<compile_context>
chip_gen: v5e
topology: v5e:2x2
jax: 0.10.0
libtpu: 0.0.40
codegen_flags: <defaults>
</compile_context>

<pallas_src>
import jax
import jax.numpy as jnp
import numpy as np
from jax.experimental import pallas as pl
from jax.experimental.pallas import tpu as pltpu


# -----------------------------------------------------------------------------
# Pallas kernel
# -----------------------------------------------------------------------------
def _tae_kernel(
    x_ref,        # (T, Bt, D_in)  f32   time-major input tile
    wih_e_ref,    # (3, D_in, H)   bf16  encoder input weights per gate (r, z, n)
    whh_e_ref,    # (3, H, H)      bf16  encoder hidden weights per gate
    bgi_e_ref,    # (3, 1, H)      f32   merged input-side biases (r,z: bih+bhh; n: bih)
    bhn_e_ref,    # (1, H)         f32   encoder bhh_n
    wc_ref,       # (H, Td)        bf16  fc_compress
    bc_ref,       # (1, Td)        f32
    wfd_r_ref,    # (T, Td, H)     bf16  fused fc_expand @ Wih_dec, r gate
    wfd_z_ref,    # (T, Td, H)     bf16
    wfd_n_ref,    # (T, Td, H)     bf16
    bfd_r_ref,    # (T, 1, H)      f32   fused biases (r,z include bhh; n: ih side only)
    bfd_z_ref,    # (T, 1, H)      f32
    bfd_n_ref,    # (T, 1, H)      f32
    whh_d_ref,    # (3, H, H)      bf16  decoder hidden weights per gate
    bhn_d_ref,    # (1, H)         f32   decoder bhh_n
    wr_ref,       # (H, D_out)     bf16  fc_reconstruct
    br_ref,       # (1, D_out)     f32
    xtilde_ref,   # (T, Bt, D_out) f32   OUT: reconstruction (time-major)
    h_out_ref,    # (Bt, Td)       f32   OUT: compressed representation
):
    T, Bt, D_in = x_ref.shape
    H = wc_ref.shape[0]
    D_out = xtilde_ref.shape[2]
    f32, bf16 = jnp.float32, jnp.bfloat16

    # ---- encoder: input projections hoisted off the serial chain (one matmul / gate) ----
    xf = x_ref[...].reshape(T * Bt, D_in).astype(bf16)
    gi_r = (jnp.dot(xf, wih_e_ref[0], preferred_element_type=f32)
            + bgi_e_ref[0]).reshape(T, Bt, H)
    gi_z = (jnp.dot(xf, wih_e_ref[1], preferred_element_type=f32)
            + bgi_e_ref[1]).reshape(T, Bt, H)
    gi_n = (jnp.dot(xf, wih_e_ref[2], preferred_element_type=f32)
            + bgi_e_ref[2]).reshape(T, Bt, H)

    whh_er, whh_ez, whh_en = whh_e_ref[0], whh_e_ref[1], whh_e_ref[2]
    bhn_e = bhn_e_ref[...]

    h = jnp.zeros((Bt, H), f32)
    for t in range(T):  # static unroll (small T); TODO(synk): lax.fori_loop for large T
        hb = h.astype(bf16)
        r = jax.nn.sigmoid(gi_r[t] + jnp.dot(hb, whh_er, preferred_element_type=f32))
        z = jax.nn.sigmoid(gi_z[t] + jnp.dot(hb, whh_ez, preferred_element_type=f32))
        n = jnp.tanh(gi_n[t]
                     + r * (jnp.dot(hb, whh_en, preferred_element_type=f32) + bhn_e))
        h = (1.0 - z) * n + z * h

    # ---- fc_compress (last hidden -> temporal representation) ----
    H_comp = jnp.dot(h.astype(bf16), wc_ref[...], preferred_element_type=f32) + bc_ref[...]
    h_out_ref[...] = H_comp

    # ---- decoder: fused (fc_expand . decoder input GEMM) computed once from H_comp ----
    hc = H_comp.astype(bf16)
    gj_r = [jnp.dot(hc, wfd_r_ref[t], preferred_element_type=f32) + bfd_r_ref[t]
            for t in range(T)]
    gj_z = [jnp.dot(hc, wfd_z_ref[t], preferred_element_type=f32) + bfd_z_ref[t]
            for t in range(T)]
    gj_n = [jnp.dot(hc, wfd_n_ref[t], preferred_element_type=f32) + bfd_n_ref[t]
            for t in range(T)]

    whh_dr, whh_dz, whh_dn = whh_d_ref[0], whh_d_ref[1], whh_d_ref[2]
    bhn_d = bhn_d_ref[...]

    hd = jnp.zeros((Bt, H), f32)
    hs = []
    for t in range(T):  # static unroll; only h @ Whh + activations on the serial chain
        hb = hd.astype(bf16)
        r = jax.nn.sigmoid(gj_r[t] + jnp.dot(hb, whh_dr, preferred_element_type=f32))
        z = jax.nn.sigmoid(gj_z[t] + jnp.dot(hb, whh_dz, preferred_element_type=f32))
        n = jnp.tanh(gj_n[t]
                     + r * (jnp.dot(hb, whh_dn, preferred_element_type=f32) + bhn_d))
        hd = (1.0 - z) * n + z * hd
        hs.append(hd)

    # ---- deferred fc_reconstruct: one batched matmul + one full-tensor store ----
    hs_all = jnp.stack(hs, axis=0).reshape(T * Bt, H).astype(bf16)
    y = jnp.dot(hs_all, wr_ref[...], preferred_element_type=f32) + br_ref[...]
    xtilde_ref[...] = y.reshape(T, Bt, D_out)


# -----------------------------------------------------------------------------
# Wrapper: gate split, bias merging, fc_expand/decoder fusion, bf16 casting,
# batch padding, time-major layout, pallas_call with a parallel batch grid.
# -----------------------------------------------------------------------------
def _round_up(a, m):
    return ((a + m - 1) // m) * m


def _split_gates(w, H):
    # columns ordered [r | z | n] (PyTorch GRU gate order)
    return w[..., 0:H], w[..., H:2 * H], w[..., 2 * H:3 * H]


def _full_spec(shape):
    return pl.BlockSpec(shape, lambda b: (0,) * len(shape))


@jax.jit
def temporal_autoencoder_forward(x, params):
    """x: (B, T, D_in) float32. Returns (X_tilde (B, T, D_in), H (B, Td))."""
    B, T, D_in = x.shape
    H = params["whh_e"].shape[0]
    Td = params["wc"].shape[1]
    D_out = params["wr"].shape[1]
    f32, bf16 = jnp.float32, jnp.bfloat16

    # ---- per-gate weight split (avoids 32-lane gate slicing in the kernel) ----
    wih_e_r, wih_e_z, wih_e_n = _split_gates(params["wih_e"], H)
    whh_e_r, whh_e_z, whh_e_n = _split_gates(params["whh_e"], H)
    bih_e_r, bih_e_z, bih_e_n = _split_gates(params["bih_e"], H)
    bhh_e_r, bhh_e_z, bhh_e_n = _split_gates(params["bhh_e"], H)
    wih_d_r, wih_d_z, wih_d_n = _split_gates(params["wih_d"], H)
    whh_d_r, whh_d_z, whh_d_n = _split_gates(params["whh_d"], H)
    bih_d_r, bih_d_z, bih_d_n = _split_gates(params["bih_d"], H)
    bhh_d_r, bhh_d_z, bhh_d_n = _split_gates(params["bhh_d"], H)

    wih_e = jnp.stack([wih_e_r, wih_e_z, wih_e_n], 0).astype(bf16)   # (3, D_in, H)
    whh_e = jnp.stack([whh_e_r, whh_e_z, whh_e_n], 0).astype(bf16)   # (3, H, H)
    bgi_e = jnp.stack([bih_e_r + bhh_e_r,                            # (3, 1, H) f32
                       bih_e_z + bhh_e_z,
                       bih_e_n], 0)
    bhn_e = bhh_e_n                                                  # (1, H)

    whh_d = jnp.stack([whh_d_r, whh_d_z, whh_d_n], 0).astype(bf16)   # (3, H, H)
    bhn_d = bhh_d_n                                                  # (1, H)

    # ---- algebraic fusion: fc_expand followed by decoder input projection ----
    #   gi_dec[g, t] = H_comp @ (wexp_t @ Wih_dec[g]) + (bexp_t @ Wih_dec[g] + bih_dec[g] (+ bhh))
    wexp3 = params["wexp"].reshape(Td, T, H)     # column block t -> decoder timestep t
    bexp2 = params["bexp"].reshape(T, H)

    def fuse(wg, big, bhg):
        wf = jnp.einsum("dth,hk->tdk", wexp3, wg)       # (T, Td, H), f32
        bf = jnp.einsum("th,hk->tk", bexp2, wg) + big   # (T, H)
        if bhg is not None:
            bf = bf + bhg
        return wf.astype(bf16), bf.reshape(T, 1, H)

    wfd_r, bfd_r = fuse(wih_d_r, bih_d_r, bhh_d_r)
    wfd_z, bfd_z = fuse(wih_d_z, bih_d_z, bhh_d_z)
    wfd_n, bfd_n = fuse(wih_d_n, bih_d_n, None)          # bhh_n stays inside r*(.)

    wc = params["wc"].astype(bf16)
    bc = params["bc"]
    wr = params["wr"].astype(bf16)
    br = params["br"]

    # ---- batch padding to a sublane-aligned tile + time-major layout ----
    Bt = 128 if B > 128 else _round_up(B, 8)
    Bp = _round_up(B, Bt)
    x_p = jnp.pad(x, ((0, Bp - B), (0, 0), (0, 0)))
    x_tm = jnp.transpose(x_p, (1, 0, 2)).astype(f32)     # (T, Bp, D_in)

    grid = (Bp // Bt,)
    in_specs = [
        pl.BlockSpec((T, Bt, D_in), lambda b: (0, b, 0)),
        _full_spec((3, D_in, H)),
        _full_spec((3, H, H)),
        _full_spec((3, 1, H)),
        _full_spec((1, H)),
        _full_spec((H, Td)),
        _full_spec((1, Td)),
        _full_spec((T, Td, H)),
        _full_spec((T, Td, H)),
        _full_spec((T, Td, H)),
        _full_spec((T, 1, H)),
        _full_spec((T, 1, H)),
        _full_spec((T, 1, H)),
        _full_spec((3, H, H)),
        _full_spec((1, H)),
        _full_spec((H, D_out)),
        _full_spec((1, D_out)),
    ]
    out_specs = (
        pl.BlockSpec((T, Bt, D_out), lambda b: (0, b, 0)),
        pl.BlockSpec((Bt, Td), lambda b: (b, 0)),
    )

    xtilde_tm, H_enc = pl.pallas_call(
        _tae_kernel,
        grid=grid,
        in_specs=in_specs,
        out_specs=out_specs,
        out_shape=(
            jax.ShapeDtypeStruct((T, Bp, D_out), f32),
            jax.ShapeDtypeStruct((Bp, Td), f32),
        ),
        compiler_params=pltpu.CompilerParams(
            dimension_semantics=("parallel",)),   # batch grid -> both TCs on v7x
    )(x_tm, wih_e, whh_e, bgi_e, bhn_e, wc, bc,
      wfd_r, wfd_z, wfd_n, bfd_r, bfd_z, bfd_n,
      whh_d, bhn_d, wr, br)

    X_tilde = jnp.transpose(xtilde_tm, (1, 0, 2))[:B]
    return X_tilde, H_enc[:B]


# -----------------------------------------------------------------------------
# Deterministic parameter initialization (nn.GRU / nn.Linear shapes, stored
# pre-transposed so the math is x @ W).
# -----------------------------------------------------------------------------
def init_params(key, input_dim, hidden_dim, temporal_dim, max_seq_len):
    ks = jax.random.split(key, 16)
    u = lambda k, shape, bound: jax.random.uniform(
        k, shape, jnp.float32, minval=-bound, maxval=bound)
    bh = 1.0 / np.sqrt(hidden_dim)
    bt = 1.0 / np.sqrt(temporal_dim)

    return {
        # encoder GRU (PyTorch weight_ih (3H, D) -> (D, 3H), gate order r|z|n)
        "wih_e": u(ks[0], (input_dim, 3 * hidden_dim), bh),
        "whh_e": u(ks[1], (hidden_dim, 3 * hidden_dim), bh),
        "bih_e": u(ks[2], (1, 3 * hidden_dim), bh),
        "bhh_e": u(ks[3], (1, 3 * hidden_dim), bh),
        # fc_compress: (Td, H) -> (H, Td)
        "wc": u(ks[4], (hidden_dim, temporal_dim), bh),
        "bc": u(ks[5], (1, temporal_dim), bh),
        # fc_expand: (T*H, Td) -> (Td, T*H)
        "wexp": u(ks[6], (temporal_dim, max_seq_len * hidden_dim), bt),
        "bexp": u(ks[7], (1, max_seq_len * hidden_dim), bt),
        # decoder GRU (input size = hidden_dim)
        "wih_d": u(ks[8], (hidden_dim, 3 * hidden_dim), bh),
        "whh_d": u(ks[9], (hidden_dim, 3 * hidden_dim), bh),
        "bih_d": u(ks[10], (1, 3 * hidden_dim), bh),
        "bhh_d": u(ks[11], (1, 3 * hidden_dim), bh),
        # fc_reconstruct: (D_out, H) -> (H, D_out)
        "wr": u(ks[12], (hidden_dim, input_dim), bh),
        "br": u(ks[13], (1, input_dim), bh),
    }


# -----------------------------------------------------------------------------
# Pure-JAX reference (unfused, same PyTorch GRU semantics). `matmul_dtype`
# optionally mirrors the kernel's bf16 MXU operand casting (f32 accumulation).
# -----------------------------------------------------------------------------
def reference_forward(x, params, matmul_dtype=jnp.float32):
    B, T, D_in = x.shape
    H = params["whh_e"].shape[0]
    md = matmul_dtype

    def mm(a, b):
        return jnp.dot(a.astype(md), b.astype(md), preferred_element_type=jnp.float32)

    def gru_cell(xt, h, wih, whh, bih, bhh):
        gi = mm(xt, wih) + bih
        gh = mm(h, whh) + bhh
        r = jax.nn.sigmoid(gi[:, 0:H] + gh[:, 0:H])
        z = jax.nn.sigmoid(gi[:, H:2 * H] + gh[:, H:2 * H])
        n = jnp.tanh(gi[:, 2 * H:3 * H] + r * gh[:, 2 * H:3 * H])
        return (1.0 - z) * n + z * h

    h = jnp.zeros((B, H), jnp.float32)
    for t in range(T):
        h = gru_cell(x[:, t, :], h, params["wih_e"], params["whh_e"],
                     params["bih_e"], params["bhh_e"])
    H_enc = mm(h, params["wc"]) + params["bc"]
    E = (mm(H_enc, params["wexp"]) + params["bexp"]).reshape(B, T, H)
    hd = jnp.zeros((B, H), jnp.float32)
    outs = []
    for t in range(T):
        hd = gru_cell(E[:, t, :], hd, params["wih_d"], params["whh_d"],
                      params["bih_d"], params["bhh_d"])
        outs.append(mm(hd, params["wr"]) + params["br"])
    return jnp.stack(outs, axis=1), H_enc


if __name__ == "__main__":
    batch = 4
    input_dim = 8
    hidden_dim = 32
    num_layers = 1          # TODO(synk): only the num_layers=1 path is implemented.
    temporal_dim = 16
    max_seq_len = 8

    key = jax.random.PRNGKey(0)
    k_x, k_p = jax.random.split(key)
    x = jax.random.normal(k_x, (batch, max_seq_len, input_dim), dtype=jnp.float32)
    params = init_params(k_p, input_dim, hidden_dim, temporal_dim, max_seq_len)

    X_tilde, H_enc = temporal_autoencoder_forward(x, params)
    jax.block_until_ready((X_tilde, H_enc))

    # Verify against a reference that uses the same bf16 MXU operand quantization
    # (remaining differences: fusion / accumulation order only).
    X_ref, H_ref = reference_forward(x, params, matmul_dtype=jnp.bfloat16)
    np.testing.assert_allclose(np.asarray(H_enc), np.asarray(H_ref), rtol=5e-2, atol=5e-2)
    np.testing.assert_allclose(np.asarray(X_tilde), np.asarray(X_ref), rtol=5e-2, atol=5e-2)

    assert X_tilde.shape == (batch, max_seq_len, input_dim)
    assert H_enc.shape == (batch, temporal_dim)
    print("KERNEL_OK")
</pallas_src>

<mosaic_0001>
module attributes {stable_mosaic.version = 11 : i64} {
  func.func @_tae_kernel(%arg0: i32, %arg1: memref<8x8x8xf32, #tpu.memory_space<vmem>>, %arg2: memref<3x8x32xbf16, #tpu.memory_space<vmem>>, %arg3: memref<3x32x32xbf16, #tpu.memory_space<vmem>>, %arg4: memref<3x1x32xf32, #tpu.memory_space<vmem>>, %arg5: memref<1x32xf32, #tpu.memory_space<vmem>>, %arg6: memref<32x16xbf16, #tpu.memory_space<vmem>>, %arg7: memref<1x16xf32, #tpu.memory_space<vmem>>, %arg8: memref<8x16x32xbf16, #tpu.memory_space<vmem>>, %arg9: memref<8x16x32xbf16, #tpu.memory_space<vmem>>, %arg10: memref<8x16x32xbf16, #tpu.memory_space<vmem>>, %arg11: memref<8x1x32xf32, #tpu.memory_space<vmem>>, %arg12: memref<8x1x32xf32, #tpu.memory_space<vmem>>, %arg13: memref<8x1x32xf32, #tpu.memory_space<vmem>>, %arg14: memref<3x32x32xbf16, #tpu.memory_space<vmem>>, %arg15: memref<1x32xf32, #tpu.memory_space<vmem>>, %arg16: memref<32x8xbf16, #tpu.memory_space<vmem>>, %arg17: memref<1x8xf32, #tpu.memory_space<vmem>>, %arg18: memref<8x8x8xf32, #tpu.memory_space<vmem>>, %arg19: memref<8x16xf32, #tpu.memory_space<vmem>>) attributes {dimension_semantics = [#tpu.dimension_semantics<parallel>], iteration_bounds = array<i64: 1>, scalar_prefetch = 0 : i64, scratch_operands = 0 : i64, tpu.core_type = #tpu.core_type<tc>, window_params = [{transform_indices = @transform_0, window_bounds = array<i64: 8, 8, 8>}, {pipeline_mode = #tpu.pipeline_mode<synchronous>, transform_indices = @transform_1, window_bounds = array<i64: 3, 8, 32>}, {pipeline_mode = #tpu.pipeline_mode<synchronous>, transform_indices = @transform_2, window_bounds = array<i64: 3, 32, 32>}, {pipeline_mode = #tpu.pipeline_mode<synchronous>, transform_indices = @transform_3, window_bounds = array<i64: 3, 1, 32>}, {pipeline_mode = #tpu.pipeline_mode<synchronous>, transform_indices = @transform_4, window_bounds = array<i64: 1, 32>}, {pipeline_mode = #tpu.pipeline_mode<synchronous>, transform_indices = @transform_5, window_bounds = array<i64: 32, 16>}, {pipeline_mode = #tpu.pipeline_mode<synchronous>, transform_indices = @transform_6, window_bounds = array<i64: 1, 16>}, {pipeline_mode = #tpu.pipeline_mode<synchronous>, transform_indices = @transform_7, window_bounds = array<i64: 8, 16, 32>}, {pipeline_mode = #tpu.pipeline_mode<synchronous>, transform_indices = @transform_8, window_bounds = array<i64: 8, 16, 32>}, {pipeline_mode = #tpu.pipeline_mode<synchronous>, transform_indices = @transform_9, window_bounds = array<i64: 8, 16, 32>}, {pipeline_mode = #tpu.pipeline_mode<synchronous>, transform_indices = @transform_10, window_bounds = array<i64: 8, 1, 32>}, {pipeline_mode = #tpu.pipeline_mode<synchronous>, transform_indices = @transform_11, window_bounds = array<i64: 8, 1, 32>}, {pipeline_mode = #tpu.pipeline_mode<synchronous>, transform_indices = @transform_12, window_bounds = array<i64: 8, 1, 32>}, {pipeline_mode = #tpu.pipeline_mode<synchronous>, transform_indices = @transform_13, window_bounds = array<i64: 3, 32, 32>}, {pipeline_mode = #tpu.pipeline_mode<synchronous>, transform_indices = @transform_14, window_bounds = array<i64: 1, 32>}, {pipeline_mode = #tpu.pipeline_mode<synchronous>, transform_indices = @transform_15, window_bounds = array<i64: 32, 8>}, {pipeline_mode = #tpu.pipeline_mode<synchronous>, transform_indices = @transform_16, window_bounds = array<i64: 1, 8>}, {transform_indices = @transform_17, window_bounds = array<i64: 8, 8, 8>}, {transform_indices = @transform_18, window_bounds = array<i64: 8, 16>}]} {
    %c0 = arith.constant 0 : index
    %c0_0 = arith.constant 0 : index
    %c0_1 = arith.constant 0 : index
    %0 = vector.load %arg1[%c0, %c0_0, %c0_1] : memref<8x8x8xf32, #tpu.memory_space<vmem>>, vector<8x8x8xf32>
    %1 = vector.shape_cast %0 : vector<8x8x8xf32> to vector<64x8xf32>
    %2 = arith.truncf %1 : vector<64x8xf32> to vector<64x8xbf16>
    %c0_2 = arith.constant 0 : index
    %c0_3 = arith.constant 0 : index
    %c0_4 = arith.constant 0 : index
    %3 = vector.load %arg2[%c0_2, %c0_3, %c0_4] : memref<3x8x32xbf16, #tpu.memory_space<vmem>>, vector<1x8x32xbf16>
    %4 = vector.shape_cast %3 : vector<1x8x32xbf16> to vector<8x32xbf16>
    %cst = arith.constant dense<0.000000e+00> : vector<64x32xf32>
    %5 = tpu.matmul %2, %4, %cst {dimension_numbers = #tpu.dot_dimension_numbers<[1], [0], [0], [1], [0, 0, 1, 1], [], []>} : vector<64x8xbf16>, vector<8x32xbf16>, vector<64x32xf32> -> vector<64x32xf32>
    %c0_5 = arith.constant 0 : index
    %c0_6 = arith.constant 0 : index
    %c0_7 = arith.constant 0 : index
    %6 = vector.load %arg4[%c0_5, %c0_6, %c0_7] : memref<3x1x32xf32, #tpu.memory_space<vmem>>, vector<1x1x32xf32>
    %7 = vector.shape_cast %6 : vector<1x1x32xf32> to vector<1x32xf32>
    %8 = vector.broadcast %7 : vector<1x32xf32> to vector<64x32xf32>
    %9 = arith.addf %5, %8 : vector<64x32xf32>
    %10 = vector.shape_cast %9 : vector<64x32xf32> to vector<8x8x32xf32>
    %c1 = arith.constant 1 : index
    %c0_8 = arith.constant 0 : index
    %c0_9 = arith.constant 0 : index
    %11 = vector.load %arg2[%c1, %c0_8, %c0_9] : memref<3x8x32xbf16, #tpu.memory_space<vmem>>, vector<1x8x32xbf16>
    %12 = vector.shape_cast %11 : vector<1x8x32xbf16> to vector<8x32xbf16>
    %cst_10 = arith.constant dense<0.000000e+00> : vector<64x32xf32>
    %13 = tpu.matmul %2, %12, %cst_10 {dimension_numbers = #tpu.dot_dimension_numbers<[1], [0], [0], [1], [0, 0, 1, 1], [], []>} : vector<64x8xbf16>, vector<8x32xbf16>, vector<64x32xf32> -> vector<64x32xf32>
    %c1_11 = arith.constant 1 : index
    %c0_12 = arith.constant 0 : index
    %c0_13 = arith.constant 0 : index
    %14 = vector.load %arg4[%c1_11, %c0_12, %c0_13] : memref<3x1x32xf32, #tpu.memory_space<vmem>>, vector<1x1x32xf32>
    %15 = vector.shape_cast %14 : vector<1x1x32xf32> to vector<1x32xf32>
    %16 = vector.broadcast %15 : vector<1x32xf32> to vector<64x32xf32>
    %17 = arith.addf %13, %16 : vector<64x32xf32>
    %18 = vector.shape_cast %17 : vector<64x32xf32> to vector<8x8x32xf32>
    %c2 = arith.constant 2 : index
    %c0_14 = arith.constant 0 : index
    %c0_15 = arith.constant 0 : index
    %19 = vector.load %arg2[%c2, %c0_14, %c0_15] : memref<3x8x32xbf16, #tpu.memory_space<vmem>>, vector<1x8x32xbf16>
    %20 = vector.shape_cast %19 : vector<1x8x32xbf16> to vector<8x32xbf16>
    %cst_16 = arith.constant dense<0.000000e+00> : vector<64x32xf32>
    %21 = tpu.matmul %2, %20, %cst_16 {dimension_numbers = #tpu.dot_dimension_numbers<[1], [0], [0], [1], [0, 0, 1, 1], [], []>} : vector<64x8xbf16>, vector<8x32xbf16>, vector<64x32xf32> -> vector<64x32xf32>
    %c2_17 = arith.constant 2 : index
    %c0_18 = arith.constant 0 : index
    %c0_19 = arith.constant 0 : index
    %22 = vector.load %arg4[%c2_17, %c0_18, %c0_19] : memref<3x1x32xf32, #tpu.memory_space<vmem>>, vector<1x1x32xf32>
    %23 = vector.shape_cast %22 : vector<1x1x32xf32> to vector<1x32xf32>
    %24 = vector.broadcast %23 : vector<1x32xf32> to vector<64x32xf32>
    %25 = arith.addf %21, %24 : vector<64x32xf32>
    %26 = vector.shape_cast %25 : vector<64x32xf32> to vector<8x8x32xf32>
    %c0_20 = arith.constant 0 : index
    %c0_21 = arith.constant 0 : index
    %c0_22 = arith.constant 0 : index
    %27 = vector.load %arg3[%c0_20, %c0_21, %c0_22] : memref<3x32x32xbf16, #tpu.memory_space<vmem>>, vector<1x32x32xbf16>
    %28 = vector.shape_cast %27 : vector<1x32x32xbf16> to vector<32x32xbf16>
    %c1_23 = arith.constant 1 : index
    %c0_24 = arith.constant 0 : index
    %c0_25 = arith.constant 0 : index
    %29 = vector.load %arg3[%c1_23, %c0_24, %c0_25] : memref<3x32x32xbf16, #tpu.memory_space<vmem>>, vector<1x32x32xbf16>
    %30 = vector.shape_cast %29 : vector<1x32x32xbf16> to vector<32x32xbf16>
    %c2_26 = arith.constant 2 : index
    %c0_27 = arith.constant 0 : index
    %c0_28 = arith.constant 0 : index
    %31 = vector.load %arg3[%c2_26, %c0_27, %c0_28] : memref<3x32x32xbf16, #tpu.memory_space<vmem>>, vector<1x32x32xbf16>
    %32 = vector.shape_cast %31 : vector<1x32x32xbf16> to vector<32x32xbf16>
    %c0_29 = arith.constant 0 : index
    %c0_30 = arith.constant 0 : index
    %33 = vector.load %arg5[%c0_29, %c0_30] : memref<1x32xf32, #tpu.memory_space<vmem>>, vector<1x32xf32>
    %cst_31 = arith.constant 0.000000e+00 : f32
    %34 = vector.broadcast %cst_31 : f32 to vector<8x32xf32>
    %35 = arith.truncf %34 : vector<8x32xf32> to vector<8x32xbf16>
    %36 = vector.extract_strided_slice %10 {offsets = [0, 0, 0], sizes = [1, 8, 32], strides = [1, 1, 1]} : vector<8x8x32xf32> to vector<1x8x32xf32>
    %37 = vector.shape_cast %36 : vector<1x8x32xf32> to vector<8x32xf32>
    %cst_32 = arith.constant dense<0.000000e+00> : vector<8x32xf32>
    %38 = tpu.matmul %35, %28, %cst_32 {dimension_numbers = #tpu.dot_dimension_numbers<[1], [0], [0], [1], [0, 0, 1, 1], [], []>} : vector<8x32xbf16>, vector<32x32xbf16>, vector<8x32xf32> -> vector<8x32xf32>
    %39 = arith.addf %37, %38 : vector<8x32xf32>
    %40 = arith.negf %39 : vector<8x32xf32>
    %41 = math.exp %40 : vector<8x32xf32>
    %cst_33 = arith.constant 1.000000e+00 : f32
    %42 = vector.broadcast %cst_33 : f32 to vector<8x32xf32>
    %43 = arith.addf %42, %41 : vector<8x32xf32>
    %44 = arith.divf %42, %43 : vector<8x32xf32>
    %45 = vector.extract_strided_slice %18 {offsets = [0, 0, 0], sizes = [1, 8, 32], strides = [1, 1, 1]} : vector<8x8x32xf32> to vector<1x8x32xf32>
    %46 = vector.shape_cast %45 : vector<1x8x32xf32> to vector<8x32xf32>
    %cst_34 = arith.constant dense<0.000000e+00> : vector<8x32xf32>
    %47 = tpu.matmul %35, %30, %cst_34 {dimension_numbers = #tpu.dot_dimension_numbers<[1], [0], [0], [1], [0, 0, 1, 1], [], []>} : vector<8x32xbf16>, vector<32x32xbf16>, vector<8x32xf32> -> vector<8x32xf32>
    %48 = arith.addf %46, %47 : vector<8x32xf32>
    %49 = arith.negf %48 : vector<8x32xf32>
    %50 = math.exp %49 : vector<8x32xf32>
    %cst_35 = arith.constant 1.000000e+00 : f32
    %51 = vector.broadcast %cst_35 : f32 to vector<8x32xf32>
    %52 = arith.addf %51, %50 : vector<8x32xf32>
    %53 = arith.divf %51, %52 : vector<8x32xf32>
    %54 = vector.extract_strided_slice %26 {offsets = [0, 0, 0], sizes = [1, 8, 32], strides = [1, 1, 1]} : vector<8x8x32xf32> to vector<1x8x32xf32>
    %55 = vector.shape_cast %54 : vector<1x8x32xf32> to vector<8x32xf32>
    %cst_36 = arith.constant dense<0.000000e+00> : vector<8x32xf32>
    %56 = tpu.matmul %35, %32, %cst_36 {dimension_numbers = #tpu.dot_dimension_numbers<[1], [0], [0], [1], [0, 0, 1, 1], [], []>} : vector<8x32xbf16>, vector<32x32xbf16>, vector<8x32xf32> -> vector<8x32xf32>
    %57 = vector.broadcast %33 : vector<1x32xf32> to vector<8x32xf32>
    %58 = arith.addf %56, %57 : vector<8x32xf32>
    %59 = arith.mulf %44, %58 : vector<8x32xf32>
    %60 = arith.addf %55, %59 : vector<8x32xf32>
    %61 = math.tanh %60 : vector<8x32xf32>
    %cst_37 = arith.constant 1.000000e+00 : f32
    %62 = vector.broadcast %cst_37 : f32 to vector<8x32xf32>
    %63 = arith.subf %62, %53 : vector<8x32xf32>
    %64 = arith.mulf %63, %61 : vector<8x32xf32>
    %65 = arith.mulf %53, %34 : vector<8x32xf32>
    %66 = arith.addf %64, %65 : vector<8x32xf32>
    %67 = arith.truncf %66 : vector<8x32xf32> to vector<8x32xbf16>
    %68 = vector.extract_strided_slice %10 {offsets = [1, 0, 0], sizes = [1, 8, 32], strides = [1, 1, 1]} : vector<8x8x32xf32> to vector<1x8x32xf32>
    %69 = vector.shape_cast %68 : vector<1x8x32xf32> to vector<8x32xf32>
    %cst_38 = arith.constant dense<0.000000e+00> : vector<8x32xf32>
    %70 = tpu.matmul %67, %28, %cst_38 {dimension_numbers = #tpu.dot_dimension_numbers<[1], [0], [0], [1], [0, 0, 1, 1], [], []>} : vector<8x32xbf16>, vector<32x32xbf16>, vector<8x32xf32> -> vector<8x32xf32>
    %71 = arith.addf %69, %70 : vector<8x32xf32>
    %72 = arith.negf %71 : vector<8x32xf32>
    %73 = math.exp %72 : vector<8x32xf32>
    %cst_39 = arith.constant 1.000000e+00 : f32
    %74 = vector.broadcast %cst_39 : f32 to vector<8x32xf32>
    %75 = arith.addf %74, %73 : vector<8x32xf32>
    %76 = arith.divf %74, %75 : vector<8x32xf32>
    %77 = vector.extract_strided_slice %18 {offsets = [1, 0, 0], sizes = [1, 8, 32], strides = [1, 1, 1]} : vector<8x8x32xf32> to vector<1x8x32xf32>
    %78 = vector.shape_cast %77 : vector<1x8x32xf32> to vector<8x32xf32>
    %cst_40 = arith.constant dense<0.000000e+00> : vector<8x32xf32>
    %79 = tpu.matmul %67, %30, %cst_40 {dimension_numbers = #tpu.dot_dimension_numbers<[1], [0], [0], [1], [0, 0, 1, 1], [], []>} : vector<8x32xbf16>, vector<32x32xbf16>, vector<8x32xf32> -> vector<8x32xf32>
    %80 = arith.addf %78, %79 : vector<8x32xf32>
    %81 = arith.negf %80 : vector<8x32xf32>
    %82 = math.exp %81 : vector<8x32xf32>
    %cst_41 = arith.constant 1.000000e+00 : f32
    %83 = vector.broadcast %cst_41 : f32 to vector<8x32xf32>
    %84 = arith.addf %83, %82 : vector<8x32xf32>
    %85 = arith.divf %83, %84 : vector<8x32xf32>
    %86 = vector.extract_strided_slice %26 {offsets = [1, 0, 0], sizes = [1, 8, 32], strides = [1, 1, 1]} : vector<8x8x32xf32> to vector<1x8x32xf32>
    %87 = vector.shape_cast %86 : vector<1x8x32xf32> to vector<8x32xf32>
    %cst_42 = arith.constant dense<0.000000e+00> : vector<8x32xf32>
    %88 = tpu.matmul %67, %32, %cst_42 {dimension_numbers = #tpu.dot_dimension_numbers<[1], [0], [0], [1], [0, 0, 1, 1], [], []>} : vector<8x32xbf16>, vector<32x32xbf16>, vector<8x32xf32> -> vector<8x32xf32>
    %89 = vector.broadcast %33 : vector<1x32xf32> to vector<8x32xf32>
    %90 = arith.addf %88, %89 : vector<8x32xf32>
    %91 = arith.mulf %76, %90 : vector<8x32xf32>
    %92 = arith.addf %87, %91 : vector<8x32xf32>
    %93 = math.tanh %92 : vector<8x32xf32>
    %cst_43 = arith.constant 1.000000e+00 : f32
    %94 = vector.broadcast %cst_43 : f32 to vector<8x32xf32>
    %95 = arith.subf %94, %85 : vector<8x32xf32>
    %96 = arith.mulf %95, %93 : vector<8x32xf32>
    %97 = arith.mulf %85, %66 : vector<8x32xf32>
    %98 = arith.addf %96, %97 : vector<8x32xf32>
    %99 = arith.truncf %98 : vector<8x32xf32> to vector<8x32xbf16>
    %100 = vector.extract_strided_slice %10 {offsets = [2, 0, 0], sizes = [1, 8, 32], strides = [1, 1, 1]} : vector<8x8x32xf32> to vector<1x8x32xf32>
    %101 = vector.shape_cast %100 : vector<1x8x32xf32> to vector<8x32xf32>
    %cst_44 = arith.constant dense<0.000000e+00> : vector<8x32xf32>
    %102 = tpu.matmul %99, %28, %cst_44 {dimension_numbers = #tpu.dot_dimension_numbers<[1], [0], [0], [1], [0, 0, 1, 1], [], []>} : vector<8x32xbf16>, vector<32x32xbf16>, vector<8x32xf32> -> vector<8x32xf32>
    %103 = arith.addf %101, %102 : vector<8x32xf32>
    %104 = arith.negf %103 : vector<8x32xf32>
    %105 = math.exp %104 : vector<8x32xf32>
    %cst_45 = arith.constant 1.000000e+00 : f32
    %106 = vector.broadcast %cst_45 : f32 to vector<8x32xf32>
    %107 = arith.addf %106, %105 : vector<8x32xf32>
    %108 = arith.divf %106, %107 : vector<8x32xf32>
    %109 = vector.extract_strided_slice %18 {offsets = [2, 0, 0], sizes = [1, 8, 32], strides = [1, 1, 1]} : vector<8x8x32xf32> to vector<1x8x32xf32>
    %110 = vector.shape_cast %109 : vector<1x8x32xf32> to vector<8x32xf32>
    %cst_46 = arith.constant dense<0.000000e+00> : vector<8x32xf32>
    %111 = tpu.matmul %99, %30, %cst_46 {dimension_numbers = #tpu.dot_dimension_numbers<[1], [0], [0], [1], [0, 0, 1, 1], [], []>} : vector<8x32xbf16>, vector<32x32xbf16>, vector<8x32xf32> -> vector<8x32xf32>
    %112 = arith.addf %110, %111 : vector<8x32xf32>
    %113 = arith.negf %112 : vector<8x32xf32>
    %114 = math.exp %113 : vector<8x32xf32>
    %cst_47 = arith.constant 1.000000e+00 : f32
    %115 = vector.broadcast %cst_47 : f32 to vector<8x32xf32>
    %116 = arith.addf %115, %114 : vector<8x32xf32>
    %117 = arith.divf %115, %116 : vector<8x32xf32>
    %118 = vector.extract_strided_slice %26 {offsets = [2, 0, 0], sizes = [1, 8, 32], strides = [1, 1, 1]} : vector<8x8x32xf32> to vector<1x8x32xf32>
    %119 = vector.shape_cast %118 : vector<1x8x32xf32> to vector<8x32xf32>
    %cst_48 = arith.constant dense<0.000000e+00> : vector<8x32xf32>
    %120 = tpu.matmul %99, %32, %cst_48 {dimension_numbers = #tpu.dot_dimension_numbers<[1], [0], [0], [1], [0, 0, 1, 1], [], []>} : vector<8x32xbf16>, vector<32x32xbf16>, vector<8x32xf32> -> vector<8x32xf32>
    %121 = vector.broadcast %33 : vector<1x32xf32> to vector<8x32xf32>
    %122 = arith.addf %120, %121 : vector<8x32xf32>
    %123 = arith.mulf %108, %122 : vector<8x32xf32>
    %124 = arith.addf %119, %123 : vector<8x32xf32>
    %125 = math.tanh %124 : vector<8x32xf32>
    %cst_49 = arith.constant 1.000000e+00 : f32
    %126 = vector.broadcast %cst_49 : f32 to vector<8x32xf32>
    %127 = arith.subf %126, %117 : vector<8x32xf32>
    %128 = arith.mulf %127, %125 : vector<8x32xf32>
    %129 = arith.mulf %117, %98 : vector<8x32xf32>
    %130 = arith.addf %128, %129 : vector<8x32xf32>
    %131 = arith.truncf %130 : vector<8x32xf32> to vector<8x32xbf16>
    %132 = vector.extract_strided_slice %10 {offsets = [3, 0, 0], sizes = [1, 8, 32], strides = [1, 1, 1]} : vector<8x8x32xf32> to vector<1x8x32xf32>
    %133 = vector.shape_cast %132 : vector<1x8x32xf32> to vector<8x32xf32>
    %cst_50 = arith.constant dense<0.000000e+00> : vector<8x32xf32>
    %134 = tpu.matmul %131, %28, %cst_50 {dimension_numbers = #tpu.dot_dimension_numbers<[1], [0], [0], [1], [0, 0, 1, 1], [], []>} : vector<8x32xbf16>, vector<32x32xbf16>, vector<8x32xf32> -> vector<8x32xf32>
    %135 = arith.addf %133, %134 : vector<8x32xf32>
    %136 = arith.negf %135 : vector<8x32xf32>
    %137 = math.exp %136 : vector<8x32xf32>
    %cst_51 = arith.constant 1.000000e+00 : f32
    %138 = vector.broadcast %cst_51 : f32 to vector<8x32xf32>
    %139 = arith.addf %138, %137 : vector<8x32xf32>
    %140 = arith.divf %138, %139 : vector<8x32xf32>
    %141 = vector.extract_strided_slice %18 {offsets = [3, 0, 0], sizes = [1, 8, 32], strides = [1, 1, 1]} : vector<8x8x32xf32> to vector<1x8x32xf32>
    %142 = vector.shape_cast %141 : vector<1x8x32xf32> to vector<8x32xf32>
    %cst_52 = arith.constant dense<0.000000e+00> : vector<8x32xf32>
    %143 = tpu.matmul %131, %30, %cst_52 {dimension_numbers = #tpu.dot_dimension_numbers<[1], [0], [0], [1], [0, 0, 1, 1], [], []>} : vector<8x32xbf16>, vector<32x32xbf16>, vector<8x32xf32> -> vector<8x32xf32>
    %144 = arith.addf %142, %143 : vector<8x32xf32>
    %145 = arith.negf %144 : vector<8x32xf32>
    %146 = math.exp %145 : vector<8x32xf32>
    %cst_53 = arith.constant 1.000000e+00 : f32
    %147 = vector.broadcast %cst_53 : f32 to vector<8x32xf32>
    %148 = arith.addf %147, %146 : vector<8x32xf32>
    %149 = arith.divf %147, %148 : vector<8x32xf32>
    %150 = vector.extract_strided_slice %26 {offsets = [3, 0, 0], sizes = [1, 8, 32], strides = [1, 1, 1]} : vector<8x8x32xf32> to vector<1x8x32xf32>
    %151 = vector.shape_cast %150 : vector<1x8x32xf32> to vector<8x32xf32>
    %cst_54 = arith.constant dense<0.000000e+00> : vector<8x32xf32>
    %152 = tpu.matmul %131, %32, %cst_54 {dimension_numbers = #tpu.dot_dimension_numbers<[1], [0], [0], [1], [0, 0, 1, 1], [], []>} : vector<8x32xbf16>, vector<32x32xbf16>, vector<8x32xf32> -> vector<8x32xf32>
    %153 = vector.broadcast %33 : vector<1x32xf32> to vector<8x32xf32>
    %154 = arith.addf %152, %153 : vector<8x32xf32>
    %155 = arith.mulf %140, %154 : vector<8x32xf32>
    %156 = arith.addf %151, %155 : vector<8x32xf32>
    %157 = math.tanh %156 : vector<8x32xf32>
    %cst_55 = arith.constant 1.000000e+00 : f32
    %158 = vector.broadcast %cst_55 : f32 to vector<8x32xf32>
    %159 = arith.subf %158, %149 : vector<8x32xf32>
    %160 = arith.mulf %159, %157 : vector<8x32xf32>
    %161 = arith.mulf %149, %130 : vector<8x32xf32>
    %162 = arith.addf %160, %161 : vector<8x32xf32>
    %163 = arith.truncf %162 : vector<8x32xf32> to vector<8x32xbf16>
    %164 = vector.extract_strided_slice %10 {offsets = [4, 0, 0], sizes = [1, 8, 32], strides = [1, 1, 1]} : vector<8x8x32xf32> to vector<1x8x32xf32>
    %165 = vector.shape_cast %164 : vector<1x8x32xf32> to vector<8x32xf32>
    %cst_56 = arith.constant dense<0.000000e+00> : vector<8x32xf32>
    %166 = tpu.matmul %163, %28, %cst_56 {dimension_numbers = #tpu.dot_dimension_numbers<[1], [0], [0], [1], [0, 0, 1, 1], [], []>} : vector<8x32xbf16>, vector<32x32xbf16>, vector<8x32xf32> -> vector<8x32xf32>
    %167 = arith.addf %165, %166 : vector<8x32xf32>
    %168 = arith.negf %167 : vector<8x32xf32>
    %169 = math.exp %168 : vector<8x32xf32>
    %cst_57 = arith.constant 1.000000e+00 : f32
    %170 = vector.broadcast %cst_57 : f32 to vector<8x32xf32>
    %171 = arith.addf %170, %169 : vector<8x32xf32>
    %172 = arith.divf %170, %171 : vector<8x32xf32>
    %173 = vector.extract_strided_slice %18 {offsets = [4, 0, 0], sizes = [1, 8, 32], strides = [1, 1, 1]} : vector<8x8x32xf32> to vector<1x8x32xf32>
    %174 = vector.shape_cast %173 : vector<1x8x32xf32> to vector<8x32xf32>
    %cst_58 = arith.constant dense<0.000000e+00> : vector<8x32xf32>
    %175 = tpu.matmul %163, %30, %cst_58 {dimension_numbers = #tpu.dot_dimension_numbers<[1], [0], [0], [1], [0, 0, 1, 1], [], []>} : vector<8x32xbf16>, vector<32x32xbf16>, vector<8x32xf32> -> vector<8x32xf32>
    %176 = arith.addf %174, %175 : vector<8x32xf32>
    %177 = arith.negf %176 : vector<8x32xf32>
    %178 = math.exp %177 : vector<8x32xf32>
    %cst_59 = arith.constant 1.000000e+00 : f32
    %179 = vector.broadcast %cst_59 : f32 to vector<8x32xf32>
    %180 = arith.addf %179, %178 : vector<8x32xf32>
    %181 = arith.divf %179, %180 : vector<8x32xf32>
    %182 = vector.extract_strided_slice %26 {offsets = [4, 0, 0], sizes = [1, 8, 32], strides = [1, 1, 1]} : vector<8x8x32xf32> to vector<1x8x32xf32>
    %183 = vector.shape_cast %182 : vector<1x8x32xf32> to vector<8x32xf32>
    %cst_60 = arith.constant dense<0.000000e+00> : vector<8x32xf32>
    %184 = tpu.matmul %163, %32, %cst_60 {dimension_numbers = #tpu.dot_dimension_numbers<[1], [0], [0], [1], [0, 0, 1, 1], [], []>} : vector<8x32xbf16>, vector<32x32xbf16>, vector<8x32xf32> -> vector<8x32xf32>
    %185 = vector.broadcast %33 : vector<1x32xf32> to vector<8x32xf32>
    %186 = arith.addf %184, %185 : vector<8x32xf32>
    %187 = arith.mulf %172, %186 : vector<8x32xf32>
    %188 = arith.addf %183, %187 : vector<8x32xf32>
    %189 = math.tanh %188 : vector<8x32xf32>
    %cst_61 = arith.constant 1.000000e+00 : f32
    %190 = vector.broadcast %cst_61 : f32 to vector<8x32xf32>
    %191 = arith.subf %190, %181 : vector<8x32xf32>
    %192 = arith.mulf %191, %189 : vector<8x32xf32>
    %193 = arith.mulf %181, %162 : vector<8x32xf32>
    %194 = arith.addf %192, %193 : vector<8x32xf32>
    %195 = arith.truncf %194 : vector<8x32xf32> to vector<8x32xbf16>
    %196 = vector.extract_strided_slice %10 {offsets = [5, 0, 0], sizes = [1, 8, 32], strides = [1, 1, 1]} : vector<8x8x32xf32> to vector<1x8x32xf32>
    %197 = vector.shape_cast %196 : vector<1x8x32xf32> to vector<8x32xf32>
    %cst_62 = arith.constant dense<0.000000e+00> : vector<8x32xf32>
    %198 = tpu.matmul %195, %28, %cst_62 {dimension_numbers = #tpu.dot_dimension_numbers<[1], [0], [0], [1], [0, 0, 1, 1], [], []>} : vector<8x32xbf16>, vector<32x32xbf16>, vector<8x32xf32> -> vector<8x32xf32>
    %199 = arith.addf %197, %198 : vector<8x32xf32>
    %200 = arith.negf %199 : vector<8x32xf32>
    %201 = math.exp %200 : vector<8x32xf32>
    %cst_63 = arith.constant 1.000000e+00 : f32
    %202 = vector.broadcast %cst_63 : f32 to vector<8x32xf32>
    %203 = arith.addf %202, %201 : vector<8x32xf32>
    %204 = arith.divf %202, %203 : vector<8x32xf32>
    %205 = vector.extract_strided_slice %18 {offsets = [5, 0, 0], sizes = [1, 8, 32], strides = [1, 1, 1]} : vector<8x8x32xf32> to vector<1x8x32xf32>
    %206 = vector.shape_cast %205 : vector<1x8x32xf32> to vector<8x32xf32>
    %cst_64 = arith.constant dense<0.000000e+00> : vector<8x32xf32>
    %207 = tpu.matmul %195, %30, %cst_64 {dimension_numbers = #tpu.dot_dimension_numbers<[1], [0], [0], [1], [0, 0, 1, 1], [], []>} : vector<8x32xbf16>, vector<32x32xbf16>, vector<8x32xf32> -> vector<8x32xf32>
    %208 = arith.addf %206, %207 : vector<8x32xf32>
    %209 = arith.negf %208 : vector<8x32xf32>
    %210 = math.exp %209 : vector<8x32xf32>
    %cst_65 = arith.constant 1.000000e+00 : f32
    %211 = vector.broadcast %cst_65 : f32 to vector<8x32xf32>
    %212 = arith.addf %211, %210 : vector<8x32xf32>
    %213 = arith.divf %211, %212 : vector<8x32xf32>
    %214 = vector.extract_strided_slice %26 {offsets = [5, 0, 0], sizes = [1, 8, 32], strides = [1, 1, 1]} : vector<8x8x32xf32> to vector<1x8x32xf32>
    %215 = vector.shape_cast %214 : vector<1x8x32xf32> to vector<8x32xf32>
    %cst_66 = arith.constant dense<0.000000e+00> : vector<8x32xf32>
    %216 = tpu.matmul %195, %32, %cst_66 {dimension_numbers = #tpu.dot_dimension_numbers<[1], [0], [0], [1], [0, 0, 1, 1], [], []>} : vector<8x32xbf16>, vector<32x32xbf16>, vector<8x32xf32> -> vector<8x32xf32>
    %217 = vector.broadcast %33 : vector<1x32xf32> to vector<8x32xf32>
    %218 = arith.addf %216, %217 : vector<8x32xf32>
    %219 = arith.mulf %204, %218 : vector<8x32xf32>
    %220 = arith.addf %215, %219 : vector<8x32xf32>
    %221 = math.tanh %220 : vector<8x32xf32>
    %cst_67 = arith.constant 1.000000e+00 : f32
    %222 = vector.broadcast %cst_67 : f32 to vector<8x32xf32>
    %223 = arith.subf %222, %213 : vector<8x32xf32>
    %224 = arith.mulf %223, %221 : vector<8x32xf32>
    %225 = arith.mulf %213, %194 : vector<8x32xf32>
    %226 = arith.addf %224, %225 : vector<8x32xf32>
    %227 = arith.truncf %226 : vector<8x32xf32> to vector<8x32xbf16>
    %228 = vector.extract_strided_slice %10 {offsets = [6, 0, 0], sizes = [1, 8, 32], strides = [1, 1, 1]} : vector<8x8x32xf32> to vector<1x8x32xf32>
    %229 = vector.shape_cast %228 : vector<1x8x32xf32> to vector<8x32xf32>
    %cst_68 = arith.constant dense<0.000000e+00> : vector<8x32xf32>
    %230 = tpu.matmul %227, %28, %cst_68 {dimension_numbers = #tpu.dot_dimension_numbers<[1], [0], [0], [1], [0, 0, 1, 1], [], []>} : vector<8x32xbf16>, vector<32x32xbf16>, vector<8x32xf32> -> vector<8x32xf32>
    %231 = arith.addf %229, %230 : vector<8x32xf32>
    %232 = arith.negf %231 : vector<8x32xf32>
    %233 = math.exp %232 : vector<8x32xf32>
    %cst_69 = arith.constant 1.000000e+00 : f32
    %234 = vector.broadcast %cst_69 : f32 to vector<8x32xf32>
    %235 = arith.addf %234, %233 : vector<8x32xf32>
    %236 = arith.divf %234, %235 : vector<8x32xf32>
    %237 = vector.extract_strided_slice %18 {offsets = [6, 0, 0], sizes = [1, 8, 32], strides = [1, 1, 1]} : vector<8x8x32xf32> to vector<1x8x32xf32>
    %238 = vector.shape_cast %237 : vector<1x8x32xf32> to vector<8x32xf32>
    %cst_70 = arith.constant dense<0.000000e+00> : vector<8x32xf32>
    %239 = tpu.matmul %227, %30, %cst_70 {dimension_numbers = #tpu.dot_dimension_numbers<[1], [0], [0], [1], [0, 0, 1, 1], [], []>} : vector<8x32xbf16>, vector<32x32xbf16>, vector<8x32xf32> -> vector<8x32xf32>
    %240 = arith.addf %238, %239 : vector<8x32xf32>
    %241 = arith.negf %240 : vector<8x32xf32>
    %242 = math.exp %241 : vector<8x32xf32>
    %cst_71 = arith.constant 1.000000e+00 : f32
    %243 = vector.broadcast %cst_71 : f32 to vector<8x32xf32>
    %244 = arith.addf %243, %242 : vector<8x32xf32>
    %245 = arith.divf %243, %244 : vector<8x32xf32>
    %246 = vector.extract_strided_slice %26 {offsets = [6, 0, 0], sizes = [1, 8, 32], strides = [1, 1, 1]} : vector<8x8x32xf32> to vector<1x8x32xf32>
    %247 = vector.shape_cast %246 : vector<1x8x32xf32> to vector<8x32xf32>
    %cst_72 = arith.constant dense<0.000000e+00> : vector<8x32xf32>
    %248 = tpu.matmul %227, %32, %cst_72 {dimension_numbers = #tpu.dot_dimension_numbers<[1], [0], [0], [1], [0, 0, 1, 1], [], []>} : vector<8x32xbf16>, vector<32x32xbf16>, vector<8x32xf32> -> vector<8x32xf32>
    %249 = vector.broadcast %33 : vector<1x32xf32> to vector<8x32xf32>
    %250 = arith.addf %248, %249 : vector<8x32xf32>
    %251 = arith.mulf %236, %250 : vector<8x32xf32>
    %252 = arith.addf %247, %251 : vector<8x32xf32>
    %253 = math.tanh %252 : vector<8x32xf32>
    %cst_73 = arith.constant 1.000000e+00 : f32
    %254 = vector.broadcast %cst_73 : f32 to vector<8x32xf32>
    %255 = arith.subf %254, %245 : vector<8x32xf32>
    %256 = arith.mulf %255, %253 : vector<8x32xf32>
    %257 = arith.mulf %245, %226 : vector<8x32xf32>
    %258 = arith.addf %256, %257 : vector<8x32xf32>
    %259 = arith.truncf %258 : vector<8x32xf32> to vector<8x32xbf16>
    %260 = vector.extract_strided_slice %10 {offsets = [7, 0, 0], sizes = [1, 8, 32], strides = [1, 1, 1]} : vector<8x8x32xf32> to vector<1x8x32xf32>
    %261 = vector.shape_cast %260 : vector<1x8x32xf32> to vector<8x32xf32>
    %cst_74 = arith.constant dense<0.000000e+00> : vector<8x32xf32>
    %262 = tpu.matmul %259, %28, %cst_74 {dimension_numbers = #tpu.dot_dimension_numbers<[1], [0], [0], [1], [0, 0, 1, 1], [], []>} : vector<8x32xbf16>, vector<32x32xbf16>, vector<8x32xf32> -> vector<8x32xf32>
    %263 = arith.addf %261, %262 : vector<8x32xf32>
    %264 = arith.negf %263 : vector<8x32xf32>
    %265 = math.exp %264 : vector<8x32xf32>
    %cst_75 = arith.constant 1.000000e+00 : f32
    %266 = vector.broadcast %cst_75 : f32 to vector<8x32xf32>
    %267 = arith.addf %266, %265 : vector<8x32xf32>
    %268 = arith.divf %266, %267 : vector<8x32xf32>
    %269 = vector.extract_strided_slice %18 {offsets = [7, 0, 0], sizes = [1, 8, 32], strides = [1, 1, 1]} : vector<8x8x32xf32> to vector<1x8x32xf32>
    %270 = vector.shape_cast %269 : vector<1x8x32xf32> to vector<8x32xf32>
    %cst_76 = arith.constant dense<0.000000e+00> : vector<8x32xf32>
    %271 = tpu.matmul %259, %30, %cst_76 {dimension_numbers = #tpu.dot_dimension_numbers<[1], [0], [0], [1], [0, 0, 1, 1], [], []>} : vector<8x32xbf16>, vector<32x32xbf16>, vector<8x32xf32> -> vector<8x32xf32>
    %272 = arith.addf %270, %271 : vector<8x32xf32>
    %273 = arith.negf %272 : vector<8x32xf32>
    %274 = math.exp %273 : vector<8x32xf32>
    %cst_77 = arith.constant 1.000000e+00 : f32
    %275 = vector.broadcast %cst_77 : f32 to vector<8x32xf32>
    %276 = arith.addf %275, %274 : vector<8x32xf32>
    %277 = arith.divf %275, %276 : vector<8x32xf32>
    %278 = vector.extract_strided_slice %26 {offsets = [7, 0, 0], sizes = [1, 8, 32], strides = [1, 1, 1]} : vector<8x8x32xf32> to vector<1x8x32xf32>
    %279 = vector.shape_cast %278 : vector<1x8x32xf32> to vector<8x32xf32>
    %cst_78 = arith.constant dense<0.000000e+00> : vector<8x32xf32>
    %280 = tpu.matmul %259, %32, %cst_78 {dimension_numbers = #tpu.dot_dimension_numbers<[1], [0], [0], [1], [0, 0, 1, 1], [], []>} : vector<8x32xbf16>, vector<32x32xbf16>, vector<8x32xf32> -> vector<8x32xf32>
    %281 = vector.broadcast %33 : vector<1x32xf32> to vector<8x32xf32>
    %282 = arith.addf %280, %281 : vector<8x32xf32>
    %283 = arith.mulf %268, %282 : vector<8x32xf32>
    %284 = arith.addf %279, %283 : vector<8x32xf32>
    %285 = math.tanh %284 : vector<8x32xf32>
    %cst_79 = arith.constant 1.000000e+00 : f32
    %286 = vector.broadcast %cst_79 : f32 to vector<8x32xf32>
    %287 = arith.subf %286, %277 : vector<8x32xf32>
    %288 = arith.mulf %287, %285 : vector<8x32xf32>
    %289 = arith.mulf %277, %258 : vector<8x32xf32>
    %290 = arith.addf %288, %289 : vector<8x32xf32>
    %291 = arith.truncf %290 : vector<8x32xf32> to vector<8x32xbf16>
    %c0_80 = arith.constant 0 : index
    %c0_81 = arith.constant 0 : index
    %292 = vector.load %arg6[%c0_80, %c0_81] : memref<32x16xbf16, #tpu.memory_space<vmem>>, vector<32x16xbf16>
    %cst_82 = arith.constant dense<0.000000e+00> : vector<8x16xf32>
    %293 = tpu.matmul %291, %292, %cst_82 {dimension_numbers = #tpu.dot_dimension_numbers<[1], [0], [0], [1], [0, 0, 1, 1], [], []>} : vector<8x32xbf16>, vector<32x16xbf16>, vector<8x16xf32> -> vector<8x16xf32>
    %c0_83 = arith.constant 0 : index
    %c0_84 = arith.constant 0 : index
    %294 = vector.load %arg7[%c0_83, %c0_84] : memref<1x16xf32, #tpu.memory_space<vmem>>, vector<1x16xf32>
    %295 = vector.broadcast %294 : vector<1x16xf32> to vector<8x16xf32>
    %296 = arith.addf %293, %295 : vector<8x16xf32>
    %c0_85 = arith.constant 0 : index
    %c0_86 = arith.constant 0 : index
    %297 = vector.load %arg19[%c0_85, %c0_86] : memref<8x16xf32, #tpu.memory_space<vmem>>, vector<8x16xf32>
    tpu.vector_store %arg19[%c0_85, %c0_86], %296 {strides = array<i32>} : memref<8x16xf32, #tpu.memory_space<vmem>>, vector<8x16xf32>,
    %298 = arith.truncf %296 : vector<8x16xf32> to vector<8x16xbf16>
    %c0_87 = arith.constant 0 : index
    %c0_88 = arith.constant 0 : index
    %c0_89 = arith.constant 0 : index
    %299 = vector.load %arg8[%c0_87, %c0_88, %c0_89] : memref<8x16x32xbf16, #tpu.memory_space<vmem>>, vector<1x16x32xbf16>
    %300 = vector.shape_cast %299 : vector<1x16x32xbf16> to vector<16x32xbf16>
    %cst_90 = arith.constant dense<0.000000e+00> : vector<8x32xf32>
    %301 = tpu.matmul %298, %300, %cst_90 {dimension_numbers = #tpu.dot_dimension_numbers<[1], [0], [0], [1], [0, 0, 1, 1], [], []>} : vector<8x16xbf16>, vector<16x32xbf16>, vector<8x32xf32> -> vector<8x32xf32>
    %c0_91 = arith.constant 0 : index
    %c0_92 = arith.constant 0 : index
    %c0_93 = arith.constant 0 : index
    %302 = vector.load %arg11[%c0_91, %c0_92, %c0_93] : memref<8x1x32xf32, #tpu.memory_space<vmem>>, vector<1x1x32xf32>
    %303 = vector.shape_cast %302 : vector<1x1x32xf32> to vector<1x32xf32>
    %304 = vector.broadcast %303 : vector<1x32xf32> to vector<8x32xf32>
    %305 = arith.addf %301, %304 : vector<8x32xf32>
    %c1_94 = arith.constant 1 : index
    %c0_95 = arith.constant 0 : index
    %c0_96 = arith.constant 0 : index
    %306 = vector.load %arg8[%c1_94, %c0_95, %c0_96] : memref<8x16x32xbf16, #tpu.memory_space<vmem>>, vector<1x16x32xbf16>
    %307 = vector.shape_cast %306 : vector<1x16x32xbf16> to vector<16x32xbf16>
    %cst_97 = arith.constant dense<0.000000e+00> : vector<8x32xf32>
    %308 = tpu.matmul %298, %307, %cst_97 {dimension_numbers = #tpu.dot_dimension_numbers<[1], [0], [0], [1], [0, 0, 1, 1], [], []>} : vector<8x16xbf16>, vector<16x32xbf16>, vector<8x32xf32> -> vector<8x32xf32>
    %c1_98 = arith.constant 1 : index
    %c0_99 = arith.constant 0 : index
    %c0_100 = arith.constant 0 : index
    %309 = vector.load %arg11[%c1_98, %c0_99, %c0_100] : memref<8x1x32xf32, #tpu.memory_space<vmem>>, vector<1x1x32xf32>
    %310 = vector.shape_cast %309 : vector<1x1x32xf32> to vector<1x32xf32>
    %311 = vector.broadcast %310 : vector<1x32xf32> to vector<8x32xf32>
    %312 = arith.addf %308, %311 : vector<8x32xf32>
    %c2_101 = arith.constant 2 : index
    %c0_102 = arith.constant 0 : index
    %c0_103 = arith.constant 0 : index
    %313 = vector.load %arg8[%c2_101, %c0_102, %c0_103] : memref<8x16x32xbf16, #tpu.memory_space<vmem>>, vector<1x16x32xbf16>
    %314 = vector.shape_cast %313 : vector<1x16x32xbf16> to vector<16x32xbf16>
    %cst_104 = arith.constant dense<0.000000e+00> : vector<8x32xf32>
    %315 = tpu.matmul %298, %314, %cst_104 {dimension_numbers = #tpu.dot_dimension_numbers<[1], [0], [0], [1], [0, 0, 1, 1], [], []>} : vector<8x16xbf16>, vector<16x32xbf16>, vector<8x32xf32> -> vector<8x32xf32>
    %c2_105 = arith.constant 2 : index
    %c0_106 = arith.constant 0 : index
    %c0_107 = arith.constant 0 : index
    %316 = vector.load %arg11[%c2_105, %c0_106, %c0_107] : memref<8x1x32xf32, #tpu.memory_space<vmem>>, vector<1x1x32xf32>
    %317 = vector.shape_cast %316 : vector<1x1x32xf32> to vector<1x32xf32>
    %318 = vector.broadcast %317 : vector<1x32xf32> to vector<8x32xf32>
    %319 = arith.addf %315, %318 : vector<8x32xf32>
    %c3 = arith.constant 3 : index
    %c0_108 = arith.constant 0 : index
    %c0_109 = arith.constant 0 : index
    %320 = vector.load %arg8[%c3, %c0_108, %c0_109] : memref<8x16x32xbf16, #tpu.memory_space<vmem>>, vector<1x16x32xbf16>
    %321 = vector.shape_cast %320 : vector<1x16x32xbf16> to vector<16x32xbf16>
    %cst_110 = arith.constant dense<0.000000e+00> : vector<8x32xf32>
    %322 = tpu.matmul %298, %321, %cst_110 {dimension_numbers = #tpu.dot_dimension_numbers<[1], [0], [0], [1], [0, 0, 1, 1], [], []>} : vector<8x16xbf16>, vector<16x32xbf16>, vector<8x32xf32> -> vector<8x32xf32>
    %c3_111 = arith.constant 3 : index
    %c0_112 = arith.constant 0 : index
    %c0_113 = arith.constant 0 : index
    %323 = vector.load %arg11[%c3_111, %c0_112, %c0_113] : memref<8x1x32xf32, #tpu.memory_space<vmem>>, vector<1x1x32xf32>
    %324 = vector.shape_cast %323 : vector<1x1x32xf32> to vector<1x32xf32>
    %325 = vector.broadcast %324 : vector<1x32xf32> to vector<8x32xf32>
    %326 = arith.addf %322, %325 : vector<8x32xf32>
    %c4 = arith.constant 4 : index
    %c0_114 = arith.constant 0 : index
    %c0_115 = arith.constant 0 : index
    %327 = vector.load %arg8[%c4, %c0_114, %c0_115] : memref<8x16x32xbf16, #tpu.memory_space<vmem>>, vector<1x16x32xbf16>
    %328 = vector.shape_cast %327 : vector<1x16x32xbf16> to vector<16x32xbf16>
    %cst_116 = arith.constant dense<0.000000e+00> : vector<8x32xf32>
    %329 = tpu.matmul %298, %328, %cst_116 {dimension_numbers = #tpu.dot_dimension_numbers<[1], [0], [0], [1], [0, 0, 1, 1], [], []>} : vector<8x16xbf16>, vector<16x32xbf16>, vector<8x32xf32> -> vector<8x32xf32>
    %c4_117 = arith.constant 4 : index
    %c0_118 = arith.constant 0 : index
    %c0_119 = arith.constant 0 : index
    %330 = vector.load %arg11[%c4_117, %c0_118, %c0_119] : memref<8x1x32xf32, #tpu.memory_space<vmem>>, vector<1x1x32xf32>
    %331 = vector.shape_cast %330 : vector<1x1x32xf32> to vector<1x32xf32>
    %332 = vector.broadcast %331 : vector<1x32xf32> to vector<8x32xf32>
    %333 = arith.addf %329, %332 : vector<8x32xf32>
    %c5 = arith.constant 5 : index
    %c0_120 = arith.constant 0 : index
    %c0_121 = arith.constant 0 : index
    %334 = vector.load %arg8[%c5, %c0_120, %c0_121] : memref<8x16x32xbf16, #tpu.memory_space<vmem>>, vector<1x16x32xbf16>
    %335 = vector.shape_cast %334 : vector<1x16x32xbf16> to vector<16x32xbf16>
    %cst_122 = arith.constant dense<0.000000e+00> : vector<8x32xf32>
    %336 = tpu.matmul %298, %335, %cst_122 {dimension_numbers = #tpu.dot_dimension_numbers<[1], [0], [0], [1], [0, 0, 1, 1], [], []>} : vector<8x16xbf16>, vector<16x32xbf16>, vector<8x32xf32> -> vector<8x32xf32>
    %c5_123 = arith.constant 5 : index
    %c0_124 = arith.constant 0 : index
    %c0_125 = arith.constant 0 : index
    %337 = vector.load %arg11[%c5_123, %c0_124, %c0_125] : memref<8x1x32xf32, #tpu.memory_space<vmem>>, vector<1x1x32xf32>
    %338 = vector.shape_cast %337 : vector<1x1x32xf32> to vector<1x32xf32>
    %339 = vector.broadcast %338 : vector<1x32xf32> to vector<8x32xf32>
    %340 = arith.addf %336, %339 : vector<8x32xf32>
    %c6 = arith.constant 6 : index
    %c0_126 = arith.constant 0 : index
    %c0_127 = arith.constant 0 : index
    %341 = vector.load %arg8[%c6, %c0_126, %c0_127] : memref<8x16x32xbf16, #tpu.memory_space<vmem>>, vector<1x16x32xbf16>
    %342 = vector.shape_cast %341 : vector<1x16x32xbf16> to vector<16x32xbf16>
    %cst_128 = arith.constant dense<0.000000e+00> : vector<8x32xf32>
    %343 = tpu.matmul %298, %342, %cst_128 {dimension_numbers = #tpu.dot_dimension_numbers<[1], [0], [0], [1], [0, 0, 1, 1], [], []>} : vector<8x16xbf16>, vector<16x32xbf16>, vector<8x32xf32> -> vector<8x32xf32>
    %c6_129 = arith.constant 6 : index
    %c0_130 = arith.constant 0 : index
    %c0_131 = arith.constant 0 : index
    %344 = vector.load %arg11[%c6_129, %c0_130, %c0_131] : memref<8x1x32xf32, #tpu.memory_space<vmem>>, vector<1x1x32xf32>
    %345 = vector.shape_cast %344 : vector<1x1x32xf32> to vector<1x32xf32>
    %346 = vector.broadcast %345 : vector<1x32xf32> to vector<8x32xf32>
    %347 = arith.addf %343, %346 : vector<8x32xf32>
    %c7 = arith.constant 7 : index
    %c0_132 = arith.constant 0 : index
    %c0_133 = arith.constant 0 : index
    %348 = vector.load %arg8[%c7, %c0_132, %c0_133] : memref<8x16x32xbf16, #tpu.memory_space<vmem>>, vector<1x16x32xbf16>
    %349 = vector.shape_cast %348 : vector<1x16x32xbf16> to vector<16x32xbf16>
    %cst_134 = arith.constant dense<0.000000e+00> : vector<8x32xf32>
    %350 = tpu.matmul %298, %349, %cst_134 {dimension_numbers = #tpu.dot_dimension_numbers<[1], [0], [0], [1], [0, 0, 1, 1], [], []>} : vector<8x16xbf16>, vector<16x32xbf16>, vector<8x32xf32> -> vector<8x32xf32>
    %c7_135 = arith.constant 7 : index
    %c0_136 = arith.constant 0 : index
    %c0_137 = arith.constant 0 : index
    %351 = vector.load %arg11[%c7_135, %c0_136, %c0_137] : memref<8x1x32xf32, #tpu.memory_space<vmem>>, vector<1x1x32xf32>
    %352 = vector.shape_cast %351 : vector<1x1x32xf32> to vector<1x32xf32>
    %353 = vector.broadcast %352 : vector<1x32xf32> to vector<8x32xf32>
    %354 = arith.addf %350, %353 : vector<8x32xf32>
    %c0_138 = arith.constant 0 : index
    %c0_139 = arith.constant 0 : index
    %c0_140 = arith.constant 0 : index
    %355 = vector.load %arg9[%c0_138, %c0_139, %c0_140] : memref<8x16x32xbf16, #tpu.memory_space<vmem>>, vector<1x16x32xbf16>
    %356 = vector.shape_cast %355 : vector<1x16x32xbf16> to vector<16x32xbf16>
    %cst_141 = arith.constant dense<0.000000e+00> : vector<8x32xf32>
    %357 = tpu.matmul %298, %356, %cst_141 {dimension_numbers = #tpu.dot_dimension_numbers<[1], [0], [0], [1], [0, 0, 1, 1], [], []>} : vector<8x16xbf16>, vector<16x32xbf16>, vector<8x32xf32> -> vector<8x32xf32>
    %c0_142 = arith.constant 0 : index
    %c0_143 = arith.constant 0 : index
    %c0_144 = arith.constant 0 : index
    %358 = vector.load %arg12[%c0_142, %c0_143, %c0_144] : memref<8x1x32xf32, #tpu.memory_space<vmem>>, vector<1x1x32xf32>
    %359 = vector.shape_cast %358 : vector<1x1x32xf32> to vector<1x32xf32>
    %360 = vector.broadcast %359 : vector<1x32xf32> to vector<8x32xf32>
    %361 = arith.addf %357, %360 : vector<8x32xf32>
    %c1_145 = arith.constant 1 : index
    %c0_146 = arith.constant 0 : index
    %c0_147 = arith.constant 0 : index
    %362 = vector.load %arg9[%c1_145, %c0_146, %c0_147] : memref<8x16x32xbf16, #tpu.memory_space<vmem>>, vector<1x16x32xbf16>
    %363 = vector.shape_cast %362 : vector<1x16x32xbf16> to vector<16x32xbf16>
    %cst_148 = arith.constant dense<0.000000e+00> : vector<8x32xf32>
    %364 = tpu.matmul %298, %363, %cst_148 {dimension_numbers = #tpu.dot_dimension_numbers<[1], [0], [0], [1], [0, 0, 1, 1], [], []>} : vector<8x16xbf16>, vector<16x32xbf16>, vector<8x32xf32> -> vector<8x32xf32>
    %c1_149 = arith.constant 1 : index
    %c0_150 = arith.constant 0 : index
    %c0_151 = arith.constant 0 : index
    %365 = vector.load %arg12[%c1_149, %c0_150, %c0_151] : memref<8x1x32xf32, #tpu.memory_space<vmem>>, vector<1x1x32xf32>
    %366 = vector.shape_cast %365 : vector<1x1x32xf32> to vector<1x32xf32>
    %367 = vector.broadcast %366 : vector<1x32xf32> to vector<8x32xf32>
    %368 = arith.addf %364, %367 : vector<8x32xf32>
    %c2_152 = arith.constant 2 : index
    %c0_153 = arith.constant 0 : index
    %c0_154 = arith.constant 0 : index
    %369 = vector.load %arg9[%c2_152, %c0_153, %c0_154] : memref<8x16x32xbf16, #tpu.memory_space<vmem>>, vector<1x16x32xbf16>
    %370 = vector.shape_cast %369 : vector<1x16x32xbf16> to vector<16x32xbf16>
    %cst_155 = arith.constant dense<0.000000e+00> : vector<8x32xf32>
    %371 = tpu.matmul %298, %370, %cst_155 {dimension_numbers = #tpu.dot_dimension_numbers<[1], [0], [0], [1], [0, 0, 1, 1], [], []>} : vector<8x16xbf16>, vector<16x32xbf16>, vector<8x32xf32> -> vector<8x32xf32>
    %c2_156 = arith.constant 2 : index
    %c0_157 = arith.constant 0 : index
    %c0_158 = arith.constant 0 : index
    %372 = vector.load %arg12[%c2_156, %c0_157, %c0_158] : memref<8x1x32xf32, #tpu.memory_space<vmem>>, vector<1x1x32xf32>
    %373 = vector.shape_cast %372 : vector<1x1x32xf32> to vector<1x32xf32>
    %374 = vector.broadcast %373 : vector<1x32xf32> to vector<8x32xf32>
    %375 = arith.addf %371, %374 : vector<8x32xf32>
    %c3_159 = arith.constant 3 : index
    %c0_160 = arith.constant 0 : index
    %c0_161 = arith.constant 0 : index
    %376 = vector.load %arg9[%c3_159, %c0_160, %c0_161] : memref<8x16x32xbf16, #tpu.memory_space<vmem>>, vector<1x16x32xbf16>
    %377 = vector.shape_cast %376 : vector<1x16x32xbf16> to vector<16x32xbf16>
    %cst_162 = arith.constant dense<0.000000e+00> : vector<8x32xf32>
    %378 = tpu.matmul %298, %377, %cst_162 {dimension_numbers = #tpu.dot_dimension_numbers<[1], [0], [0], [1], [0, 0, 1, 1], [], []>} : vector<8x16xbf16>, vector<16x32xbf16>, vector<8x32xf32> -> vector<8x32xf32>
    %c3_163 = arith.constant 3 : index
    %c0_164 = arith.constant 0 : index
    %c0_165 = arith.constant 0 : index
    %379 = vector.load %arg12[%c3_163, %c0_164, %c0_165] : memref<8x1x32xf32, #tpu.memory_space<vmem>>, vector<1x1x32xf32>
    %380 = vector.shape_cast %379 : vector<1x1x32xf32> to vector<1x32xf32>
    %381 = vector.broadcast %380 : vector<1x32xf32> to vector<8x32xf32>
    %382 = arith.addf %378, %381 : vector<8x32xf32>
    %c4_166 = arith.constant 4 : index
    %c0_167 = arith.constant 0 : index
    %c0_168 = arith.constant 0 : index
    %383 = vector.load %arg9[%c4_166, %c0_167, %c0_168] : memref<8x16x32xbf16, #tpu.memory_space<vmem>>, vector<1x16x32xbf16>
    %384 = vector.shape_cast %383 : vector<1x16x32xbf16> to vector<16x32xbf16>
    %cst_169 = arith.constant dense<0.000000e+00> : vector<8x32xf32>
    %385 = tpu.matmul %298, %384, %cst_169 {dimension_numbers = #tpu.dot_dimension_numbers<[1], [0], [0], [1], [0, 0, 1, 1], [], []>} : vector<8x16xbf16>, vector<16x32xbf16>, vector<8x32xf32> -> vector<8x32xf32>
    %c4_170 = arith.constant 4 : index
    %c0_171 = arith.constant 0 : index
    %c0_172 = arith.constant 0 : index
    %386 = vector.load %arg12[%c4_170, %c0_171, %c0_172] : memref<8x1x32xf32, #tpu.memory_space<vmem>>, vector<1x1x32xf32>
    %387 = vector.shape_cast %386 : vector<1x1x32xf32> to vector<1x32xf32>
    %388 = vector.broadcast %387 : vector<1x32xf32> to vector<8x32xf32>
    %389 = arith.addf %385, %388 : vector<8x32xf32>
    %c5_173 = arith.constant 5 : index
    %c0_174 = arith.constant 0 : index
    %c0_175 = arith.constant 0 : index
    %390 = vector.load %arg9[%c5_173, %c0_174, %c0_175] : memref<8x16x32xbf16, #tpu.memory_space<vmem>>, vector<1x16x32xbf16>
    %391 = vector.shape_cast %390 : vector<1x16x32xbf16> to vector<16x32xbf16>
    %cst_176 = arith.constant dense<0.000000e+00> : vector<8x32xf32>
    %392 = tpu.matmul %298, %391, %cst_176 {dimension_numbers = #tpu.dot_dimension_numbers<[1], [0], [0], [1], [0, 0, 1, 1], [], []>} : vector<8x16xbf16>, vector<16x32xbf16>, vector<8x32xf32> -> vector<8x32xf32>
    %c5_177 = arith.constant 5 : index
    %c0_178 = arith.constant 0 : index
    %c0_179 = arith.constant 0 : index
    %393 = vector.load %arg12[%c5_177, %c0_178, %c0_179] : memref<8x1x32xf32, #tpu.memory_space<vmem>>, vector<1x1x32xf32>
    %394 = vector.shape_cast %393 : vector<1x1x32xf32> to vector<1x32xf32>
    %395 = vector.broadcast %394 : vector<1x32xf32> to vector<8x32xf32>
    %396 = arith.addf %392, %395 : vector<8x32xf32>
    %c6_180 = arith.constant 6 : index
    %c0_181 = arith.constant 0 : index
    %c0_182 = arith.constant 0 : index
    %397 = vector.load %arg9[%c6_180, %c0_181, %c0_182] : memref<8x16x32xbf16, #tpu.memory_space<vmem>>, vector<1x16x32xbf16>
    %398 = vector.shape_cast %397 : vector<1x16x32xbf16> to vector<16x32xbf16>
    %cst_183 = arith.constant dense<0.000000e+00> : vector<8x32xf32>
    %399 = tpu.matmul %298, %398, %cst_183 {dimension_numbers = #tpu.dot_dimension_numbers<[1], [0], [0], [1], [0, 0, 1, 1], [], []>} : vector<8x16xbf16>, vector<16x32xbf16>, vector<8x32xf32> -> vector<8x32xf32>
    %c6_184 = arith.constant 6 : index
    %c0_185 = arith.constant 0 : index
    %c0_186 = arith.constant 0 : index
    %400 = vector.load %arg12[%c6_184, %c0_185, %c0_186] : memref<8x1x32xf32, #tpu.memory_space<vmem>>, vector<1x1x32xf32>
    %401 = vector.shape_cast %400 : vector<1x1x32xf32> to vector<1x32xf32>
    %402 = vector.broadcast %401 : vector<1x32xf32> to vector<8x32xf32>
    %403 = arith.addf %399, %402 : vector<8x32xf32>
    %c7_187 = arith.constant 7 : index
    %c0_188 = arith.constant 0 : index
    %c0_189 = arith.constant 0 : index
    %404 = vector.load %arg9[%c7_187, %c0_188, %c0_189] : memref<8x16x32xbf16, #tpu.memory_space<vmem>>, vector<1x16x32xbf16>
    %405 = vector.shape_cast %404 : vector<1x16x32xbf16> to vector<16x32xbf16>
    %cst_190 = arith.constant dense<0.000000e+00> : vector<8x32xf32>
    %406 = tpu.matmul %298, %405, %cst_190 {dimension_numbers = #tpu.dot_dimension_numbers<[1], [0], [0], [1], [0, 0, 1, 1], [], []>} : vector<8x16xbf16>, vector<16x32xbf16>, vector<8x32xf32> -> vector<8x32xf32>
    %c7_191 = arith.constant 7 : index
    %c0_192 = arith.constant 0 : index
    %c0_193 = arith.constant 0 : index
    %407 = vector.load %arg12[%c7_191, %c0_192, %c0_193] : memref<8x1x32xf32, #tpu.memory_space<vmem>>, vector<1x1x32xf32>
    %408 = vector.shape_cast %407 : vector<1x1x32xf32> to vector<1x32xf32>
    %409 = vector.broadcast %408 : vector<1x32xf32> to vector<8x32xf32>
    %410 = arith.addf %406, %409 : vector<8x32xf32>
    %c0_194 = arith.constant 0 : index
    %c0_195 = arith.constant 0 : index
    %c0_196 = arith.constant 0 : index
    %411 = vector.load %arg10[%c0_194, %c0_195, %c0_196] : memref<8x16x32xbf16, #tpu.memory_space<vmem>>, vector<1x16x32xbf16>
    %412 = vector.shape_cast %411 : vector<1x16x32xbf16> to vector<16x32xbf16>
    %cst_197 = arith.constant dense<0.000000e+00> : vector<8x32xf32>
    %413 = tpu.matmul %298, %412, %cst_197 {dimension_numbers = #tpu.dot_dimension_numbers<[1], [0], [0], [1], [0, 0, 1, 1], [], []>} : vector<8x16xbf16>, vector<16x32xbf16>, vector<8x32xf32> -> vector<8x32xf32>
    %c0_198 = arith.constant 0 : index
    %c0_199 = arith.constant 0 : index
    %c0_200 = arith.constant 0 : index
    %414 = vector.load %arg13[%c0_198, %c0_199, %c0_200] : memref<8x1x32xf32, #tpu.memory_space<vmem>>, vector<1x1x32xf32>
    %415 = vector.shape_cast %414 : vector<1x1x32xf32> to vector<1x32xf32>
    %416 = vector.broadcast %415 : vector<1x32xf32> to vector<8x32xf32>
    %417 = arith.addf %413, %416 : vector<8x32xf32>
    %c1_201 = arith.constant 1 : index
    %c0_202 = arith.constant 0 : index
    %c0_203 = arith.constant 0 : index
    %418 = vector.load %arg10[%c1_201, %c0_202, %c0_203] : memref<8x16x32xbf16, #tpu.memory_space<vmem>>, vector<1x16x32xbf16>
    %419 = vector.shape_cast %418 : vector<1x16x32xbf16> to vector<16x32xbf16>
    %cst_204 = arith.constant dense<0.000000e+00> : vector<8x32xf32>
    %420 = tpu.matmul %298, %419, %cst_204 {dimension_numbers = #tpu.dot_dimension_numbers<[1], [0], [0], [1], [0, 0, 1, 1], [], []>} : vector<8x16xbf16>, vector<16x32xbf16>, vector<8x32xf32> -> vector<8x32xf32>
    %c1_205 = arith.constant 1 : index
    %c0_206 = arith.constant 0 : index
    %c0_207 = arith.constant 0 : index
    %421 = vector.load %arg13[%c1_205, %c0_206, %c0_207] : memref<8x1x32xf32, #tpu.memory_space<vmem>>, vector<1x1x32xf32>
    %422 = vector.shape_cast %421 : vector<1x1x32xf32> to vector<1x32xf32>
    %423 = vector.broadcast %422 : vector<1x32xf32> to vector<8x32xf32>
    %424 = arith.addf %420, %423 : vector<8x32xf32>
    %c2_208 = arith.constant 2 : index
    %c0_209 = arith.constant 0 : index
    %c0_210 = arith.constant 0 : index
    %425 = vector.load %arg10[%c2_208, %c0_209, %c0_210] : memref<8x16x32xbf16, #tpu.memory_space<vmem>>, vector<1x16x32xbf16>
    %426 = vector.shape_cast %425 : vector<1x16x32xbf16> to vector<16x32xbf16>
    %cst_211 = arith.constant dense<0.000000e+00> : vector<8x32xf32>
    %427 = tpu.matmul %298, %426, %cst_211 {dimension_numbers = #tpu.dot_dimension_numbers<[1], [0], [0], [1], [0, 0, 1, 1], [], []>} : vector<8x16xbf16>, vector<16x32xbf16>, vector<8x32xf32> -> vector<8x32xf32>
    %c2_212 = arith.constant 2 : index
    %c0_213 = arith.constant 0 : index
    %c0_214 = arith.constant 0 : index
    %428 = vector.load %arg13[%c2_212, %c0_213, %c0_214] : memref<8x1x32xf32, #tpu.memory_space<vmem>>, vector<1x1x32xf32>
    %429 = vector.shape_cast %428 : vector<1x1x32xf32> to vector<1x32xf32>
    %430 = vector.broadcast %429 : vector<1x32xf32> to vector<8x32xf32>
    %431 = arith.addf %427, %430 : vector<8x32xf32>
    %c3_215 = arith.constant 3 : index
    %c0_216 = arith.constant 0 : index
    %c0_217 = arith.constant 0 : index
    %432 = vector.load %arg10[%c3_215, %c0_216, %c0_217] : memref<8x16x32xbf16, #tpu.memory_space<vmem>>, vector<1x16x32xbf16>
    %433 = vector.shape_cast %432 : vector<1x16x32xbf16> to vector<16x32xbf16>
    %cst_218 = arith.constant dense<0.000000e+00> : vector<8x32xf32>
    %434 = tpu.matmul %298, %433, %cst_218 {dimension_numbers = #tpu.dot_dimension_numbers<[1], [0], [0], [1], [0, 0, 1, 1], [], []>} : vector<8x16xbf16>, vector<16x32xbf16>, vector<8x32xf32> -> vector<8x32xf32>
    %c3_219 = arith.constant 3 : index
    %c0_220 = arith.constant 0 : index
    %c0_221 = arith.constant 0 : index
    %435 = vector.load %arg13[%c3_219, %c0_220, %c0_221] : memref<8x1x32xf32, #tpu.memory_space<vmem>>, vector<1x1x32xf32>
    %436 = vector.shape_cast %435 : vector<1x1x32xf32> to vector<1x32xf32>
    %437 = vector.broadcast %436 : vector<1x32xf32> to vector<8x32xf32>
    %438 = arith.addf %434, %437 : vector<8x32xf32>
    %c4_222 = arith.constant 4 : index
    %c0_223 = arith.constant 0 : index
    %c0_224 = arith.constant 0 : index
    %439 = vector.load %arg10[%c4_222, %c0_223, %c0_224] : memref<8x16x32xbf16, #tpu.memory_space<vmem>>, vector<1x16x32xbf16>
    %440 = vector.shape_cast %439 : vector<1x16x32xbf16> to vector<16x32xbf16>
    %cst_225 = arith.constant dense<0.000000e+00> : vector<8x32xf32>
    %441 = tpu.matmul %298, %440, %cst_225 {dimension_numbers = #tpu.dot_dimension_numbers<[1], [0], [0], [1], [0, 0, 1, 1], [], []>} : vector<8x16xbf16>, vector<16x32xbf16>, vector<8x32xf32> -> vector<8x32xf32>
    %c4_226 = arith.constant 4 : index
    %c0_227 = arith.constant 0 : index
    %c0_228 = arith.constant 0 : index
    %442 = vector.load %arg13[%c4_226, %c0_227, %c0_228] : memref<8x1x32xf32, #tpu.memory_space<vmem>>, vector<1x1x32xf32>
    %443 = vector.shape_cast %442 : vector<1x1x32xf32> to vector<1x32xf32>
    %444 = vector.broadcast %443 : vector<1x32xf32> to vector<8x32xf32>
    %445 = arith.addf %441, %444 : vector<8x32xf32>
    %c5_229 = arith.constant 5 : index
    %c0_230 = arith.constant 0 : index
    %c0_231 = arith.constant 0 : index
    %446 = vector.load %arg10[%c5_229, %c0_230, %c0_231] : memref<8x16x32xbf16, #tpu.memory_space<vmem>>, vector<1x16x32xbf16>
    %447 = vector.shape_cast %446 : vector<1x16x32xbf16> to vector<16x32xbf16>
    %cst_232 = arith.constant dense<0.000000e+00> : vector<8x32xf32>
    %448 = tpu.matmul %298, %447, %cst_232 {dimension_numbers = #tpu.dot_dimension_numbers<[1], [0], [0], [1], [0, 0, 1, 1], [], []>} : vector<8x16xbf16>, vector<16x32xbf16>, vector<8x32xf32> -> vector<8x32xf32>
    %c5_233 = arith.constant 5 : index
    %c0_234 = arith.constant 0 : index
    %c0_235 = arith.constant 0 : index
    %449 = vector.load %arg13[%c5_233, %c0_234, %c0_235] : memref<8x1x32xf32, #tpu.memory_space<vmem>>, vector<1x1x32xf32>
    %450 = vector.shape_cast %449 : vector<1x1x32xf32> to vector<1x32xf32>
    %451 = vector.broadcast %450 : vector<1x32xf32> to vector<8x32xf32>
    %452 = arith.addf %448, %451 : vector<8x32xf32>
    %c6_236 = arith.constant 6 : index
    %c0_237 = arith.constant 0 : index
    %c0_238 = arith.constant 0 : index
    %453 = vector.load %arg10[%c6_236, %c0_237, %c0_238] : memref<8x16x32xbf16, #tpu.memory_space<vmem>>, vector<1x16x32xbf16>
    %454 = vector.shape_cast %453 : vector<1x16x32xbf16> to vector<16x32xbf16>
    %cst_239 = arith.constant dense<0.000000e+00> : vector<8x32xf32>
    %455 = tpu.matmul %298, %454, %cst_239 {dimension_numbers = #tpu.dot_dimension_numbers<[1], [0], [0], [1], [0, 0, 1, 1], [], []>} : vector<8x16xbf16>, vector<16x32xbf16>, vector<8x32xf32> -> vector<8x32xf32>
    %c6_240 = arith.constant 6 : index
    %c0_241 = arith.constant 0 : index
    %c0_242 = arith.constant 0 : index
    %456 = vector.load %arg13[%c6_240, %c0_241, %c0_242] : memref<8x1x32xf32, #tpu.memory_space<vmem>>, vector<1x1x32xf32>
    %457 = vector.shape_cast %456 : vector<1x1x32xf32> to vector<1x32xf32>
    %458 = vector.broadcast %457 : vector<1x32xf32> to vector<8x32xf32>
    %459 = arith.addf %455, %458 : vector<8x32xf32>
    %c7_243 = arith.constant 7 : index
    %c0_244 = arith.constant 0 : index
    %c0_245 = arith.constant 0 : index
    %460 = vector.load %arg10[%c7_243, %c0_244, %c0_245] : memref<8x16x32xbf16, #tpu.memory_space<vmem>>, vector<1x16x32xbf16>
    %461 = vector.shape_cast %460 : vector<1x16x32xbf16> to vector<16x32xbf16>
    %cst_246 = arith.constant dense<0.000000e+00> : vector<8x32xf32>
    %462 = tpu.matmul %298, %461, %cst_246 {dimension_numbers = #tpu.dot_dimension_numbers<[1], [0], [0], [1], [0, 0, 1, 1], [], []>} : vector<8x16xbf16>, vector<16x32xbf16>, vector<8x32xf32> -> vector<8x32xf32>
    %c7_247 = arith.constant 7 : index
    %c0_248 = arith.constant 0 : index
    %c0_249 = arith.constant 0 : index
    %463 = vector.load %arg13[%c7_247, %c0_248, %c0_249] : memref<8x1x32xf32, #tpu.memory_space<vmem>>, vector<1x1x32xf32>
    %464 = vector.shape_cast %463 : vector<1x1x32xf32> to vector<1x32xf32>
    %465 = vector.broadcast %464 : vector<1x32xf32> to vector<8x32xf32>
    %466 = arith.addf %462, %465 : vector<8x32xf32>
    %c0_250 = arith.constant 0 : index
    %c0_251 = arith.constant 0 : index
    %c0_252 = arith.constant 0 : index
    %467 = vector.load %arg14[%c0_250, %c0_251, %c0_252] : memref<3x32x32xbf16, #tpu.memory_space<vmem>>, vector<1x32x32xbf16>
    %468 = vector.shape_cast %467 : vector<1x32x32xbf16> to vector<32x32xbf16>
    %c1_253 = arith.constant 1 : index
    %c0_254 = arith.constant 0 : index
    %c0_255 = arith.constant 0 : index
    %469 = vector.load %arg14[%c1_253, %c0_254, %c0_255] : memref<3x32x32xbf16, #tpu.memory_space<vmem>>, vector<1x32x32xbf16>
    %470 = vector.shape_cast %469 : vector<1x32x32xbf16> to vector<32x32xbf16>
    %c2_256 = arith.constant 2 : index
    %c0_257 = arith.constant 0 : index
    %c0_258 = arith.constant 0 : index
    %471 = vector.load %arg14[%c2_256, %c0_257, %c0_258] : memref<3x32x32xbf16, #tpu.memory_space<vmem>>, vector<1x32x32xbf16>
    %472 = vector.shape_cast %471 : vector<1x32x32xbf16> to vector<32x32xbf16>
    %c0_259 = arith.constant 0 : index
    %c0_260 = arith.constant 0 : index
    %473 = vector.load %arg15[%c0_259, %c0_260] : memref<1x32xf32, #tpu.memory_space<vmem>>, vector<1x32xf32>
    %cst_261 = arith.constant 0.000000e+00 : f32
    %474 = vector.broadcast %cst_261 : f32 to vector<8x32xf32>
    %475 = arith.truncf %474 : vector<8x32xf32> to vector<8x32xbf16>
    %cst_262 = arith.constant dense<0.000000e+00> : vector<8x32xf32>
    %476 = tpu.matmul %475, %468, %cst_262 {dimension_numbers = #tpu.dot_dimension_numbers<[1], [0], [0], [1], [0, 0, 1, 1], [], []>} : vector<8x32xbf16>, vector<32x32xbf16>, vector<8x32xf32> -> vector<8x32xf32>
    %477 = arith.addf %305, %476 : vector<8x32xf32>
    %478 = arith.negf %477 : vector<8x32xf32>
    %479 = math.exp %478 : vector<8x32xf32>
    %cst_263 = arith.constant 1.000000e+00 : f32
    %480 = vector.broadcast %cst_263 : f32 to vector<8x32xf32>
    %481 = arith.addf %480, %479 : vector<8x32xf32>
    %482 = arith.divf %480, %481 : vector<8x32xf32>
    %cst_264 = arith.constant dense<0.000000e+00> : vector<8x32xf32>
    %483 = tpu.matmul %475, %470, %cst_264 {dimension_numbers = #tpu.dot_dimension_numbers<[1], [0], [0], [1], [0, 0, 1, 1], [], []>} : vector<8x32xbf16>, vector<32x32xbf16>, vector<8x32xf32> -> vector<8x32xf32>
    %484 = arith.addf %361, %483 : vector<8x32xf32>
    %485 = arith.negf %484 : vector<8x32xf32>
    %486 = math.exp %485 : vector<8x32xf32>
    %cst_265 = arith.constant 1.000000e+00 : f32
    %487 = vector.broadcast %cst_265 : f32 to vector<8x32xf32>
    %488 = arith.addf %487, %486 : vector<8x32xf32>
    %489 = arith.divf %487, %488 : vector<8x32xf32>
    %cst_266 = arith.constant dense<0.000000e+00> : vector<8x32xf32>
    %490 = tpu.matmul %475, %472, %cst_266 {dimension_numbers = #tpu.dot_dimension_numbers<[1], [0], [0], [1], [0, 0, 1, 1], [], []>} : vector<8x32xbf16>, vector<32x32xbf16>, vector<8x32xf32> -> vector<8x32xf32>
    %491 = vector.broadcast %473 : vector<1x32xf32> to vector<8x32xf32>
    %492 = arith.addf %490, %491 : vector<8x32xf32>
    %493 = arith.mulf %482, %492 : vector<8x32xf32>
    %494 = arith.addf %417, %493 : vector<8x32xf32>
    %495 = math.tanh %494 : vector<8x32xf32>
    %cst_267 = arith.constant 1.000000e+00 : f32
    %496 = vector.broadcast %cst_267 : f32 to vector<8x32xf32>
    %497 = arith.subf %496, %489 : vector<8x32xf32>
    %498 = arith.mulf %497, %495 : vector<8x32xf32>
    %499 = arith.mulf %489, %474 : vector<8x32xf32>
    %500 = arith.addf %498, %499 : vector<8x32xf32>
    %501 = arith.truncf %500 : vector<8x32xf32> to vector<8x32xbf16>
    %cst_268 = arith.constant dense<0.000000e+00> : vector<8x32xf32>
    %502 = tpu.matmul %501, %468, %cst_268 {dimension_numbers = #tpu.dot_dimension_numbers<[1], [0], [0], [1], [0, 0, 1, 1], [], []>} : vector<8x32xbf16>, vector<32x32xbf16>, vector<8x32xf32> -> vector<8x32xf32>
    %503 = arith.addf %312, %502 : vector<8x32xf32>
    %504 = arith.negf %503 : vector<8x32xf32>
    %505 = math.exp %504 : vector<8x32xf32>
    %cst_269 = arith.constant 1.000000e+00 : f32
    %506 = vector.broadcast %cst_269 : f32 to vector<8x32xf32>
    %507 = arith.addf %506, %505 : vector<8x32xf32>
    %508 = arith.divf %506, %507 : vector<8x32xf32>
    %cst_270 = arith.constant dense<0.000000e+00> : vector<8x32xf32>
    %509 = tpu.matmul %501, %470, %cst_270 {dimension_numbers = #tpu.dot_dimension_numbers<[1], [0], [0], [1], [0, 0, 1, 1], [], []>} : vector<8x32xbf16>, vector<32x32xbf16>, vector<8x32xf32> -> vector<8x32xf32>
    %510 = arith.addf %368, %509 : vector<8x32xf32>
    %511 = arith.negf %510 : vector<8x32xf32>
    %512 = math.exp %511 : vector<8x32xf32>
    %cst_271 = arith.constant 1.000000e+00 : f32
    %513 = vector.broadcast %cst_271 : f32 to vector<8x32xf32>
    %514 = arith.addf %513, %512 : vector<8x32xf32>
    %515 = arith.divf %513, %514 : vector<8x32xf32>
    %cst_272 = arith.constant dense<0.000000e+00> : vector<8x32xf32>
    %516 = tpu.matmul %501, %472, %cst_272 {dimension_numbers = #tpu.dot_dimension_numbers<[1], [0], [0], [1], [0, 0, 1, 1], [], []>} : vector<8x32xbf16>, vector<32x32xbf16>, vector<8x32xf32> -> vector<8x32xf32>
    %517 = vector.broadcast %473 : vector<1x32xf32> to vector<8x32xf32>
    %518 = arith.addf %516, %517 : vector<8x32xf32>
    %519 = arith.mulf %508, %518 : vector<8x32xf32>
    %520 = arith.addf %424, %519 : vector<8x32xf32>
    %521 = math.tanh %520 : vector<8x32xf32>
    %cst_273 = arith.constant 1.000000e+00 : f32
    %522 = vector.broadcast %cst_273 : f32 to vector<8x32xf32>
    %523 = arith.subf %522, %515 : vector<8x32xf32>
    %524 = arith.mulf %523, %521 : vector<8x32xf32>
    %525 = arith.mulf %515, %500 : vector<8x32xf32>
    %526 = arith.addf %524, %525 : vector<8x32xf32>
    %527 = arith.truncf %526 : vector<8x32xf32> to vector<8x32xbf16>
    %cst_274 = arith.constant dense<0.000000e+00> : vector<8x32xf32>
    %528 = tpu.matmul %527, %468, %cst_274 {dimension_numbers = #tpu.dot_dimension_numbers<[1], [0], [0], [1], [0, 0, 1, 1], [], []>} : vector<8x32xbf16>, vector<32x32xbf16>, vector<8x32xf32> -> vector<8x32xf32>
    %529 = arith.addf %319, %528 : vector<8x32xf32>
    %530 = arith.negf %529 : vector<8x32xf32>
    %531 = math.exp %530 : vector<8x32xf32>
    %cst_275 = arith.constant 1.000000e+00 : f32
    %532 = vector.broadcast %cst_275 : f32 to vector<8x32xf32>
    %533 = arith.addf %532, %531 : vector<8x32xf32>
    %534 = arith.divf %532, %533 : vector<8x32xf32>
    %cst_276 = arith.constant dense<0.000000e+00> : vector<8x32xf32>
    %535 = tpu.matmul %527, %470, %cst_276 {dimension_numbers = #tpu.dot_dimension_numbers<[1], [0], [0], [1], [0, 0, 1, 1], [], []>} : vector<8x32xbf16>, vector<32x32xbf16>, vector<8x32xf32> -> vector<8x32xf32>
    %536 = arith.addf %375, %535 : vector<8x32xf32>
    %537 = arith.negf %536 : vector<8x32xf32>
    %538 = math.exp %537 : vector<8x32xf32>
    %cst_277 = arith.constant 1.000000e+00 : f32
    %539 = vector.broadcast %cst_277 : f32 to vector<8x32xf32>
    %540 = arith.addf %539, %538 : vector<8x32xf32>
    %541 = arith.divf %539, %540 : vector<8x32xf32>
    %cst_278 = arith.constant dense<0.000000e+00> : vector<8x32xf32>
    %542 = tpu.matmul %527, %472, %cst_278 {dimension_numbers = #tpu.dot_dimension_numbers<[1], [0], [0], [1], [0, 0, 1, 1], [], []>} : vector<8x32xbf16>, vector<32x32xbf16>, vector<8x32xf32> -> vector<8x32xf32>
    %543 = vector.broadcast %473 : vector<1x32xf32> to vector<8x32xf32>
    %544 = arith.addf %542, %543 : vector<8x32xf32>
    %545 = arith.mulf %534, %544 : vector<8x32xf32>
    %546 = arith.addf %431, %545 : vector<8x32xf32>
    %547 = math.tanh %546 : vector<8x32xf32>
    %cst_279 = arith.constant 1.000000e+00 : f32
    %548 = vector.broadcast %cst_279 : f32 to vector<8x32xf32>
    %549 = arith.subf %548, %541 : vector<8x32xf32>
    %550 = arith.mulf %549, %547 : vector<8x32xf32>
    %551 = arith.mulf %541, %526 : vector<8x32xf32>
    %552 = arith.addf %550, %551 : vector<8x32xf32>
    %553 = arith.truncf %552 : vector<8x32xf32> to vector<8x32xbf16>
    %cst_280 = arith.constant dense<0.000000e+00> : vector<8x32xf32>
    %554 = tpu.matmul %553, %468, %cst_280 {dimension_numbers = #tpu.dot_dimension_numbers<[1], [0], [0], [1], [0, 0, 1, 1], [], []>} : vector<8x32xbf16>, vector<32x32xbf16>, vector<8x32xf32> -> vector<8x32xf32>
    %555 = arith.addf %326, %554 : vector<8x32xf32>
    %556 = arith.negf %555 : vector<8x32xf32>
    %557 = math.exp %556 : vector<8x32xf32>
    %cst_281 = arith.constant 1.000000e+00 : f32
    %558 = vector.broadcast %cst_281 : f32 to vector<8x32xf32>
    %559 = arith.addf %558, %557 : vector<8x32xf32>
    %560 = arith.divf %558, %559 : vector<8x32xf32>
    %cst_282 = arith.constant dense<0.000000e+00> : vector<8x32xf32>
    %561 = tpu.matmul %553, %470, %cst_282 {dimension_numbers = #tpu.dot_dimension_numbers<[1], [0], [0], [1], [0, 0, 1, 1], [], []>} : vector<8x32xbf16>, vector<32x32xbf16>, vector<8x32xf32> -> vector<8x32xf32>
    %562 = arith.addf %382, %561 : vector<8x32xf32>
    %563 = arith.negf %562 : vector<8x32xf32>
    %564 = math.exp %563 : vector<8x32xf32>
    %cst_283 = arith.constant 1.000000e+00 : f32
    %565 = vector.broadcast %cst_283 : f32 to vector<8x32xf32>
    %566 = arith.addf %565, %564 : vector<8x32xf32>
    %567 = arith.divf %565, %566 : vector<8x32xf32>
    %cst_284 = arith.constant dense<0.000000e+00> : vector<8x32xf32>
    %568 = tpu.matmul %553, %472, %cst_284 {dimension_numbers = #tpu.dot_dimension_numbers<[1], [0], [0], [1], [0, 0, 1, 1], [], []>} : vector<8x32xbf16>, vector<32x32xbf16>, vector<8x32xf32> -> vector<8x32xf32>
    %569 = vector.broadcast %473 : vector<1x32xf32> to vector<8x32xf32>
    %570 = arith.addf %568, %569 : vector<8x32xf32>
    %571 = arith.mulf %560, %570 : vector<8x32xf32>
    %572 = arith.addf %438, %571 : vector<8x32xf32>
    %573 = math.tanh %572 : vector<8x32xf32>
    %cst_285 = arith.constant 1.000000e+00 : f32
    %574 = vector.broadcast %cst_285 : f32 to vector<8x32xf32>
    %575 = arith.subf %574, %567 : vector<8x32xf32>
    %576 = arith.mulf %575, %573 : vector<8x32xf32>
    %577 = arith.mulf %567, %552 : vector<8x32xf32>
    %578 = arith.addf %576, %577 : vector<8x32xf32>
    %579 = arith.truncf %578 : vector<8x32xf32> to vector<8x32xbf16>
    %cst_286 = arith.constant dense<0.000000e+00> : vector<8x32xf32>
    %580 = tpu.matmul %579, %468, %cst_286 {dimension_numbers = #tpu.dot_dimension_numbers<[1], [0], [0], [1], [0, 0, 1, 1], [], []>} : vector<8x32xbf16>, vector<32x32xbf16>, vector<8x32xf32> -> vector<8x32xf32>
    %581 = arith.addf %333, %580 : vector<8x32xf32>
    %582 = arith.negf %581 : vector<8x32xf32>
    %583 = math.exp %582 : vector<8x32xf32>
    %cst_287 = arith.constant 1.000000e+00 : f32
    %584 = vector.broadcast %cst_287 : f32 to vector<8x32xf32>
    %585 = arith.addf %584, %583 : vector<8x32xf32>
    %586 = arith.divf %584, %585 : vector<8x32xf32>
    %cst_288 = arith.constant dense<0.000000e+00> : vector<8x32xf32>
    %587 = tpu.matmul %579, %470, %cst_288 {dimension_numbers = #tpu.dot_dimension_numbers<[1], [0], [0], [1], [0, 0, 1, 1], [], []>} : vector<8x32xbf16>, vector<32x32xbf16>, vector<8x32xf32> -> vector<8x32xf32>
    %588 = arith.addf %389, %587 : vector<8x32xf32>
    %589 = arith.negf %588 : vector<8x32xf32>
    %590 = math.exp %589 : vector<8x32xf32>
    %cst_289 = arith.constant 1.000000e+00 : f32
    %591 = vector.broadcast %cst_289 : f32 to vector<8x32xf32>
    %592 = arith.addf %591, %590 : vector<8x32xf32>
    %593 = arith.divf %591, %592 : vector<8x32xf32>
    %cst_290 = arith.constant dense<0.000000e+00> : vector<8x32xf32>
    %594 = tpu.matmul %579, %472, %cst_290 {dimension_numbers = #tpu.dot_dimension_numbers<[1], [0], [0], [1], [0, 0, 1, 1], [], []>} : vector<8x32xbf16>, vector<32x32xbf16>, vector<8x32xf32> -> vector<8x32xf32>
    %595 = vector.broadcast %473 : vector<1x32xf32> to vector<8x32xf32>
    %596 = arith.addf %594, %595 : vector<8x32xf32>
    %597 = arith.mulf %586, %596 : vector<8x32xf32>
    %598 = arith.addf %445, %597 : vector<8x32xf32>
    %599 = math.tanh %598 : vector<8x32xf32>
    %cst_291 = arith.constant 1.000000e+00 : f32
    %600 = vector.broadcast %cst_291 : f32 to vector<8x32xf32>
    %601 = arith.subf %600, %593 : vector<8x32xf32>
    %602 = arith.mulf %601, %599 : vector<8x32xf32>
    %603 = arith.mulf %593, %578 : vector<8x32xf32>
    %604 = arith.addf %602, %603 : vector<8x32xf32>
    %605 = arith.truncf %604 : vector<8x32xf32> to vector<8x32xbf16>
    %cst_292 = arith.constant dense<0.000000e+00> : vector<8x32xf32>
    %606 = tpu.matmul %605, %468, %cst_292 {dimension_numbers = #tpu.dot_dimension_numbers<[1], [0], [0], [1], [0, 0, 1, 1], [], []>} : vector<8x32xbf16>, vector<32x32xbf16>, vector<8x32xf32> -> vector<8x32xf32>
    %607 = arith.addf %340, %606 : vector<8x32xf32>
    %608 = arith.negf %607 : vector<8x32xf32>
    %609 = math.exp %608 : vector<8x32xf32>
    %cst_293 = arith.constant 1.000000e+00 : f32
    %610 = vector.broadcast %cst_293 : f32 to vector<8x32xf32>
    %611 = arith.addf %610, %609 : vector<8x32xf32>
    %612 = arith.divf %610, %611 : vector<8x32xf32>
    %cst_294 = arith.constant dense<0.000000e+00> : vector<8x32xf32>
    %613 = tpu.matmul %605, %470, %cst_294 {dimension_numbers = #tpu.dot_dimension_numbers<[1], [0], [0], [1], [0, 0, 1, 1], [], []>} : vector<8x32xbf16>, vector<32x32xbf16>, vector<8x32xf32> -> vector<8x32xf32>
    %614 = arith.addf %396, %613 : vector<8x32xf32>
    %615 = arith.negf %614 : vector<8x32xf32>
    %616 = math.exp %615 : vector<8x32xf32>
    %cst_295 = arith.constant 1.000000e+00 : f32
    %617 = vector.broadcast %cst_295 : f32 to vector<8x32xf32>
    %618 = arith.addf %617, %616 : vector<8x32xf32>
    %619 = arith.divf %617, %618 : vector<8x32xf32>
    %cst_296 = arith.constant dense<0.000000e+00> : vector<8x32xf32>
    %620 = tpu.matmul %605, %472, %cst_296 {dimension_numbers = #tpu.dot_dimension_numbers<[1], [0], [0], [1], [0, 0, 1, 1], [], []>} : vector<8x32xbf16>, vector<32x32xbf16>, vector<8x32xf32> -> vector<8x32xf32>
    %621 = vector.broadcast %473 : vector<1x32xf32> to vector<8x32xf32>
    %622 = arith.addf %620, %621 : vector<8x32xf32>
    %623 = arith.mulf %612, %622 : vector<8x32xf32>
    %624 = arith.addf %452, %623 : vector<8x32xf32>
    %625 = math.tanh %624 : vector<8x32xf32>
    %cst_297 = arith.constant 1.000000e+00 : f32
    %626 = vector.broadcast %cst_297 : f32 to vector<8x32xf32>
    %627 = arith.subf %626, %619 : vector<8x32xf32>
    %628 = arith.mulf %627, %625 : vector<8x32xf32>
    %629 = arith.mulf %619, %604 : vector<8x32xf32>
    %630 = arith.addf %628, %629 : vector<8x32xf32>
    %631 = arith.truncf %630 : vector<8x32xf32> to vector<8x32xbf16>
    %cst_298 = arith.constant dense<0.000000e+00> : vector<8x32xf32>
    %632 = tpu.matmul %631, %468, %cst_298 {dimension_numbers = #tpu.dot_dimension_numbers<[1], [0], [0], [1], [0, 0, 1, 1], [], []>} : vector<8x32xbf16>, vector<32x32xbf16>, vector<8x32xf32> -> vector<8x32xf32>
    %633 = arith.addf %347, %632 : vector<8x32xf32>
    %634 = arith.negf %633 : vector<8x32xf32>
    %635 = math.exp %634 : vector<8x32xf32>
    %cst_299 = arith.constant 1.000000e+00 : f32
    %636 = vector.broadcast %cst_299 : f32 to vector<8x32xf32>
    %637 = arith.addf %636, %635 : vector<8x32xf32>
    %638 = arith.divf %636, %637 : vector<8x32xf32>
    %cst_300 = arith.constant dense<0.000000e+00> : vector<8x32xf32>
    %639 = tpu.matmul %631, %470, %cst_300 {dimension_numbers = #tpu.dot_dimension_numbers<[1], [0], [0], [1], [0, 0, 1, 1], [], []>} : vector<8x32xbf16>, vector<32x32xbf16>, vector<8x32xf32> -> vector<8x32xf32>
    %640 = arith.addf %403, %639 : vector<8x32xf32>
    %641 = arith.negf %640 : vector<8x32xf32>
    %642 = math.exp %641 : vector<8x32xf32>
    %cst_301 = arith.constant 1.000000e+00 : f32
    %643 = vector.broadcast %cst_301 : f32 to vector<8x32xf32>
    %644 = arith.addf %643, %642 : vector<8x32xf32>
    %645 = arith.divf %643, %644 : vector<8x32xf32>
    %cst_302 = arith.constant dense<0.000000e+00> : vector<8x32xf32>
    %646 = tpu.matmul %631, %472, %cst_302 {dimension_numbers = #tpu.dot_dimension_numbers<[1], [0], [0], [1], [0, 0, 1, 1], [], []>} : vector<8x32xbf16>, vector<32x32xbf16>, vector<8x32xf32> -> vector<8x32xf32>
    %647 = vector.broadcast %473 : vector<1x32xf32> to vector<8x32xf32>
    %648 = arith.addf %646, %647 : vector<8x32xf32>
    %649 = arith.mulf %638, %648 : vector<8x32xf32>
    %650 = arith.addf %459, %649 : vector<8x32xf32>
    %651 = math.tanh %650 : vector<8x32xf32>
    %cst_303 = arith.constant 1.000000e+00 : f32
    %652 = vector.broadcast %cst_303 : f32 to vector<8x32xf32>
    %653 = arith.subf %652, %645 : vector<8x32xf32>
    %654 = arith.mulf %653, %651 : vector<8x32xf32>
    %655 = arith.mulf %645, %630 : vector<8x32xf32>
    %656 = arith.addf %654, %655 : vector<8x32xf32>
    %657 = arith.truncf %656 : vector<8x32xf32> to vector<8x32xbf16>
    %cst_304 = arith.constant dense<0.000000e+00> : vector<8x32xf32>
    %658 = tpu.matmul %657, %468, %cst_304 {dimension_numbers = #tpu.dot_dimension_numbers<[1], [0], [0], [1], [0, 0, 1, 1], [], []>} : vector<8x32xbf16>, vector<32x32xbf16>, vector<8x32xf32> -> vector<8x32xf32>
    %659 = arith.addf %354, %658 : vector<8x32xf32>
    %660 = arith.negf %659 : vector<8x32xf32>
    %661 = math.exp %660 : vector<8x32xf32>
    %cst_305 = arith.constant 1.000000e+00 : f32
    %662 = vector.broadcast %cst_305 : f32 to vector<8x32xf32>
    %663 = arith.addf %662, %661 : vector<8x32xf32>
    %664 = arith.divf %662, %663 : vector<8x32xf32>
    %cst_306 = arith.constant dense<0.000000e+00> : vector<8x32xf32>
    %665 = tpu.matmul %657, %470, %cst_306 {dimension_numbers = #tpu.dot_dimension_numbers<[1], [0], [0], [1], [0, 0, 1, 1], [], []>} : vector<8x32xbf16>, vector<32x32xbf16>, vector<8x32xf32> -> vector<8x32xf32>
    %666 = arith.addf %410, %665 : vector<8x32xf32>
    %667 = arith.negf %666 : vector<8x32xf32>
    %668 = math.exp %667 : vector<8x32xf32>
    %cst_307 = arith.constant 1.000000e+00 : f32
    %669 = vector.broadcast %cst_307 : f32 to vector<8x32xf32>
    %670 = arith.addf %669, %668 : vector<8x32xf32>
    %671 = arith.divf %669, %670 : vector<8x32xf32>
    %cst_308 = arith.constant dense<0.000000e+00> : vector<8x32xf32>
    %672 = tpu.matmul %657, %472, %cst_308 {dimension_numbers = #tpu.dot_dimension_numbers<[1], [0], [0], [1], [0, 0, 1, 1], [], []>} : vector<8x32xbf16>, vector<32x32xbf16>, vector<8x32xf32> -> vector<8x32xf32>
    %673 = vector.broadcast %473 : vector<1x32xf32> to vector<8x32xf32>
    %674 = arith.addf %672, %673 : vector<8x32xf32>
    %675 = arith.mulf %664, %674 : vector<8x32xf32>
    %676 = arith.addf %466, %675 : vector<8x32xf32>
    %677 = math.tanh %676 : vector<8x32xf32>
    %cst_309 = arith.constant 1.000000e+00 : f32
    %678 = vector.broadcast %cst_309 : f32 to vector<8x32xf32>
    %679 = arith.subf %678, %671 : vector<8x32xf32>
    %680 = arith.mulf %679, %677 : vector<8x32xf32>
    %681 = arith.mulf %671, %656 : vector<8x32xf32>
    %682 = arith.addf %680, %681 : vector<8x32xf32>
    %683 = vector.shape_cast %500 : vector<8x32xf32> to vector<1x8x32xf32>
    %684 = vector.shape_cast %526 : vector<8x32xf32> to vector<1x8x32xf32>
    %685 = vector.shape_cast %552 : vector<8x32xf32> to vector<1x8x32xf32>
    %686 = vector.shape_cast %578 : vector<8x32xf32> to vector<1x8x32xf32>
    %687 = vector.shape_cast %604 : vector<8x32xf32> to vector<1x8x32xf32>
    %688 = vector.shape_cast %630 : vector<8x32xf32> to vector<1x8x32xf32>
    %689 = vector.shape_cast %656 : vector<8x32xf32> to vector<1x8x32xf32>
    %690 = vector.shape_cast %682 : vector<8x32xf32> to vector<1x8x32xf32>
    %691 = tpu.concatenate %683, %684, %685, %686, %687, %688, %689, %690 in 0 : vector<1x8x32xf32>, vector<1x8x32xf32>, vector<1x8x32xf32>, vector<1x8x32xf32>, vector<1x8x32xf32>, vector<1x8x32xf32>, vector<1x8x32xf32>, vector<1x8x32xf32> -> vector<8x8x32xf32>
    %692 = vector.shape_cast %691 : vector<8x8x32xf32> to vector<64x32xf32>
    %693 = arith.truncf %692 : vector<64x32xf32> to vector<64x32xbf16>
    %c0_310 = arith.constant 0 : index
    %c0_311 = arith.constant 0 : index
    %694 = vector.load %arg16[%c0_310, %c0_311] : memref<32x8xbf16, #tpu.memory_space<vmem>>, vector<32x8xbf16>
    %cst_312 = arith.constant dense<0.000000e+00> : vector<64x8xf32>
    %695 = tpu.matmul %693, %694, %cst_312 {dimension_numbers = #tpu.dot_dimension_numbers<[1], [0], [0], [1], [0, 0, 1, 1], [], []>} : vector<64x32xbf16>, vector<32x8xbf16>, vector<64x8xf32> -> vector<64x8xf32>
    %c0_313 = arith.constant 0 : index
    %c0_314 = arith.constant 0 : index
    %696 = vector.load %arg17[%c0_313, %c0_314] : memref<1x8xf32, #tpu.memory_space<vmem>>, vector<1x8xf32>
    %697 = vector.broadcast %696 : vector<1x8xf32> to vector<64x8xf32>
    %698 = arith.addf %695, %697 : vector<64x8xf32>
    %699 = vector.shape_cast %698 : vector<64x8xf32> to vector<8x8x8xf32>
    %c0_315 = arith.constant 0 : index
    %c0_316 = arith.constant 0 : index
    %c0_317 = arith.constant 0 : index
    %700 = vector.load %arg18[%c0_315, %c0_316, %c0_317] : memref<8x8x8xf32, #tpu.memory_space<vmem>>, vector<8x8x8xf32>
    tpu.vector_store %arg18[%c0_315, %c0_316, %c0_317], %699 {strides = array<i32>} : memref<8x8x8xf32, #tpu.memory_space<vmem>>, vector<8x8x8xf32>,
    return
  }
  func.func @transform_0(%arg0: i32) -> (i32, i32, i32) {
    %c0_i32 = arith.constant 0 : i32
    %c0_i32_0 = arith.constant 0 : i32
    %c0_i32_1 = arith.constant 0 : i32
    return %c0_i32, %arg0, %c0_i32_0 : i32, i32, i32
  }
  func.func @transform_1(%arg0: i32) -> (i32, i32, i32) {
    %c0_i32 = arith.constant 0 : i32
    %c0_i32_0 = arith.constant 0 : i32
    %c0_i32_1 = arith.constant 0 : i32
    %c0_i32_2 = arith.constant 0 : i32
    return %c0_i32, %c0_i32_0, %c0_i32_1 : i32, i32, i32
  }
  func.func @transform_2(%arg0: i32) -> (i32, i32, i32) {
    %c0_i32 = arith.constant 0 : i32
    %c0_i32_0 = arith.constant 0 : i32
    %c0_i32_1 = arith.constant 0 : i32
    %c0_i32_2 = arith.constant 0 : i32
    return %c0_i32, %c0_i32_0, %c0_i32_1 : i32, i32, i32
  }
  func.func @transform_3(%arg0: i32) -> (i32, i32, i32) {
    %c0_i32 = arith.constant 0 : i32
    %c0_i32_0 = arith.constant 0 : i32
    %c0_i32_1 = arith.constant 0 : i32
    %c0_i32_2 = arith.constant 0 : i32
    return %c0_i32, %c0_i32_0, %c0_i32_1 : i32, i32, i32
  }
  func.func @transform_4(%arg0: i32) -> (i32, i32) {
    %c0_i32 = arith.constant 0 : i32
    %c0_i32_0 = arith.constant 0 : i32
    %c0_i32_1 = arith.constant 0 : i32
    return %c0_i32, %c0_i32_0 : i32, i32
  }
  func.func @transform_5(%arg0: i32) -> (i32, i32) {
    %c0_i32 = arith.constant 0 : i32
    %c0_i32_0 = arith.constant 0 : i32
    %c0_i32_1 = arith.constant 0 : i32
    return %c0_i32, %c0_i32_0 : i32, i32
  }
  func.func @transform_6(%arg0: i32) -> (i32, i32) {
    %c0_i32 = arith.constant 0 : i32
    %c0_i32_0 = arith.constant 0 : i32
    %c0_i32_1 = arith.constant 0 : i32
    return %c0_i32, %c0_i32_0 : i32, i32
  }
  func.func @transform_7(%arg0: i32) -> (i32, i32, i32) {
    %c0_i32 = arith.constant 0 : i32
    %c0_i32_0 = arith.constant 0 : i32
    %c0_i32_1 = arith.constant 0 : i32
    %c0_i32_2 = arith.constant 0 : i32
    return %c0_i32, %c0_i32_0, %c0_i32_1 : i32, i32, i32
  }
  func.func @transform_8(%arg0: i32) -> (i32, i32, i32) {
    %c0_i32 = arith.constant 0 : i32
    %c0_i32_0 = arith.constant 0 : i32
    %c0_i32_1 = arith.constant 0 : i32
    %c0_i32_2 = arith.constant 0 : i32
    return %c0_i32, %c0_i32_0, %c0_i32_1 : i32, i32, i32
  }
  func.func @transform_9(%arg0: i32) -> (i32, i32, i32) {
    %c0_i32 = arith.constant 0 : i32
    %c0_i32_0 = arith.constant 0 : i32
    %c0_i32_1 = arith.constant 0 : i32
    %c0_i32_2 = arith.constant 0 : i32
    return %c0_i32, %c0_i32_0, %c0_i32_1 : i32, i32, i32
  }
  func.func @transform_10(%arg0: i32) -> (i32, i32, i32) {
    %c0_i32 = arith.constant 0 : i32
    %c0_i32_0 = arith.constant 0 : i32
    %c0_i32_1 = arith.constant 0 : i32
    %c0_i32_2 = arith.constant 0 : i32
    return %c0_i32, %c0_i32_0, %c0_i32_1 : i32, i32, i32
  }
  func.func @transform_11(%arg0: i32) -> (i32, i32, i32) {
    %c0_i32 = arith.constant 0 : i32
    %c0_i32_0 = arith.constant 0 : i32
    %c0_i32_1 = arith.constant 0 : i32
    %c0_i32_2 = arith.constant 0 : i32
    return %c0_i32, %c0_i32_0, %c0_i32_1 : i32, i32, i32
  }
  func.func @transform_12(%arg0: i32) -> (i32, i32, i32) {
    %c0_i32 = arith.constant 0 : i32
    %c0_i32_0 = arith.constant 0 : i32
    %c0_i32_1 = arith.constant 0 : i32
    %c0_i32_2 = arith.constant 0 : i32
    return %c0_i32, %c0_i32_0, %c0_i32_1 : i32, i32, i32
  }
  func.func @transform_13(%arg0: i32) -> (i32, i32, i32) {
    %c0_i32 = arith.constant 0 : i32
    %c0_i32_0 = arith.constant 0 : i32
    %c0_i32_1 = arith.constant 0 : i32
    %c0_i32_2 = arith.constant 0 : i32
    return %c0_i32, %c0_i32_0, %c0_i32_1 : i32, i32, i32
  }
  func.func @transform_14(%arg0: i32) -> (i32, i32) {
    %c0_i32 = arith.constant 0 : i32
    %c0_i32_0 = arith.constant 0 : i32
    %c0_i32_1 = arith.constant 0 : i32
    return %c0_i32, %c0_i32_0 : i32, i32
  }
  func.func @transform_15(%arg0: i32) -> (i32, i32) {
    %c0_i32 = arith.constant 0 : i32
    %c0_i32_0 = arith.constant 0 : i32
    %c0_i32_1 = arith.constant 0 : i32
    return %c0_i32, %c0_i32_0 : i32, i32
  }
  func.func @transform_16(%arg0: i32) -> (i32, i32) {
    %c0_i32 = arith.constant 0 : i32
    %c0_i32_0 = arith.constant 0 : i32
    %c0_i32_1 = arith.constant 0 : i32
    return %c0_i32, %c0_i32_0 : i32, i32
  }
  func.func @transform_17(%arg0: i32) -> (i32, i32, i32) {
    %c0_i32 = arith.constant 0 : i32
    %c0_i32_0 = arith.constant 0 : i32
    %c0_i32_1 = arith.constant 0 : i32
    return %c0_i32, %arg0, %c0_i32_0 : i32, i32, i32
  }
  func.func @transform_18(%arg0: i32) -> (i32, i32) {
    %c0_i32 = arith.constant 0 : i32
    %c0_i32_0 = arith.constant 0 : i32
    return %arg0, %c0_i32 : i32, i32
  }
}

</mosaic_0001>

<bundles_post_ra>
// kernel: temporal_autoencoder_forward.1
= control target key start
LH: loop header
LB: loop body
LE: loop exit
PB: predicated region body
PF: predicated region fallthrough
CT: control target
= control target key end

     0   :  { %vm89_vm0 = vcmask 1043456   ;;  %vm76_vm1 = vcmask 64512   ;;  %v3103_v24 = vmov 0   ;;  %vm227_vm10 = vcmask 261120   ;;  %s3972_s1 = inlined_call_operand.vmem [shape: bf16[3,8,32], index: 1, kind: input, shape index: {}]   ;;  %s3973_s0 = inlined_call_operand.vmem [shape: f32[8,8,8], index: 0, kind: input, shape index: {}]   ;;  %s3974_s2 = inlined_call_operand.vmem [shape: bf16[3,32,32], index: 2, kind: input, shape index: {}]   ;;  %s3975_s3 = inlined_call_operand.vmem [shape: f32[3,1,32], index: 3, kind: input, shape index: {}]   ;;  %s3976_s4 = inlined_call_operand.vmem [shape: f32[1,32], index: 4, kind: input, shape index: {}]   ;;  %s3977_s6 = inlined_call_operand.vmem [shape: f32[1,16], index: 6, kind: input, shape index: {}]   ;;  %s3978_s5 = inlined_call_operand.vmem [shape: bf16[32,16], index: 5, kind: input, shape index: {}]   ;;  %s3979_s7 = inlined_call_operand.vmem [shape: bf16[8,16,32], index: 7, kind: input, shape index: {}]   ;;  %s3980_s10 = inlined_call_operand.vmem [shape: f32[8,1,32], index: 10, kind: input, shape index: {}]   ;;  %s3981_s18 = inlined_call_operand.vmem [shape: f32[8,16], index: 18, kind: output, shape index: {1}]   ;;  %s3982_s8 = inlined_call_operand.vmem [shape: bf16[8,16,32], index: 8, kind: input, shape index: {}]   ;;  %s3983_s9 = inlined_call_operand.vmem [shape: bf16[8,16,32], index: 9, kind: input, shape index: {}]   ;;  %s3984_s11 = inlined_call_operand.vmem [shape: f32[8,1,32], index: 11, kind: input, shape index: {}]   ;;  %s3985_s13 = inlined_call_operand.vmem [shape: bf16[3,32,32], index: 13, kind: input, shape index: {}]   ;;  %s3986_s12 = inlined_call_operand.vmem [shape: f32[8,1,32], index: 12, kind: input, shape index: {}]   ;;  %s3987_s14 = inlined_call_operand.vmem [shape: f32[1,32], index: 14, kind: input, shape index: {}]   ;;  %s3988_s15 = inlined_call_operand.vmem [shape: bf16[32,8], index: 15, kind: input, shape index: {}]   ;;  %s3989_s16 = inlined_call_operand.vmem [shape: f32[1,8], index: 16, kind: input, shape index: {}]   ;;  %s3990_s17 = inlined_call_operand.vmem [shape: f32[8,8,8], index: 17, kind: output, shape index: {0}]  }
   0x1   :  { %3994 = sst [smem:[#allocation2_spill]] %s3972_s1  ;;  %v3310_v25 = vld [vmem:[%s3975_s3 + $0x1] ss:$0 sm:$0xff]  ;;  %v3325_v32 = vld [vmem:[%s3975_s3] ss:$0 sm:$0xff] }
   0x2   :  { %3995 = sst [smem:[#allocation3_spill]] %s3973_s0  ;;  %v3337_v59 = vld [vmem:[%s3976_s4] ss:$0 sm:$0xff]  ;;  %v3342_v60 = vld [vmem:[%s3975_s3 + $0x2] ss:$0 sm:$0xff] }
   0x3   :  { %3996 = sst [smem:[#allocation4_spill]] %s3974_s2 }
   0x4   :  { %s3997_s29 = sld [smem:[#allocation2_spill]] }
   0x5   :  { %s3998_s19 = sld [smem:[#allocation3_spill]] }
   0x6   :  { %s3999_s2 = sld [smem:[#allocation4_spill]] }
   0xa   :  { %v2514_v0 = vld [vmem:[%s3997_s29 + $0x4] sm:$0xf]  ;;  %v71_v9 = vld [vmem:[%s3997_s29] sm:$0xf]  ;;  %v2520_v14 = vld [vmem:[%s3997_s29 + $0x8] sm:$0xf] }
   0xb   :  { %v65_v1 = vld [vmem:[%s3998_s19 + $0x30] sm:$0xff]  ;;  %v66_v2 = vld [vmem:[%s3998_s19 + $0x38] sm:$0xff]  ;;  %v130_v3 = vsel %vm89_vm0, %v2514_v0, 0  ;;  %v91_v11 = vsel %vm89_vm0, %v71_v9, 0  ;;  %v59_v12 = vld [vmem:[%s3998_s19] sm:$0xff]  ;;  %v169_v17 = vsel %vm89_vm0, %v2520_v14, 0 }
   0xc   :  { %v3209_v4 = vpack.c.bf16 %v66_v2, %v65_v1  ;;  %v3214_v5 = vld [vmem:[%s3999_s2 + $0x8] sm:$0xff]  ;;  %v61_v6 = vld [vmem:[%s3998_s19 + $0x10] sm:$0xff]  ;;  %2909 = vmatpush.bf16.msra.mxu3 %v130_v3  ;;  %v3222_v7 = vld [vmem:[%s3999_s2] sm:$0xff]  ;;  %2908 = vmatpush.bf16.msra.mxu2 %v130_v3 }
   0xd   :  { %v62_v8 = vld [vmem:[%s3998_s19 + $0x18] sm:$0xff]  ;;  %v60_v13 = vld [vmem:[%s3998_s19 + $0x8] sm:$0xff]  ;;  %139 = vmatpush.bf16.msra.mxu1 %v130_v3  ;;  %100 = vmatpush.bf16.msra.mxu0 %v91_v11  ;;  %v3262_v19 = vld [vmem:[%s3999_s2 + $0x10] sm:$0xff] }
   0xe   :  { %v68_v10 = vpack.c.bf16 %v62_v8, %v61_v6  ;;  %v3244_v15 = vld [vmem:[%s3999_s2 + $0x18] sm:$0xff]  ;;  %v67_v16 = vpack.c.bf16 %v60_v13, %v59_v12  ;;  %v3256_v18 = vld [vmem:[%s3999_s2 + $0x28] sm:$0xff]  ;;  %v3270_v20 = vld [vmem:[%s3999_s2 + $0x20] sm:$0xff] }
   0xf   :  { %2519 = vmatmul.msk.bf16.vlgmr.msra.gmra.mxu3 %vm76_vm1, %v3209_v4  ;;  %v63_v21 = vld [vmem:[%s3998_s19 + $0x20] sm:$0xff]  ;;  %v64_v22 = vld [vmem:[%s3998_s19 + $0x28] sm:$0xff] }
  0x10   :  { %237 = vmatpush.bf16.msrb.mxu3 %v3214_v5  ;;  %2517 = vmatmul.msk.bf16.vlgmr.msra.gmra.mxu2 %vm76_vm1, %v68_v10  ;;  %v69_v23 = vpack.c.bf16 %v64_v22, %v63_v21 }
  0x11   :  { %178 = vmatpush.bf16.msrb.mxu2 %v169_v17  ;;  %2516 = vmatmul.msk.bf16.vlgmr.msra.gmra.mxu1 %vm76_vm1, %v67_v16 }
  0x12   :  { %2510 = vmatmul.msk.bf16.vlgmr.msra.gmra.mxu0 %vm76_vm1, %v67_v16  ;;  %420 = vmatpush.bf16.msrb.mxu1 %v3256_v18 }
  0x13   :  { %387 = vmatpush.bf16.msrb.mxu0 %v3244_v15 }
  0x14   :  { %238 = vmatpush.bf16.msrb.mxu3 %v3222_v7 }
  0x15   :  { %444 = vmatpush.bf16.msra.mxu2 %v3214_v5 }
  0x16   :  { %421 = vmatpush.bf16.msrb.mxu1 %v3270_v20 }
  0x17   :  { %388 = vmatpush.bf16.msrb.mxu0 %v3262_v19 }
  0x18   :  { %282 = vmatpush.bf16.msra.mxu3 %v3244_v15 }
  0x19   :  { %445 = vmatpush.bf16.msra.mxu2 %v3222_v7 }
  0x1a   :  { %534 = vmatpush.bf16.msra.mxu1 %v3214_v5 }
  0x1b   :  { %510 = vmatpush.bf16.msra.mxu0 %v3256_v18 }
  0x1c   :  { %283 = vmatpush.bf16.msra.mxu3 %v3262_v19 }
  0x1e   :  { %535 = vmatpush.bf16.msra.mxu1 %v3222_v7 }
  0x1f   :  { %511 = vmatpush.bf16.msra.mxu0 %v3270_v20  ;;  %239 = vmatmul.bf16.vlgmr.msrb.gmra.mxu3 %v3103_v24 }
  0x20   :  { %2518 = vmatmul.msk.bf16.gmra.mxu2 %vm76_vm1, %v69_v23  ;;  %330 = vmatpush.bf16.msrb.mxu3 %v3256_v18 }
  0x22   :  { %2511 = vmatmul.msk.bf16.gmra.mxu0 %vm76_vm1, %v68_v10 }
  0x24   :  { %331 = vmatpush.bf16.msrb.mxu3 %v3270_v20 }
  0x2f   :  { %284 = vmatmul.bf16.vlgmr.msra.gmra.mxu3 %v3103_v24 }
  0x30   :  { %2522 = vmatmul.msk.bf16.vlgmr.msrb.gmra.mxu2 %vm76_vm1, %v67_v16  ;;  %354 = vmatpush.bf16.msra.mxu3 %v3214_v5 }
  0x31   :  { %567 = vmatpush.bf16.msrb.mxu2 %v3244_v15 }
  0x32   :  { %2512 = vmatmul.msk.bf16.gmra.mxu0 %vm76_vm1, %v69_v23 }
  0x34   :  { %355 = vmatpush.bf16.msra.mxu3 %v3222_v7 }
  0x35   :  { %568 = vmatpush.bf16.msrb.mxu2 %v3262_v19 }
  0x3f   :  { %332 = vmatmul.bf16.vlgmr.msrb.gmra.mxu3 %v3103_v24 }
  0x40   :  { %2523 = vmatmul.msk.bf16.gmra.mxu2 %vm76_vm1, %v68_v10  ;;  %477 = vmatpush.bf16.msrb.mxu3 %v3244_v15 }
  0x42   :  { %2513 = vmatmul.msk.bf16.gmra.mxu0 %vm76_vm1, %v3209_v4 }
  0x44   :  { %478 = vmatpush.bf16.msrb.mxu3 %v3262_v19 }
  0x50   :  { %2524 = vmatmul.msk.bf16.gmra.mxu2 %vm76_vm1, %v69_v23 }
  0x60   :  { %2525 = vmatmul.msk.bf16.gmra.mxu2 %vm76_vm1, %v3209_v4 }
  0x8e   :  { %v141_v43 = vpop.f32.mrf.mxu1 }
  0x8f   :  { %v102_v33 = vpop.f32.mrf.mxu0  ;;  %v142_v44 = vadd.f32 %v3310_v25, %v141_v43 }
  0x90   :  { %v103_v34 = vadd.f32 %v3325_v32, %v102_v33 }
  0x92   :  { %v156_v26 = vpop.f32.mrf.mxu3 }
  0x93   :  { %v146_v27 = vpop.f32.mrf.mxu2  ;;  %v3313_v28 = vadd.f32 %v3310_v25, %v156_v26 }
  0x94   :  { %v3316_v29 = vadd.f32 %v3310_v25, %v146_v27 }
  0x9a   :  { %v3318_v30 = vpop.f32.mrf.mxu3 }
  0x9b   :  { %v3320_v31 = vpop.f32.mrf.mxu2 }
  0xa2   :  { %v240_v35 = vpop.f32.mrf.mxu3 }
  0xa3   :  { %v151_v36 = vpop.f32.mrf.mxu2  ;;  %v244_v37 = vadd.f32 %v240_v35, %v103_v34 }
  0xa4   :  { %v3329_v38 = vadd.f32 %v3310_v25, %v151_v36  ;;  %v104_v36 = vpop.f32.mrf.mxu0 }
  0xa5   :  { %v2542_v39 = vmul.f32 -1.442695, %v244_v37 }
  0xa7   :  { %2942 = vpow2.f32 %v2542_v39 }
  0xaa   :  { %v242_v40 = vpop.f32.mrf.mxu3 }
  0xab   :  { %v3332_v50 = vpop.f32.mrf.mxu2 }
  0xac   :  { %v3359_v37 = vpop.f32.mrf.mxu0 }
  0xad   :  { %v2943_v41 = vpop.eup %2942 }
  0xae   :  { %v248_v42 = vadd.f32 1.0, %v2943_v41 }
  0xb0   :  { %2944 = vrcp.f32 %v248_v42  ;;  %v260_v57 = vand.u32 2147483648, %v248_v42  ;;  %vm254_vm3 = vweird.f32 %v248_v42  ;;  %v258_v58 = vand.u32 2147483647, %v248_v42 }
  0xb2   :  { %v285_v45 = vpop.f32.mrf.mxu3  ;;  %v261_v62 = vor.u32 1.1754944e-38, %v260_v57  ;;  %vm259_vm5 = vcmp.eq.f32.partialorder %v258_v58, 8.507059e+37 }
  0xb3   :  { %v289_v46 = vadd.f32 %v285_v45, %v142_v44  ;;  %v180_v0 = vpop.f32.mrf.mxu2  ;;  %v143_v44 = vpop.f32.mrf.mxu1 }
  0xb4   :  { %v181_v2 = vadd.f32 %v3342_v60, %v180_v0  ;;  %v3361_v39 = vpop.f32.mrf.mxu0  ;;  %v144_v45 = vadd.f32 %v3310_v25, %v143_v44 }
  0xb5   :  { %v2551_v47 = vmul.f32 -1.442695, %v289_v46 }
  0xb6   :  { %v2945_v48 = vpop.eup %2944 }
  0xb7   :  { %2946 = vpow2.f32 %v2551_v47  ;;  %v250_v49 = vmul.f32 %v2945_v48, %v248_v42  ;;  %vm255_vm2 = vweird.f32 %v2945_v48 }
  0xb8   :  { %vm256_vm4 = vmor %vm254_vm3, %vm255_vm2 }
  0xb9   :  { %v251_v51 = vsub.f32 1.0, %v250_v49 }
  0xba   :  { %v287_v52 = vpop.f32.mrf.mxu3 }
  0xbb   :  { %v252_v53 = vmul.f32 %v2945_v48, %v251_v51  ;;  %v105_v51 = vadd.f32 %v3325_v32, %v104_v36 }
  0xbc   :  { %v3363_v40 = vpop.f32.mrf.mxu0 }
  0xbd   :  { %v2947_v54 = vpop.eup %2946  ;;  %v253_v55 = vadd.f32 %v2945_v48, %v252_v53 }
  0xbe   :  { %v293_v56 = vadd.f32 1.0, %v2947_v54 }
  0xbf   :  { %v257_v61 = vsel %vm256_vm4, %v2945_v48, %v253_v55 }
  0xc0   :  { %2948 = vrcp.f32 %v293_v56  ;;  %v262_v3 = vsel %vm259_vm5, %v261_v62, %v257_v61  ;;  %v305_v11 = vand.u32 2147483648, %v293_v56  ;;  %v303_v14 = vand.u32 2147483647, %v293_v56 }
  0xc1   :  { %vm299_vm7 = vweird.f32 %v293_v56 }
  0xc2   :  { %v333_v63 = vpop.f32.mrf.mxu3  ;;  %v306_v17 = vor.u32 1.1754944e-38, %v305_v11  ;;  %vm304_vm9 = vcmp.eq.f32.partialorder %v303_v14, 8.507059e+37 }
  0xc3   :  { %v334_v1 = vadd.f32 %v3337_v59, %v333_v63 }
  0xc4   :  { %v3365_v41 = vpop.f32.mrf.mxu0 }
  0xc5   :  { %v337_v4 = vmul.f32 %v334_v1, %v262_v3 }
  0xc6   :  { %v2949_v6 = vpop.eup %2948 }
  0xc7   :  { %v295_v8 = vmul.f32 %v2949_v6, %v293_v56  ;;  %v338_v9 = vadd.f32 %v337_v4, %v181_v2  ;;  %vm300_vm6 = vweird.f32 %v2949_v6 }
  0xc8   :  { %vm301_vm8 = vmor %vm299_vm7, %vm300_vm6 }
  0xc9   :  { %v296_v10 = vsub.f32 1.0, %v295_v8  ;;  %2950 = vtanh.f32 %v338_v9 }
  0xca   :  { %v335_v12 = vpop.f32.mrf.mxu3 }
  0xcb   :  { %v297_v13 = vmul.f32 %v2949_v6, %v296_v10 }
  0xcc   :  { %v3367_v42 = vpop.f32.mrf.mxu0 }
  0xcd   :  { %v298_v16 = vadd.f32 %v2949_v6, %v297_v13  ;;  %v182_v13 = vpop.f32.mrf.mxu2 }
  0xcf   :  { %v302_v21 = vsel %vm301_vm8, %v2949_v6, %v298_v16  ;;  %v2951_v26 = vpop.eup %2950 }
  0xd0   :  { %v307_v22 = vsel %vm304_vm9, %v306_v17, %v302_v21 }
  0xd1   :  { %v340_v23 = vsub.f32 1.0, %v307_v22  ;;  %v342_v33 = vmul.f32 0.0, %v307_v22 }
  0xd3   :  { %v341_v27 = vmul.f32 %v2951_v26, %v340_v23  ;;  %v183_v23 = vadd.f32 %v3342_v60, %v182_v13 }
  0xd4   :  { %v3369_v43 = vpop.f32.mrf.mxu0 }
  0xd5   :  { %v3346_v34 = vadd.f32 %v342_v33, %v341_v27 }
  0xd7   :  { %v344_v35 = vpack.c.bf16 %v3346_v34, %v3346_v34 }
  0xd9   :  { %2560 = vmatmul.msk.bf16.vlgmr.msra.gmra.mxu3 %vm227_vm10, %v344_v35  ;;  %2562 = vmatmul.msk.bf16.vlgmr.msrb.gmra.mxu0 %vm227_vm10, %v344_v35 }
  0xda   :  { %2564 = vmatmul.msk.bf16.vlgmr.msrb.gmra.mxu1 %vm227_vm10, %v344_v35  ;;  %600 = vmatpush.bf16.msra.mxu3 %v3256_v18 }
  0xdb   :  { %624 = vmatpush.bf16.msrb.mxu0 %v3214_v5  ;;  %657 = vmatpush.bf16.msrb.mxu1 %v3244_v15 }
  0xde   :  { %601 = vmatpush.bf16.msra.mxu3 %v3270_v20 }
  0xdf   :  { %625 = vmatpush.bf16.msrb.mxu0 %v3222_v7  ;;  %658 = vmatpush.bf16.msrb.mxu1 %v3262_v19 }
 0x156   :  { %v390_v46 = vpop.f32.mrf.mxu0 }
 0x157   :  { %v394_v47 = vadd.f32 %v390_v46, %v144_v45  ;;  %v423_v48 = vpop.f32.mrf.mxu1 }
 0x158   :  { %v424_v16 = vadd.f32 %v3337_v59, %v423_v48 }
 0x159   :  { %v2563_v49 = vmul.f32 -1.442695, %v394_v47 }
 0x15b   :  { %2952 = vpow2.f32 %v2563_v49 }
 0x15c   :  { %v357_v52 = vpop.f32.mrf.mxu3 }
 0x15d   :  { %v361_v53 = vadd.f32 %v357_v52, %v105_v51 }
 0x15e   :  { %v392_v54 = vpop.f32.mrf.mxu0 }
 0x15f   :  { %v2561_v55 = vmul.f32 -1.442695, %v361_v53  ;;  %v425_v56 = vpop.f32.mrf.mxu1 }
 0x161   :  { %v2953_v57 = vpop.eup %2952  ;;  %2954 = vpow2.f32 %v2561_v55 }
 0x162   :  { %v398_v58 = vadd.f32 1.0, %v2953_v57 }
 0x164   :  { %v359_v61 = vpop.f32.mrf.mxu3  ;;  %2956 = vrcp.f32 %v398_v58  ;;  %v410_v26 = vand.u32 2147483648, %v398_v58  ;;  %vm404_vm0 = vweird.f32 %v398_v58  ;;  %v408_v33 = vand.u32 2147483647, %v398_v58 }
 0x165   :  { %v108_v61 = vadd.f32 %v3325_v32, %v3359_v37 }
 0x166   :  { %v411_v44 = vor.u32 1.1754944e-38, %v410_v26  ;;  %vm409_vm3 = vcmp.eq.f32.partialorder %v408_v33, 8.507059e+37 }
 0x167   :  { %v2955_v62 = vpop.eup %2954 }
 0x168   :  { %v365_v63 = vadd.f32 1.0, %v2955_v62 }
 0x16a   :  { %2958 = vrcp.f32 %v365_v63  ;;  %v2957_v0 = vpop.eup %2956  ;;  %v377_v8 = vand.u32 2147483648, %v365_v63  ;;  %v375_v10 = vand.u32 2147483647, %v365_v63  ;;  %vm371_vm12 = vweird.f32 %v365_v63 }
 0x16b   :  { %v400_v1 = vmul.f32 %v2957_v0, %v398_v58  ;;  %vm405_vm15 = vweird.f32 %v2957_v0 }
 0x16c   :  { %v378_v14 = vor.u32 1.1754944e-38, %v377_v8  ;;  %vm376_vm14 = vcmp.eq.f32.partialorder %v375_v10, 8.507059e+37  ;;  %vm406_vm2 = vmor %vm404_vm0, %vm405_vm15 }
 0x16d   :  { %v401_v4 = vsub.f32 1.0, %v400_v1 }
 0x16f   :  { %v402_v11 = vmul.f32 %v2957_v0, %v401_v4 }
 0x170   :  { %v2959_v2 = vpop.eup %2958 }
 0x171   :  { %v367_v3 = vmul.f32 %v2959_v2, %v365_v63  ;;  %vm372_vm11 = vweird.f32 %v2959_v2  ;;  %v403_v21 = vadd.f32 %v2957_v0, %v402_v11 }
 0x172   :  { %vm373_vm13 = vmor %vm371_vm12, %vm372_vm11 }
 0x173   :  { %v368_v6 = vsub.f32 1.0, %v367_v3  ;;  %v407_v36 = vsel %vm406_vm2, %v2957_v0, %v403_v21 }
 0x174   :  { %v412_v45 = vsel %vm409_vm3, %v411_v44, %v407_v36 }
 0x175   :  { %v369_v9 = vmul.f32 %v2959_v2, %v368_v6  ;;  %v430_v46 = vsub.f32 1.0, %v412_v45  ;;  %v432_v49 = vmul.f32 %v412_v45, %v3346_v34  ;;  %v185_v34 = vpop.f32.mrf.mxu2 }
 0x177   :  { %v370_v12 = vadd.f32 %v2959_v2, %v369_v9 }
 0x179   :  { %v374_v17 = vsel %vm373_vm13, %v2959_v2, %v370_v12 }
 0x17a   :  { %v379_v22 = vsel %vm376_vm14, %v378_v14, %v374_v17 }
 0x17b   :  { %v427_v27 = vmul.f32 %v424_v16, %v379_v22 }
 0x17d   :  { %v428_v35 = vadd.f32 %v427_v27, %v183_v23  ;;  %v3389_v53 = vpop.f32.mrf.mxu2 }
 0x17f   :  { %2960 = vtanh.f32 %v428_v35 }
 0x185   :  { %v2961_v47 = vpop.eup %2960  ;;  %v3391_v54 = vpop.f32.mrf.mxu2 }
 0x186   :  { %v431_v48 = vmul.f32 %v2961_v47, %v430_v46  ;;  %v186_v46 = vadd.f32 %v3342_v60, %v185_v34 }
 0x188   :  { %v3376_v51 = vadd.f32 %v432_v49, %v431_v48 }
 0x18a   :  { %v434_v52 = vpack.c.bf16 %v3376_v51, %v3376_v51 }
 0x18c   :  { %2565 = vmatmul.msk.bf16.vlgmr.msra.gmra.mxu2 %vm227_vm10, %v434_v52  ;;  %2567 = vmatmul.msk.bf16.vlgmr.msrb.gmra.mxu3 %vm227_vm10, %v434_v52 }
 0x18d   :  { %2569 = vmatmul.msk.bf16.vlgmr.msra.gmra.mxu0 %vm227_vm10, %v434_v52  ;;  %690 = vmatpush.bf16.msra.mxu2 %v3256_v18  ;;  %v3393_v55 = vpop.f32.mrf.mxu2 }
 0x18e   :  { %714 = vmatpush.bf16.msrb.mxu3 %v3214_v5  ;;  %747 = vmatpush.bf16.msra.mxu0 %v3244_v15 }
 0x191   :  { %691 = vmatpush.bf16.msra.mxu2 %v3270_v20 }
 0x192   :  { %715 = vmatpush.bf16.msrb.mxu3 %v3222_v7  ;;  %748 = vmatpush.bf16.msra.mxu0 %v3262_v19 }
 0x195   :  { %v3395_v56 = vpop.f32.mrf.mxu2 }
 0x19d   :  { %v3397_v57 = vpop.f32.mrf.mxu2 }
 0x20a   :  { %v513_v58 = vpop.f32.mrf.mxu0 }
 0x20b   :  { %v514_v35 = vadd.f32 %v3337_v59, %v513_v58 }
 0x20f   :  { %v447_v62 = vpop.f32.mrf.mxu2  ;;  %v480_v63 = vpop.f32.mrf.mxu3 }
 0x210   :  { %v451_v0 = vadd.f32 %v447_v62, %v108_v61  ;;  %v484_v1 = vadd.f32 %v480_v63, %v3316_v29 }
 0x212   :  { %v2566_v2 = vmul.f32 -1.442695, %v451_v0  ;;  %v2568_v3 = vmul.f32 -1.442695, %v484_v1  ;;  %v515_v4 = vpop.f32.mrf.mxu0 }
 0x214   :  { %2962 = vpow2.f32 %v2566_v2 }
 0x215   :  { %2964 = vpow2.f32 %v2568_v3 }
 0x217   :  { %v449_v6 = vpop.f32.mrf.mxu2  ;;  %v482_v8 = vpop.f32.mrf.mxu3 }
 0x21a   :  { %v2963_v9 = vpop.eup %2962 }
 0x21b   :  { %v2965_v10 = vpop.eup %2964  ;;  %v455_v11 = vadd.f32 1.0, %v2963_v9  ;;  %v149_v9 = vadd.f32 %v3310_v25, %v3320_v31 }
 0x21c   :  { %v488_v12 = vadd.f32 1.0, %v2965_v10 }
 0x21d   :  { %2966 = vrcp.f32 %v455_v11  ;;  %v467_v21 = vand.u32 2147483648, %v455_v11  ;;  %v465_v23 = vand.u32 2147483647, %v455_v11  ;;  %vm461_vm5 = vweird.f32 %v455_v11 }
 0x21e   :  { %2968 = vrcp.f32 %v488_v12  ;;  %v500_v48 = vand.u32 2147483648, %v488_v12  ;;  %vm494_vm9 = vweird.f32 %v488_v12  ;;  %v498_v49 = vand.u32 2147483647, %v488_v12 }
 0x21f   :  { %v468_v33 = vor.u32 1.1754944e-38, %v467_v21  ;;  %vm466_vm7 = vcmp.eq.f32.partialorder %v465_v23, 8.507059e+37 }
 0x220   :  { %v501_v62 = vor.u32 1.1754944e-38, %v500_v48  ;;  %vm499_vm12 = vcmp.eq.f32.partialorder %v498_v49, 8.507059e+37  ;;  %v188_v49 = vadd.f32 %v3342_v60, %v3389_v53 }
 0x223   :  { %v2967_v13 = vpop.eup %2966 }
 0x224   :  { %v2969_v37 = vpop.eup %2968  ;;  %v457_v14 = vmul.f32 %v2967_v13, %v455_v11  ;;  %vm462_vm4 = vweird.f32 %v2967_v13 }
 0x225   :  { %v490_v16 = vmul.f32 %v2969_v37, %v488_v12  ;;  %vm463_vm6 = vmor %vm461_vm5, %vm462_vm4  ;;  %vm495_vm8 = vweird.f32 %v2969_v37 }
 0x226   :  { %v458_v17 = vsub.f32 1.0, %v457_v14  ;;  %vm496_vm11 = vmor %vm494_vm9, %vm495_vm8 }
 0x227   :  { %v491_v29 = vsub.f32 1.0, %v490_v16 }
 0x228   :  { %v459_v22 = vmul.f32 %v2967_v13, %v458_v17 }
 0x229   :  { %v492_v26 = vmul.f32 %v2969_v37, %v491_v29 }
 0x22a   :  { %v460_v27 = vadd.f32 %v2967_v13, %v459_v22 }
 0x22b   :  { %v493_v45 = vadd.f32 %v2969_v37, %v492_v26 }
 0x22c   :  { %v464_v36 = vsel %vm463_vm6, %v2967_v13, %v460_v27 }
 0x22d   :  { %v469_v44 = vsel %vm466_vm7, %v468_v33, %v464_v36  ;;  %v497_v61 = vsel %vm496_vm11, %v2969_v37, %v493_v45 }
 0x22e   :  { %v517_v47 = vmul.f32 %v514_v35, %v469_v44  ;;  %v502_v63 = vsel %vm499_vm12, %v501_v62, %v497_v61 }
 0x22f   :  { %v520_v0 = vsub.f32 1.0, %v502_v63  ;;  %v522_v2 = vmul.f32 %v502_v63, %v3376_v51  ;;  %v110_v51 = vadd.f32 %v3325_v32, %v3361_v39 }
 0x230   :  { %v518_v52 = vadd.f32 %v517_v47, %v186_v46 }
 0x232   :  { %2970 = vtanh.f32 %v518_v52 }
 0x238   :  { %v2971_v58 = vpop.eup %2970 }
 0x239   :  { %v521_v1 = vmul.f32 %v2971_v58, %v520_v0 }
 0x23b   :  { %v3405_v3 = vadd.f32 %v522_v2, %v521_v1 }
 0x23d   :  { %v524_v34 = vpack.c.bf16 %v3405_v3, %v3405_v3 }
 0x23f   :  { %2570 = vmatmul.msk.bf16.vlgmr.msra.gmra.mxu1 %vm227_vm10, %v524_v34  ;;  %2572 = vmatmul.msk.bf16.vlgmr.msrb.gmra.mxu2 %vm227_vm10, %v524_v34 }
 0x240   :  { %2574 = vmatmul.msk.bf16.vlgmr.msra.gmra.mxu3 %vm227_vm10, %v524_v34  ;;  %780 = vmatpush.bf16.msra.mxu1 %v3256_v18 }
 0x241   :  { %804 = vmatpush.bf16.msrb.mxu2 %v3214_v5  ;;  %837 = vmatpush.bf16.msra.mxu3 %v3244_v15 }
 0x244   :  { %781 = vmatpush.bf16.msra.mxu1 %v3270_v20 }
 0x245   :  { %805 = vmatpush.bf16.msrb.mxu2 %v3222_v7  ;;  %838 = vmatpush.bf16.msra.mxu3 %v3262_v19 }
 0x2bc   :  { %v537_v4 = vpop.f32.mrf.mxu1 }
 0x2bd   :  { %v541_v6 = vadd.f32 %v537_v4, %v110_v51 }
 0x2bf   :  { %v2571_v8 = vmul.f32 -1.442695, %v541_v6 }
 0x2c1   :  { %2972 = vpow2.f32 %v2571_v8 }
 0x2c2   :  { %v570_v10 = vpop.f32.mrf.mxu2 }
 0x2c3   :  { %v574_v11 = vadd.f32 %v570_v10, %v149_v9  ;;  %v603_v12 = vpop.f32.mrf.mxu3 }
 0x2c4   :  { %v539_v13 = vpop.f32.mrf.mxu1  ;;  %v604_v48 = vadd.f32 %v3337_v59, %v603_v12 }
 0x2c5   :  { %v2573_v37 = vmul.f32 -1.442695, %v574_v11 }
 0x2c7   :  { %v2973_v14 = vpop.eup %2972  ;;  %2974 = vpow2.f32 %v2573_v37 }
 0x2c8   :  { %v545_v16 = vadd.f32 1.0, %v2973_v14 }
 0x2ca   :  { %2976 = vrcp.f32 %v545_v16  ;;  %v572_v17 = vpop.f32.mrf.mxu2  ;;  %v557_v27 = vand.u32 2147483648, %v545_v16  ;;  %v555_v33 = vand.u32 2147483647, %v545_v16  ;;  %vm551_vm14 = vweird.f32 %v545_v16 }
 0x2cb   :  { %v605_v21 = vpop.f32.mrf.mxu3 }
 0x2cc   :  { %v558_v45 = vor.u32 1.1754944e-38, %v557_v27  ;;  %vm556_vm0 = vcmp.eq.f32.partialorder %v555_v33, 8.507059e+37 }
 0x2cd   :  { %v2975_v29 = vpop.eup %2974 }
 0x2ce   :  { %v578_v39 = vadd.f32 1.0, %v2975_v29 }
 0x2d0   :  { %v2977_v22 = vpop.eup %2976  ;;  %2978 = vrcp.f32 %v578_v39  ;;  %v590_v62 = vand.u32 2147483648, %v578_v39  ;;  %v588_v0 = vand.u32 2147483647, %v578_v39  ;;  %vm584_vm3 = vweird.f32 %v578_v39 }
 0x2d1   :  { %v547_v23 = vmul.f32 %v2977_v22, %v545_v16  ;;  %vm552_vm13 = vweird.f32 %v2977_v22 }
 0x2d2   :  { %vm553_vm15 = vmor %vm551_vm14, %vm552_vm13  ;;  %v591_v2 = vor.u32 1.1754944e-38, %v590_v62  ;;  %vm589_vm5 = vcmp.eq.f32.partialorder %v588_v0, 8.507059e+37 }
 0x2d3   :  { %v548_v26 = vsub.f32 1.0, %v547_v23 }
 0x2d5   :  { %v549_v31 = vmul.f32 %v2977_v22, %v548_v26 }
 0x2d6   :  { %v2979_v35 = vpop.eup %2978 }
 0x2d7   :  { %v580_v36 = vmul.f32 %v2979_v35, %v578_v39  ;;  %v550_v44 = vadd.f32 %v2977_v22, %v549_v31  ;;  %vm585_vm2 = vweird.f32 %v2979_v35 }
 0x2d8   :  { %vm586_vm4 = vmor %vm584_vm3, %vm585_vm2 }
 0x2d9   :  { %v581_v46 = vsub.f32 1.0, %v580_v36  ;;  %v554_v47 = vsel %vm553_vm15, %v2977_v22, %v550_v44 }
 0x2da   :  { %v559_v52 = vsel %vm556_vm0, %v558_v45, %v554_v47 }
 0x2db   :  { %v582_v61 = vmul.f32 %v2979_v35, %v581_v46  ;;  %v607_v63 = vmul.f32 %v604_v48, %v559_v52  ;;  %v191_v52 = vadd.f32 %v3342_v60, %v3391_v54 }
 0x2dd   :  { %v583_v58 = vadd.f32 %v2979_v35, %v582_v61  ;;  %v608_v1 = vadd.f32 %v607_v63, %v188_v49 }
 0x2df   :  { %v587_v34 = vsel %vm586_vm4, %v2979_v35, %v583_v58  ;;  %2980 = vtanh.f32 %v608_v1 }
 0x2e0   :  { %v592_v51 = vsel %vm589_vm5, %v591_v2, %v587_v34 }
 0x2e1   :  { %v610_v4 = vsub.f32 1.0, %v592_v51  ;;  %v612_v53 = vmul.f32 %v592_v51, %v3405_v3  ;;  %v113_v3 = vadd.f32 %v3325_v32, %v3363_v40 }
 0x2e5   :  { %v2981_v6 = vpop.eup %2980 }
 0x2e6   :  { %v611_v8 = vmul.f32 %v2981_v6, %v610_v4 }
 0x2e8   :  { %v3426_v9 = vadd.f32 %v612_v53, %v611_v8  ;;  %v154_v53 = vadd.f32 %v3310_v25, %v3332_v50 }
 0x2ea   :  { %v614_v10 = vpack.c.bf16 %v3426_v9, %v3426_v9 }
 0x2ec   :  { %2575 = vmatmul.msk.bf16.vlgmr.msrb.gmra.mxu0 %vm227_vm10, %v614_v10  ;;  %2577 = vmatmul.msk.bf16.vlgmr.msrb.gmra.mxu1 %vm227_vm10, %v614_v10 }
 0x2ed   :  { %2579 = vmatmul.msk.bf16.vlgmr.msra.gmra.mxu2 %vm227_vm10, %v614_v10  ;;  %870 = vmatpush.bf16.msrb.mxu0 %v3256_v18 }
 0x2ee   :  { %894 = vmatpush.bf16.msrb.mxu1 %v3214_v5  ;;  %927 = vmatpush.bf16.msra.mxu2 %v3244_v15 }
 0x2f1   :  { %871 = vmatpush.bf16.msrb.mxu0 %v3270_v20 }
 0x2f2   :  { %895 = vmatpush.bf16.msrb.mxu1 %v3222_v7  ;;  %928 = vmatpush.bf16.msra.mxu2 %v3262_v19 }
 0x369   :  { %v627_v11 = vpop.f32.mrf.mxu0  ;;  %v660_v12 = vpop.f32.mrf.mxu1 }
 0x36a   :  { %v631_v13 = vadd.f32 %v627_v11, %v113_v3  ;;  %v664_v37 = vadd.f32 %v660_v12, %v3329_v38  ;;  %v115_v12 = vadd.f32 %v3325_v32, %v3365_v41 }
 0x36c   :  { %v2576_v14 = vmul.f32 -1.442695, %v631_v13  ;;  %v2578_v16 = vmul.f32 -1.442695, %v664_v37 }
 0x36e   :  { %2982 = vpow2.f32 %v2576_v14 }
 0x36f   :  { %2984 = vpow2.f32 %v2578_v16 }
 0x370   :  { %v693_v5 = vpop.f32.mrf.mxu2 }
 0x371   :  { %v629_v15 = vpop.f32.mrf.mxu0  ;;  %v662_v17 = vpop.f32.mrf.mxu1  ;;  %v694_v47 = vadd.f32 %v3337_v59, %v693_v5 }
 0x374   :  { %v2983_v21 = vpop.eup %2982 }
 0x375   :  { %v2985_v29 = vpop.eup %2984  ;;  %v635_v7 = vadd.f32 1.0, %v2983_v21 }
 0x376   :  { %v668_v39 = vadd.f32 1.0, %v2985_v29 }
 0x377   :  { %2986 = vrcp.f32 %v635_v7  ;;  %v647_v31 = vand.u32 2147483648, %v635_v7  ;;  %v645_v35 = vand.u32 2147483647, %v635_v7  ;;  %vm641_vm7 = vweird.f32 %v635_v7 }
 0x378   :  { %2988 = vrcp.f32 %v668_v39  ;;  %v695_v19 = vpop.f32.mrf.mxu2  ;;  %v680_v61 = vand.u32 2147483648, %v668_v39  ;;  %vm674_vm12 = vweird.f32 %v668_v39  ;;  %v678_v63 = vand.u32 2147483647, %v668_v39 }
 0x379   :  { %v648_v45 = vor.u32 1.1754944e-38, %v647_v31  ;;  %vm646_vm9 = vcmp.eq.f32.partialorder %v645_v35, 8.507059e+37 }
 0x37a   :  { %v681_v1 = vor.u32 1.1754944e-38, %v680_v61  ;;  %vm679_vm14 = vcmp.eq.f32.partialorder %v678_v63, 8.507059e+37 }
 0x37d   :  { %v2987_v40 = vpop.eup %2986 }
 0x37e   :  { %v2989_v22 = vpop.eup %2988  ;;  %v637_v23 = vmul.f32 %v2987_v40, %v635_v7  ;;  %vm642_vm6 = vweird.f32 %v2987_v40 }
 0x37f   :  { %v670_v26 = vmul.f32 %v2989_v22, %v668_v39  ;;  %vm643_vm8 = vmor %vm641_vm7, %vm642_vm6  ;;  %vm675_vm11 = vweird.f32 %v2989_v22 }
 0x380   :  { %v638_v27 = vsub.f32 1.0, %v637_v23  ;;  %vm676_vm13 = vmor %vm674_vm12, %vm675_vm11 }
 0x381   :  { %v671_v38 = vsub.f32 1.0, %v670_v26 }
 0x382   :  { %v639_v33 = vmul.f32 %v2987_v40, %v638_v27 }
 0x383   :  { %v672_v36 = vmul.f32 %v2989_v22, %v671_v38 }
 0x384   :  { %v640_v44 = vadd.f32 %v2987_v40, %v639_v33 }
 0x385   :  { %v673_v48 = vadd.f32 %v2989_v22, %v672_v36 }
 0x386   :  { %v644_v46 = vsel %vm643_vm8, %v2987_v40, %v640_v44  ;;  %v193_v44 = vadd.f32 %v3342_v60, %v3393_v55 }
 0x387   :  { %v649_v49 = vsel %vm646_vm9, %v648_v45, %v644_v46  ;;  %v677_v58 = vsel %vm676_vm13, %v2989_v22, %v673_v48 }
 0x388   :  { %v697_v62 = vmul.f32 %v694_v47, %v649_v49  ;;  %v682_v2 = vsel %vm679_vm14, %v681_v1, %v677_v58 }
 0x389   :  { %v700_v34 = vsub.f32 1.0, %v682_v2  ;;  %v702_v6 = vmul.f32 %v682_v2, %v3426_v9 }
 0x38a   :  { %v698_v0 = vadd.f32 %v697_v62, %v191_v52 }
 0x38c   :  { %2990 = vtanh.f32 %v698_v0 }
 0x392   :  { %v2991_v51 = vpop.eup %2990 }
 0x393   :  { %v701_v4 = vmul.f32 %v2991_v51, %v700_v34  ;;  %v118_v34 = vadd.f32 %v3325_v32, %v3367_v42 }
 0x395   :  { %v3446_v8 = vadd.f32 %v702_v6, %v701_v4 }
 0x397   :  { %v704_v54 = vpack.c.bf16 %v3446_v8, %v3446_v8 }
 0x399   :  { %2580 = vmatmul.msk.bf16.vlgmr.msrb.gmra.mxu3 %vm227_vm10, %v704_v54  ;;  %2582 = vmatmul.msk.bf16.vlgmr.msra.gmra.mxu0 %vm227_vm10, %v704_v54 }
 0x39a   :  { %2584 = vmatmul.msk.bf16.vlgmr.msra.gmra.mxu1 %vm227_vm10, %v704_v54  ;;  %960 = vmatpush.bf16.msrb.mxu3 %v3256_v18 }
 0x39e   :  { %961 = vmatpush.bf16.msrb.mxu3 %v3270_v20 }
 0x416   :  { %v750_v10 = vpop.f32.mrf.mxu0 }
 0x417   :  { %v754_v9 = vadd.f32 %v750_v10, %v154_v53  ;;  %v783_v3 = vpop.f32.mrf.mxu1 }
 0x418   :  { %v784_v31 = vadd.f32 %v3337_v59, %v783_v3 }
 0x419   :  { %v2583_v11 = vmul.f32 -1.442695, %v754_v9 }
 0x41b   :  { %2992 = vpow2.f32 %v2583_v11 }
 0x41c   :  { %v717_v13 = vpop.f32.mrf.mxu3 }
 0x41d   :  { %v721_v37 = vadd.f32 %v717_v13, %v115_v12 }
 0x41e   :  { %v752_v14 = vpop.f32.mrf.mxu0 }
 0x41f   :  { %v2581_v16 = vmul.f32 -1.442695, %v721_v37  ;;  %v785_v5 = vpop.f32.mrf.mxu1 }
 0x421   :  { %v2993_v15 = vpop.eup %2992  ;;  %2994 = vpow2.f32 %v2581_v16 }
 0x422   :  { %v758_v18 = vadd.f32 1.0, %v2993_v15 }
 0x424   :  { %v719_v20 = vpop.f32.mrf.mxu3  ;;  %2996 = vrcp.f32 %v758_v18  ;;  %v770_v45 = vand.u32 2147483648, %v758_v18  ;;  %vm764_vm5 = vweird.f32 %v758_v18  ;;  %v768_v47 = vand.u32 2147483647, %v758_v18 }
 0x426   :  { %v771_v52 = vor.u32 1.1754944e-38, %v770_v45  ;;  %vm769_vm7 = vcmp.eq.f32.partialorder %v768_v47, 8.507059e+37  ;;  %v120_v47 = vadd.f32 %v3325_v32, %v3369_v43  ;;  %v2874_v32 = vld [vmem:[%s3978_s5] sm:$0xff] }
 0x427   :  { %v2995_v17 = vpop.eup %2994 }
 0x428   :  { %v725_v50 = vadd.f32 1.0, %v2995_v17 }
 0x42a   :  { %2998 = vrcp.f32 %v725_v50  ;;  %v2997_v21 = vpop.eup %2996  ;;  %v737_v40 = vand.u32 2147483648, %v725_v50  ;;  %v735_v23 = vand.u32 2147483647, %v725_v50  ;;  %vm731_vm0 = vweird.f32 %v725_v50 }
 0x42b   :  { %v760_v29 = vmul.f32 %v2997_v21, %v758_v18  ;;  %vm765_vm4 = vweird.f32 %v2997_v21 }
 0x42c   :  { %v738_v38 = vor.u32 1.1754944e-38, %v737_v40  ;;  %vm736_vm3 = vcmp.eq.f32.partialorder %v735_v23, 8.507059e+37  ;;  %vm766_vm6 = vmor %vm764_vm5, %vm765_vm4  ;;  %v196_v40 = vadd.f32 %v3342_v60, %v3395_v56 }
 0x42d   :  { %v761_v19 = vsub.f32 1.0, %v760_v29 }
 0x42f   :  { %v762_v26 = vmul.f32 %v2997_v21, %v761_v19 }
 0x430   :  { %v2999_v7 = vpop.eup %2998 }
 0x431   :  { %v727_v39 = vmul.f32 %v2999_v7, %v725_v50  ;;  %vm732_vm15 = vweird.f32 %v2999_v7  ;;  %v763_v35 = vadd.f32 %v2997_v21, %v762_v26 }
 0x432   :  { %vm733_vm2 = vmor %vm731_vm0, %vm732_vm15 }
 0x433   :  { %v728_v41 = vsub.f32 1.0, %v727_v39  ;;  %v767_v49 = vsel %vm766_vm6, %v2997_v21, %v763_v35 }
 0x434   :  { %v772_v61 = vsel %vm769_vm7, %v771_v52, %v767_v49 }
 0x435   :  { %v729_v22 = vmul.f32 %v2999_v7, %v728_v41  ;;  %v790_v62 = vsub.f32 1.0, %v772_v61  ;;  %v792_v58 = vmul.f32 %v772_v61, %v3446_v8  ;;  %v159_v61 = vadd.f32 %v3310_v25, %v3318_v30 }
 0x437   :  { %v730_v27 = vadd.f32 %v2999_v7, %v729_v22 }
 0x439   :  { %v734_v33 = vsel %vm733_vm2, %v2999_v7, %v730_v27 }
 0x43a   :  { %v739_v36 = vsel %vm736_vm3, %v738_v38, %v734_v33 }
 0x43b   :  { %v787_v46 = vmul.f32 %v784_v31, %v739_v36 }
 0x43d   :  { %v788_v48 = vadd.f32 %v787_v46, %v193_v44 }
 0x43f   :  { %3000 = vtanh.f32 %v788_v48 }
 0x445   :  { %v3001_v63 = vpop.eup %3000 }
 0x446   :  { %v791_v0 = vmul.f32 %v3001_v63, %v790_v62 }
 0x448   :  { %v793_v1 = vadd.f32 %v792_v58, %v791_v0 }
 0x44a   :  { %v794_v2 = vpack.c.bf16 %v793_v1, %v793_v1 }
 0x44c   :  { %2585 = vmatmul.msk.bf16.vlgmr.msrb.gmra.mxu2 %vm227_vm10, %v794_v2  ;;  %2587 = vmatmul.msk.bf16.vlgmr.msra.gmra.mxu3 %vm227_vm10, %v794_v2 }
 0x44d   :  { %2589 = vmatmul.msk.bf16.vlgmr.msrb.gmra.mxu0 %vm227_vm10, %v794_v2 }
 0x4ca   :  { %v873_v55 = vpop.f32.mrf.mxu0 }
 0x4cb   :  { %v874_v7 = vadd.f32 %v3337_v59, %v873_v55 }
 0x4cf   :  { %v807_v51 = vpop.f32.mrf.mxu2  ;;  %v840_v4 = vpop.f32.mrf.mxu3 }
 0x4d0   :  { %v811_v6 = vadd.f32 %v807_v51, %v118_v34  ;;  %v844_v54 = vadd.f32 %v840_v4, %v3313_v28  ;;  %v2876_v34 = vld [vmem:[%s3979_s7] sm:$0xff]  ;;  %v2877_v51 = vld [vmem:[%s3979_s7 + $0x8] sm:$0xff] }
 0x4d1   :  { %1036 = vmatpush.bf16.msra.mxu1 %v2876_v34  ;;  %1063 = vmatpush.bf16.msrb.mxu2 %v2877_v51  ;;  %v3624_v34 = vld [vmem:[%s3985_s13 + $0x28] sm:$0xff]  ;;  %v3635_v51 = vld [vmem:[%s3985_s13] sm:$0xff] }
 0x4d2   :  { %v2586_v53 = vmul.f32 -1.442695, %v811_v6  ;;  %v2588_v10 = vmul.f32 -1.442695, %v844_v54  ;;  %v875_v8 = vpop.f32.mrf.mxu0 }
 0x4d4   :  { %3002 = vpow2.f32 %v2586_v53 }
 0x4d5   :  { %3004 = vpow2.f32 %v2588_v10 }
 0x4d7   :  { %v809_v9 = vpop.f32.mrf.mxu2  ;;  %v842_v3 = vpop.f32.mrf.mxu3 }
 0x4da   :  { %v3003_v11 = vpop.eup %3002 }
 0x4db   :  { %v3005_v12 = vpop.eup %3004  ;;  %v815_v13 = vadd.f32 1.0, %v3003_v11 }
 0x4dc   :  { %v848_v37 = vadd.f32 1.0, %v3005_v12 }
 0x4dd   :  { %3006 = vrcp.f32 %v815_v13  ;;  %v827_v18 = vand.u32 2147483648, %v815_v13  ;;  %v825_v17 = vand.u32 2147483647, %v815_v13  ;;  %vm821_vm9 = vweird.f32 %v815_v13 }
 0x4de   :  { %3008 = vrcp.f32 %v848_v37  ;;  %v860_v23 = vand.u32 2147483648, %v848_v37  ;;  %vm854_vm14 = vweird.f32 %v848_v37  ;;  %v858_v26 = vand.u32 2147483647, %v848_v37 }
 0x4df   :  { %v828_v29 = vor.u32 1.1754944e-38, %v827_v18  ;;  %vm826_vm12 = vcmp.eq.f32.partialorder %v825_v17, 8.507059e+37 }
 0x4e0   :  { %v861_v31 = vor.u32 1.1754944e-38, %v860_v23  ;;  %vm859_vm0 = vcmp.eq.f32.partialorder %v858_v26, 8.507059e+37  ;;  %v2879_v23 = vld [vmem:[%s3979_s7 + $0x18] sm:$0xff]  ;;  %v2880_v26 = vld [vmem:[%s3979_s7 + $0x20] sm:$0xff] }
 0x4e3   :  { %v3007_v14 = vpop.eup %3006 }
 0x4e4   :  { %v3009_v42 = vpop.eup %3008  ;;  %v817_v16 = vmul.f32 %v3007_v14, %v815_v13  ;;  %vm822_vm8 = vweird.f32 %v3007_v14 }
 0x4e5   :  { %v850_v5 = vmul.f32 %v3009_v42, %v848_v37  ;;  %vm823_vm11 = vmor %vm821_vm9, %vm822_vm8  ;;  %vm855_vm13 = vweird.f32 %v3009_v42 }
 0x4e6   :  { %v818_v15 = vsub.f32 1.0, %v817_v16  ;;  %vm856_vm15 = vmor %vm854_vm14, %vm855_vm13 }
 0x4e7   :  { %v851_v28 = vsub.f32 1.0, %v850_v5  ;;  %v198_v5 = vadd.f32 %v3342_v60, %v3397_v57 }
 0x4e8   :  { %v819_v20 = vmul.f32 %v3007_v14, %v818_v15 }
 0x4e9   :  { %v852_v50 = vmul.f32 %v3009_v42, %v851_v28 }
 0x4ea   :  { %v820_v21 = vadd.f32 %v3007_v14, %v819_v20 }
 0x4eb   :  { %v853_v41 = vadd.f32 %v3009_v42, %v852_v50 }
 0x4ec   :  { %v824_v39 = vsel %vm823_vm11, %v3007_v14, %v820_v21  ;;  %vm1011_vm11 = vcmask 130048  }
 0x4ed   :  { %v829_v19 = vsel %vm826_vm12, %v828_v29, %v824_v39  ;;  %v857_v38 = vsel %vm856_vm15, %v3009_v42, %v853_v41 }
 0x4ee   :  { %v877_v22 = vmul.f32 %v874_v7, %v829_v19  ;;  %v862_v33 = vsel %vm859_vm0, %v861_v31, %v857_v38  ;;  %v2882_v38 = vld [vmem:[%s3979_s7 + $0x30] sm:$0xff]  ;;  %v2883_v31 = vld [vmem:[%s3979_s7 + $0x38] sm:$0xff] }
 0x4ef   :  { %v880_v35 = vsub.f32 1.0, %v862_v33  ;;  %v882_v45 = vmul.f32 %v862_v33, %v793_v1  ;;  %v2875_v1 = vld [vmem:[%s3978_s5 + $0x8] sm:$0xff]  ;;  %v2915_v33 = vld [vmem:[%s3977_s6] ss:$0 sm:$0xff] }
 0x4f0   :  { %v878_v27 = vadd.f32 %v877_v22, %v196_v40  ;;  %1004 = vmatpush.bf16.msra.mxu0 %v2875_v1  ;;  %v2878_v22 = vld [vmem:[%s3979_s7 + $0x10] sm:$0xff]  ;;  %v2895_v1 = vld [vmem:[%s3983_s9 + $0x18] sm:$0xff] }
 0x4f1   :  { %1090 = vmatpush.bf16.msra.mxu3 %v2878_v22 }
 0x4f2   :  { %3010 = vtanh.f32 %v878_v27  ;;  %v2881_v27 = vld [vmem:[%s3979_s7 + $0x28] sm:$0xff] }
 0x4f4   :  { %1005 = vmatpush.bf16.msra.mxu0 %v2874_v32  ;;  %v2897_v32 = vld [vmem:[%s3983_s9 + $0x28] sm:$0xff] }
 0x4f8   :  { %v3011_v36 = vpop.eup %3010  ;;  %1117 = vmatpush.bf16.msrb.mxu0 %v2879_v23 }
 0x4f9   :  { %v881_v44 = vmul.f32 %v3011_v36, %v880_v35 }
 0x4fb   :  { %v3472_v46 = vadd.f32 %v882_v45, %v881_v44  ;;  %v2884_v45 = vld [vmem:[%s3982_s8] sm:$0xff] }
 0x4fd   :  { %v884_v56 = vpack.c.bf16 %v3472_v46, %v3472_v46 }
 0x4ff   :  { %2590 = vmatmul.msk.bf16.vlgmr.msrb.gmra.mxu1 %vm227_vm10, %v884_v56  ;;  %2592 = vmatmul.msk.bf16.vlgmr.msra.gmra.mxu2 %vm227_vm10, %v884_v56 }
 0x500   :  { %2594 = vmatmul.msk.bf16.vlgmr.msrb.gmra.mxu3 %vm227_vm10, %v884_v56  ;;  %1144 = vmatpush.bf16.msrb.mxu1 %v2880_v26  ;;  %v2886_v56 = vld [vmem:[%s3982_s8 + $0x10] sm:$0xff] }
 0x501   :  { %1171 = vmatpush.bf16.msra.mxu2 %v2881_v27  ;;  %1198 = vmatpush.bf16.msrb.mxu3 %v2882_v38 }
 0x57c   :  { %v897_v48 = vpop.f32.mrf.mxu1 }
 0x57d   :  { %v901_v49 = vadd.f32 %v897_v48, %v120_v47  ;;  %v2887_v47 = vld [vmem:[%s3982_s8 + $0x18] sm:$0xff] }
 0x57f   :  { %v2591_v52 = vmul.f32 -1.442695, %v901_v49  ;;  %v2888_v49 = vld [vmem:[%s3982_s8 + $0x20] sm:$0xff] }
 0x581   :  { %3012 = vpow2.f32 %v2591_v52  ;;  %v2889_v52 = vld [vmem:[%s3982_s8 + $0x28] sm:$0xff] }
 0x582   :  { %v930_v62 = vpop.f32.mrf.mxu2 }
 0x583   :  { %v934_v63 = vadd.f32 %v930_v62, %v159_v61  ;;  %v963_v0 = vpop.f32.mrf.mxu3  ;;  %v2890_v61 = vld [vmem:[%s3982_s8 + $0x30] sm:$0xff]  ;;  %v2891_v62 = vld [vmem:[%s3982_s8 + $0x38] sm:$0xff] }
 0x584   :  { %v899_v58 = vpop.f32.mrf.mxu1  ;;  %v964_v16 = vadd.f32 %v3337_v59, %v963_v0  ;;  %v2893_v0 = vld [vmem:[%s3983_s9 + $0x8] sm:$0xff] }
 0x585   :  { %v2593_v2 = vmul.f32 -1.442695, %v934_v63  ;;  %v2892_v63 = vld [vmem:[%s3983_s9] sm:$0xff]  ;;  %v2894_v58 = vld [vmem:[%s3983_s9 + $0x10] sm:$0xff] }
 0x587   :  { %v3013_v43 = vpop.eup %3012  ;;  %3014 = vpow2.f32 %v2593_v2  ;;  %v2896_v2 = vld [vmem:[%s3983_s9 + $0x20] sm:$0xff] }
 0x588   :  { %v905_v55 = vadd.f32 1.0, %v3013_v43  ;;  %v2898_v43 = vld [vmem:[%s3983_s9 + $0x30] sm:$0xff] }
 0x58a   :  { %3016 = vrcp.f32 %v905_v55  ;;  %v932_v25 = vpop.f32.mrf.mxu2  ;;  %v917_v8 = vand.u32 2147483648, %v905_v55  ;;  %v915_v3 = vand.u32 2147483647, %v905_v55  ;;  %vm911_vm3 = vweird.f32 %v905_v55 }
 0x58b   :  { %v965_v30 = vpop.f32.mrf.mxu3  ;;  %v3610_v25 = vld [vmem:[%s3985_s13 + $0x8] sm:$0xff] }
 0x58c   :  { %v918_v37 = vor.u32 1.1754944e-38, %v917_v8  ;;  %vm916_vm5 = vcmp.eq.f32.partialorder %v915_v3, 8.507059e+37  ;;  %v3615_v30 = vld [vmem:[%s3985_s13 + $0x18] sm:$0xff] }
 0x58d   :  { %v3015_v4 = vpop.eup %3014 }
 0x58e   :  { %v938_v6 = vadd.f32 1.0, %v3015_v4  ;;  %v3640_v4 = vld [vmem:[%s3985_s13 + $0x10] sm:$0xff] }
 0x590   :  { %v3017_v54 = vpop.eup %3016  ;;  %3018 = vrcp.f32 %v938_v6  ;;  %v950_v28 = vand.u32 2147483648, %v938_v6  ;;  %v948_v17 = vand.u32 2147483647, %v938_v6  ;;  %vm944_vm7 = vweird.f32 %v938_v6 }
 0x591   :  { %v907_v53 = vmul.f32 %v3017_v54, %v905_v55  ;;  %vm912_vm2 = vweird.f32 %v3017_v54  ;;  %v2899_v55 = vld [vmem:[%s3983_s9 + $0x38] sm:$0xff] }
 0x592   :  { %vm913_vm4 = vmor %vm911_vm3, %vm912_vm2  ;;  %v951_v29 = vor.u32 1.1754944e-38, %v950_v28  ;;  %vm949_vm9 = vcmp.eq.f32.partialorder %v948_v17, 8.507059e+37 }
 0x593   :  { %v908_v10 = vsub.f32 1.0, %v907_v53 }
 0x595   :  { %v909_v9 = vmul.f32 %v3017_v54, %v908_v10 }
 0x596   :  { %v3019_v11 = vpop.eup %3018 }
 0x597   :  { %v940_v12 = vmul.f32 %v3019_v11, %v938_v6  ;;  %v910_v13 = vadd.f32 %v3017_v54, %v909_v9  ;;  %vm945_vm6 = vweird.f32 %v3019_v11  ;;  %v3646_v6 = vld [vmem:[%s3985_s13 + $0x20] sm:$0xff] }
 0x598   :  { %vm946_vm8 = vmor %vm944_vm7, %vm945_vm6 }
 0x599   :  { %v941_v14 = vsub.f32 1.0, %v940_v12  ;;  %v914_v42 = vsel %vm913_vm4, %v3017_v54, %v910_v13 }
 0x59a   :  { %v919_v15 = vsel %vm916_vm5, %v918_v37, %v914_v42 }
 0x59b   :  { %v942_v18 = vmul.f32 %v3019_v11, %v941_v14  ;;  %v967_v20 = vmul.f32 %v964_v16, %v919_v15 }
 0x59d   :  { %v943_v50 = vadd.f32 %v3019_v11, %v942_v18  ;;  %v968_v21 = vadd.f32 %v967_v20, %v198_v5 }
 0x59f   :  { %v947_v7 = vsel %vm946_vm8, %v3019_v11, %v943_v50  ;;  %3020 = vtanh.f32 %v968_v21 }
 0x5a0   :  { %v952_v39 = vsel %vm949_vm9, %v951_v29, %v947_v7 }
 0x5a1   :  { %v970_v19 = vsub.f32 1.0, %v952_v39  ;;  %v972_v60 = vmul.f32 %v952_v39, %v3472_v46  ;;  %v2885_v46 = vld [vmem:[%s3982_s8 + $0x8] sm:$0xff] }
 0x5a5   :  { %v3021_v59 = vpop.eup %3020 }
 0x5a6   :  { %v971_v41 = vmul.f32 %v3021_v59, %v970_v19 }
 0x5a8   :  { %v973_v57 = vadd.f32 %v972_v60, %v971_v41 }
 0x5aa   :  { %v974_v40 = vpack.c.bf16 %v973_v57, %v973_v57 }
 0x5ac   :  { %2603 = vmatmul.msk.bf16.vlgmr.msra.gmra.mxu0 %vm227_vm10, %v974_v40 }
 0x5ad   :  { %1225 = vmatpush.bf16.msra.mxu0 %v2883_v31 }
 0x629   :  { %v1007_v35 = vpop.f32.mrf.mxu0 }
 0x62a   :  { %v1008_v36 = vadd.f32 %v2915_v33, %v1007_v35 }
 0x62c   :  { %1012 = vst.msk [vmem:[%s3981_s18] sm:$0xff] %vm1011_vm11, %v1008_v36  ;;  %v3525_v44 = vpack.c.bf16 %v1008_v36, %v1008_v36 }
 0x62e   :  { %2608 = vmatmul.msk.bf16.vlgmr.msra.gmra.mxu1 %vm1011_vm11, %v3525_v44  ;;  %2616 = vmatmul.msk.bf16.vlgmr.msrb.gmra.mxu2 %vm1011_vm11, %v3525_v44 }
 0x62f   :  { %2624 = vmatmul.msk.bf16.vlgmr.msra.gmra.mxu3 %vm1011_vm11, %v3525_v44  ;;  %2632 = vmatmul.msk.bf16.vlgmr.msrb.gmra.mxu0 %vm1011_vm11, %v3525_v44 }
 0x630   :  { %1250 = vmatpush.bf16.msra.mxu1 %v2884_v45  ;;  %1277 = vmatpush.bf16.msrb.mxu2 %v2885_v46 }
 0x631   :  { %v1009_v48 = vpop.f32.mrf.mxu0  ;;  %1304 = vmatpush.bf16.msra.mxu3 %v2886_v56  ;;  %1331 = vmatpush.bf16.msrb.mxu0 %v2887_v47 }
 0x63e   :  { %2640 = vmatmul.msk.bf16.vlgmr.msrb.gmra.mxu1 %vm1011_vm11, %v3525_v44  ;;  %2648 = vmatmul.msk.bf16.vlgmr.msra.gmra.mxu2 %vm1011_vm11, %v3525_v44 }
 0x63f   :  { %2656 = vmatmul.msk.bf16.vlgmr.msrb.gmra.mxu3 %vm1011_vm11, %v3525_v44  ;;  %2664 = vmatmul.msk.bf16.vlgmr.msra.gmra.mxu0 %vm1011_vm11, %v3525_v44 }
 0x640   :  { %1358 = vmatpush.bf16.msrb.mxu1 %v2888_v49  ;;  %1385 = vmatpush.bf16.msra.mxu2 %v2889_v52  ;;  %v2916_v49 = vld [vmem:[%s3980_s10] ss:$0 sm:$0xff] }
 0x641   :  { %1412 = vmatpush.bf16.msrb.mxu3 %v2890_v61  ;;  %1439 = vmatpush.bf16.msra.mxu0 %v2891_v62 }
 0x64e   :  { %2669 = vmatmul.msk.bf16.vlgmr.msra.gmra.mxu1 %vm1011_vm11, %v3525_v44  ;;  %2677 = vmatmul.msk.bf16.vlgmr.msrb.gmra.mxu2 %vm1011_vm11, %v3525_v44 }
 0x64f   :  { %2685 = vmatmul.msk.bf16.vlgmr.msra.gmra.mxu3 %vm1011_vm11, %v3525_v44  ;;  %2693 = vmatmul.msk.bf16.vlgmr.msrb.gmra.mxu0 %vm1011_vm11, %v3525_v44 }
 0x650   :  { %1464 = vmatpush.bf16.msra.mxu1 %v2892_v63  ;;  %1491 = vmatpush.bf16.msrb.mxu2 %v2893_v0  ;;  %v2924_v0 = vld [vmem:[%s3984_s11] ss:$0 sm:$0xff] }
 0x651   :  { %1518 = vmatpush.bf16.msra.mxu3 %v2894_v58  ;;  %1545 = vmatpush.bf16.msrb.mxu0 %v2895_v1 }
 0x65e   :  { %2701 = vmatmul.msk.bf16.vlgmr.msrb.gmra.mxu1 %vm1011_vm11, %v3525_v44  ;;  %2709 = vmatmul.msk.bf16.vlgmr.msra.gmra.mxu2 %vm1011_vm11, %v3525_v44 }
 0x65f   :  { %2717 = vmatmul.msk.bf16.vlgmr.msrb.gmra.mxu3 %vm1011_vm11, %v3525_v44  ;;  %2725 = vmatmul.msk.bf16.vlgmr.msra.gmra.mxu0 %vm1011_vm11, %v3525_v44 }
 0x660   :  { %1572 = vmatpush.bf16.msrb.mxu1 %v2896_v2  ;;  %1599 = vmatpush.bf16.msra.mxu2 %v2897_v32 }
 0x661   :  { %1626 = vmatpush.bf16.msrb.mxu3 %v2898_v43  ;;  %1653 = vmatpush.bf16.msra.mxu0 %v2899_v55 }
 0x66e   :  { %2730 = vmatmul.msk.bf16.vlgmr.msra.gmra.mxu1 %vm1011_vm11, %v3525_v44  ;;  %2738 = vmatmul.msk.bf16.vlgmr.msrb.gmra.mxu2 %vm1011_vm11, %v3525_v44 }
 0x66f   :  { %2746 = vmatmul.msk.bf16.vlgmr.msra.gmra.mxu3 %vm1011_vm11, %v3525_v44  ;;  %2754 = vmatmul.msk.bf16.vlgmr.msrb.gmra.mxu0 %vm1011_vm11, %v3525_v44 }
 0x670   :  { %1692 = vmatpush.bf16.msra.mxu1 %v3610_v25  ;;  %1737 = vmatpush.bf16.msrb.mxu2 %v3615_v30 }
 0x671   :  { %1785 = vmatpush.bf16.msra.mxu3 %v3624_v34  ;;  %1809 = vmatpush.bf16.msrb.mxu0 %v3610_v25 }
 0x674   :  { %1693 = vmatpush.bf16.msra.mxu1 %v3635_v51  ;;  %1738 = vmatpush.bf16.msrb.mxu2 %v3640_v4 }
 0x675   :  { %1786 = vmatpush.bf16.msra.mxu3 %v3646_v6  ;;  %1810 = vmatpush.bf16.msrb.mxu0 %v3635_v51 }
 0x67e   :  { %2762 = vmatmul.msk.bf16.vlgmr.msrb.gmra.mxu1 %vm1011_vm11, %v3525_v44  ;;  %2770 = vmatmul.msk.bf16.vlgmr.msra.gmra.mxu2 %vm1011_vm11, %v3525_v44 }
 0x67f   :  { %2778 = vmatmul.msk.bf16.vlgmr.msrb.gmra.mxu3 %vm1011_vm11, %v3525_v44  ;;  %2786 = vmatmul.msk.bf16.vlgmr.msra.gmra.mxu0 %vm1011_vm11, %v3525_v44 }
 0x680   :  { %1842 = vmatpush.bf16.msrb.mxu1 %v3615_v30  ;;  %1875 = vmatpush.bf16.msra.mxu2 %v3624_v34 }
 0x681   :  { %1899 = vmatpush.bf16.msrb.mxu3 %v3610_v25  ;;  %1932 = vmatpush.bf16.msra.mxu0 %v3615_v30 }
 0x684   :  { %1843 = vmatpush.bf16.msrb.mxu1 %v3640_v4  ;;  %1876 = vmatpush.bf16.msra.mxu2 %v3646_v6 }
 0x685   :  { %1900 = vmatpush.bf16.msrb.mxu3 %v3635_v51  ;;  %1933 = vmatpush.bf16.msra.mxu0 %v3640_v4 }
 0x68e   :  { %1694 = vmatmul.bf16.vlgmr.msra.gmra.mxu1 %v3103_v24  ;;  %1739 = vmatmul.bf16.vlgmr.msrb.gmra.mxu2 %v3103_v24 }
 0x68f   :  { %1787 = vmatmul.bf16.vlgmr.msra.gmra.mxu3 %v3103_v24  ;;  %1965 = vmatpush.bf16.msra.mxu1 %v3624_v34 }
 0x690   :  { %1989 = vmatpush.bf16.msrb.mxu2 %v3610_v25  ;;  %2022 = vmatpush.bf16.msra.mxu3 %v3615_v30 }
 0x693   :  { %1966 = vmatpush.bf16.msra.mxu1 %v3646_v6 }
 0x694   :  { %1990 = vmatpush.bf16.msrb.mxu2 %v3635_v51  ;;  %2023 = vmatpush.bf16.msra.mxu3 %v3640_v4 }
 0x6ab   :  { %v1038_v54 = vpop.f32.mrf.mxu1 }
 0x6ac   :  { %v3678_v53 = vpop.f32.mrf.mxu0  ;;  %v1039_v61 = vadd.f32 %v2916_v49, %v1038_v54 }
 0x6b1   :  { %v3680_v10 = vpop.f32.mrf.mxu2 }
 0x6b2   :  { %v3682_v8 = vpop.f32.mrf.mxu3 }
 0x6b3   :  { %v1040_v24 = vpop.f32.mrf.mxu1 }
 0x6b4   :  { %v1121_v9 = vpop.f32.mrf.mxu0 }
 0x6b9   :  { %v1067_v3 = vpop.f32.mrf.mxu2 }
 0x6ba   :  { %v1094_v11 = vpop.f32.mrf.mxu3 }
 0x6bb   :  { %v3684_v12 = vpop.f32.mrf.mxu1 }
 0x6bc   :  { %v3686_v13 = vpop.f32.mrf.mxu0 }
 0x6c1   :  { %v3688_v37 = vpop.f32.mrf.mxu2 }
 0x6c2   :  { %v3690_v14 = vpop.f32.mrf.mxu3 }
 0x6c3   :  { %v1148_v42 = vpop.f32.mrf.mxu1 }
 0x6c4   :  { %v1229_v16 = vpop.f32.mrf.mxu0 }
 0x6c9   :  { %v1175_v5 = vpop.f32.mrf.mxu2 }
 0x6ca   :  { %v1202_v15 = vpop.f32.mrf.mxu3 }
 0x6cb   :  { %v1252_v18 = vpop.f32.mrf.mxu1 }
 0x6cc   :  { %v3692_v28 = vpop.f32.mrf.mxu0  ;;  %v1253_v2 = vadd.f32 %v2924_v0, %v1252_v18  ;;  %v3729_v18 = vld [vmem:[%s3987_s14] ss:$0 sm:$0xff] }
 0x6d1   :  { %v3694_v20 = vpop.f32.mrf.mxu2 }
 0x6d2   :  { %v3696_v17 = vpop.f32.mrf.mxu3 }
 0x6d3   :  { %v1254_v50 = vpop.f32.mrf.mxu1 }
 0x6d4   :  { %v1335_v21 = vpop.f32.mrf.mxu0 }
 0x6d9   :  { %v1281_v29 = vpop.f32.mrf.mxu2 }
 0x6da   :  { %v1308_v7 = vpop.f32.mrf.mxu3 }
 0x6db   :  { %v3698_v39 = vpop.f32.mrf.mxu1 }
 0x6dc   :  { %v3700_v19 = vpop.f32.mrf.mxu0 }
 0x6e1   :  { %v3702_v59 = vpop.f32.mrf.mxu2 }
 0x6e2   :  { %v3704_v41 = vpop.f32.mrf.mxu3 }
 0x6e3   :  { %v1362_v60 = vpop.f32.mrf.mxu1 }
 0x6e4   :  { %v1443_v57 = vpop.f32.mrf.mxu0 }
 0x6e9   :  { %v1389_v40 = vpop.f32.mrf.mxu2 }
 0x6ea   :  { %v1416_v22 = vpop.f32.mrf.mxu3  ;;  %v2932_v40 = vld [vmem:[%s3986_s12] ss:$0 sm:$0xff] }
 0x6eb   :  { %v1466_v23 = vpop.f32.mrf.mxu1 }
 0x6ec   :  { %v3706_v26 = vpop.f32.mrf.mxu0 }
 0x6f1   :  { %v3708_v27 = vpop.f32.mrf.mxu2 }
 0x6f2   :  { %v3710_v38 = vpop.f32.mrf.mxu3 }
 0x6f3   :  { %v1468_v31 = vpop.f32.mrf.mxu1 }
 0x6f4   :  { %v1549_v33 = vpop.f32.mrf.mxu0 }
 0x6f9   :  { %v1495_v35 = vpop.f32.mrf.mxu2 }
 0x6fa   :  { %v1522_v36 = vpop.f32.mrf.mxu3 }
 0x6fb   :  { %v3712_v44 = vpop.f32.mrf.mxu1 }
 0x6fc   :  { %v3714_v45 = vpop.f32.mrf.mxu0 }
 0x701   :  { %v3716_v46 = vpop.f32.mrf.mxu2 }
 0x702   :  { %v3718_v56 = vpop.f32.mrf.mxu3 }
 0x703   :  { %v1576_v47 = vpop.f32.mrf.mxu1 }
 0x704   :  { %v1657_v48 = vpop.f32.mrf.mxu0 }
 0x705   :  { %v1467_v48 = vadd.f32 %v2932_v40, %v1466_v23 }
 0x709   :  { %v1603_v52 = vpop.f32.mrf.mxu2 }
 0x70a   :  { %v1630_v62 = vpop.f32.mrf.mxu3 }
 0x70b   :  { %v1695_v63 = vpop.f32.mrf.mxu1 }
 0x70c   :  { %v1699_v58 = vadd.f32 %v1695_v63, %v1039_v61 }
 0x70e   :  { %v2803_v1 = vmul.f32 -1.442695, %v1699_v58 }
 0x710   :  { %3022 = vpow2.f32 %v2803_v1 }
 0x711   :  { %v1740_v32 = vpop.f32.mrf.mxu2 }
 0x712   :  { %v1744_v43 = vadd.f32 %v1740_v32, %v1253_v2  ;;  %v1788_v55 = vpop.f32.mrf.mxu3 }
 0x713   :  { %v1697_v24 = vpop.f32.mrf.mxu1  ;;  %v1789_v33 = vadd.f32 %v3729_v18, %v1788_v55 }
 0x714   :  { %v2812_v9 = vmul.f32 -1.442695, %v1744_v43 }
 0x716   :  { %v3023_v3 = vpop.eup %3022  ;;  %3024 = vpow2.f32 %v2812_v9 }
 0x717   :  { %v1703_v11 = vadd.f32 1.0, %v3023_v3 }
 0x719   :  { %3026 = vrcp.f32 %v1703_v11  ;;  %v1742_v54 = vpop.f32.mrf.mxu2  ;;  %v1715_v29 = vand.u32 2147483648, %v1703_v11  ;;  %v1713_v60 = vand.u32 2147483647, %v1703_v11  ;;  %vm1709_vm13 = vweird.f32 %v1703_v11 }
 0x71a   :  { %v1790_v42 = vpop.f32.mrf.mxu3  ;;  %v2926_v54 = vld [vmem:[%s3984_s11 + $0x1] ss:$0 sm:$0xff] }
 0x71b   :  { %v1716_v35 = vor.u32 1.1754944e-38, %v1715_v29  ;;  %vm1714_vm15 = vcmp.eq.f32.partialorder %v1713_v60, 8.507059e+37 }
 0x71c   :  { %v3025_v16 = vpop.eup %3024 }
 0x71d   :  { %v1748_v5 = vadd.f32 1.0, %v3025_v16  ;;  %v1280_v16 = vadd.f32 %v2926_v54, %v3694_v20 }
 0x71f   :  { %v3027_v15 = vpop.eup %3026  ;;  %3028 = vrcp.f32 %v1748_v5  ;;  %v1760_v61 = vand.u32 2147483648, %v1748_v5  ;;  %v1758_v63 = vand.u32 2147483647, %v1748_v5  ;;  %vm1754_vm2 = vweird.f32 %v1748_v5 }
 0x720   :  { %v1705_v50 = vmul.f32 %v3027_v15, %v1703_v11  ;;  %vm1710_vm12 = vweird.f32 %v3027_v15  ;;  %v2918_v11 = vld [vmem:[%s3980_s10 + $0x1] ss:$0 sm:$0xff] }
 0x721   :  { %vm1711_vm14 = vmor %vm1709_vm13, %vm1710_vm12  ;;  %v1761_v1 = vor.u32 1.1754944e-38, %v1760_v61  ;;  %vm1759_vm4 = vcmp.eq.f32.partialorder %v1758_v63, 8.507059e+37  ;;  %v1066_v42 = vadd.f32 %v2918_v11, %v3680_v10 }
 0x722   :  { %v1706_v21 = vsub.f32 1.0, %v1705_v50 }
 0x724   :  { %v1707_v7 = vmul.f32 %v3027_v15, %v1706_v21 }
 0x725   :  { %v3029_v57 = vpop.eup %3028 }
 0x726   :  { %v1750_v22 = vmul.f32 %v3029_v57, %v1748_v5  ;;  %v1708_v31 = vadd.f32 %v3027_v15, %v1707_v7  ;;  %vm1755_vm0 = vweird.f32 %v3029_v57 }
 0x727   :  { %vm1756_vm3 = vmor %vm1754_vm2, %vm1755_vm0 }
 0x728   :  { %v1751_v36 = vsub.f32 1.0, %v1750_v22  ;;  %v1712_v47 = vsel %vm1711_vm14, %v3027_v15, %v1708_v31 }
 0x729   :  { %v1717_v49 = vsel %vm1714_vm15, %v1716_v35, %v1712_v47 }
 0x72a   :  { %v1752_v52 = vmul.f32 %v3029_v57, %v1751_v36  ;;  %v1792_v62 = vmul.f32 %v1789_v33, %v1717_v49 }
 0x72c   :  { %v1753_v0 = vadd.f32 %v3029_v57, %v1752_v52  ;;  %v1793_v58 = vadd.f32 %v1792_v62, %v1467_v48 }
 0x72e   :  { %v1757_v2 = vsel %vm1756_vm3, %v3029_v57, %v1753_v0  ;;  %3030 = vtanh.f32 %v1793_v58  ;;  %v2934_v58 = vld [vmem:[%s3986_s12 + $0x1] ss:$0 sm:$0xff] }
 0x72f   :  { %v1762_v32 = vsel %vm1759_vm4, %v1761_v1, %v1757_v2 }
 0x730   :  { %v1795_v43 = vsub.f32 1.0, %v1762_v32  ;;  %v1797_v9 = vmul.f32 0.0, %v1762_v32 }
 0x734   :  { %v3031_v55 = vpop.eup %3030 }
 0x735   :  { %v1796_v24 = vmul.f32 %v3031_v55, %v1795_v43 }
 0x737   :  { %v3735_v23 = vadd.f32 %v1797_v9, %v1796_v24  ;;  %v1494_v9 = vadd.f32 %v2934_v58, %v3708_v27 }
 0x739   :  { %v1799_v3 = vpack.c.bf16 %v3735_v23, %v3735_v23 }
 0x73b   :  { %2821 = vmatmul.msk.bf16.vlgmr.msrb.gmra.mxu0 %vm227_vm10, %v1799_v3  ;;  %2823 = vmatmul.msk.bf16.vlgmr.msrb.gmra.mxu1 %vm227_vm10, %v1799_v3 }
 0x73c   :  { %2825 = vmatmul.msk.bf16.vlgmr.msra.gmra.mxu2 %vm227_vm10, %v1799_v3  ;;  %2055 = vmatpush.bf16.msrb.mxu0 %v3624_v34 }
 0x73d   :  { %2079 = vmatpush.bf16.msrb.mxu1 %v3610_v25  ;;  %2112 = vmatpush.bf16.msra.mxu2 %v3615_v30 }
 0x740   :  { %2056 = vmatpush.bf16.msrb.mxu0 %v3646_v6 }
 0x741   :  { %2080 = vmatpush.bf16.msrb.mxu1 %v3635_v51  ;;  %2113 = vmatpush.bf16.msra.mxu2 %v3640_v4 }
 0x7b8   :  { %v1812_v5 = vpop.f32.mrf.mxu0  ;;  %v1845_v15 = vpop.f32.mrf.mxu1 }
 0x7b9   :  { %v1816_v50 = vadd.f32 %v1812_v5, %v1066_v42  ;;  %v1849_v21 = vadd.f32 %v1845_v15, %v1280_v16 }
 0x7bb   :  { %v2822_v29 = vmul.f32 -1.442695, %v1816_v50  ;;  %v2824_v7 = vmul.f32 -1.442695, %v1849_v21 }
 0x7bd   :  { %3032 = vpow2.f32 %v2822_v29 }
 0x7be   :  { %3034 = vpow2.f32 %v2824_v7 }
 0x7bf   :  { %v1878_v60 = vpop.f32.mrf.mxu2 }
 0x7c0   :  { %v1814_v57 = vpop.f32.mrf.mxu0  ;;  %v1847_v40 = vpop.f32.mrf.mxu1  ;;  %v1879_v43 = vadd.f32 %v3729_v18, %v1878_v60 }
 0x7c1   :  { %v2927_v57 = vld [vmem:[%s3984_s11 + $0x2] ss:$0 sm:$0xff] }
 0x7c2   :  { %v1307_v40 = vadd.f32 %v2927_v57, %v3696_v17 }
 0x7c3   :  { %v3033_v22 = vpop.eup %3032 }
 0x7c4   :  { %v3035_v31 = vpop.eup %3034  ;;  %v1820_v33 = vadd.f32 1.0, %v3033_v22 }
 0x7c5   :  { %v1853_v35 = vadd.f32 1.0, %v3035_v31  ;;  %v2919_v31 = vld [vmem:[%s3980_s10 + $0x2] ss:$0 sm:$0xff] }
 0x7c6   :  { %3036 = vrcp.f32 %v1820_v33  ;;  %v1832_v61 = vand.u32 2147483648, %v1820_v33  ;;  %v1830_v63 = vand.u32 2147483647, %v1820_v33  ;;  %vm1826_vm6 = vweird.f32 %v1820_v33 }
 0x7c7   :  { %3038 = vrcp.f32 %v1853_v35  ;;  %v1880_v10 = vpop.f32.mrf.mxu2  ;;  %v1865_v3 = vand.u32 2147483648, %v1853_v35  ;;  %vm1859_vm11 = vweird.f32 %v1853_v35  ;;  %v1863_v54 = vand.u32 2147483647, %v1853_v35 }
 0x7c8   :  { %v1833_v2 = vor.u32 1.1754944e-38, %v1832_v61  ;;  %vm1831_vm8 = vcmp.eq.f32.partialorder %v1830_v63, 8.507059e+37 }
 0x7c9   :  { %v1866_v5 = vor.u32 1.1754944e-38, %v1865_v3  ;;  %vm1864_vm13 = vcmp.eq.f32.partialorder %v1863_v54, 8.507059e+37 }
 0x7cc   :  { %v3037_v36 = vpop.eup %3036 }
 0x7cd   :  { %v3039_v20 = vpop.eup %3038  ;;  %v1822_v47 = vmul.f32 %v3037_v36, %v1820_v33  ;;  %vm1827_vm5 = vweird.f32 %v3037_v36 }
 0x7ce   :  { %v1855_v48 = vmul.f32 %v3039_v20, %v1853_v35  ;;  %vm1828_vm7 = vmor %vm1826_vm6, %vm1827_vm5  ;;  %vm1860_vm9 = vweird.f32 %v3039_v20 }
 0x7cf   :  { %v1823_v49 = vsub.f32 1.0, %v1822_v47  ;;  %vm1861_vm12 = vmor %vm1859_vm11, %vm1860_vm9 }
 0x7d0   :  { %v1856_v52 = vsub.f32 1.0, %v1855_v48 }
 0x7d1   :  { %v1824_v62 = vmul.f32 %v3037_v36, %v1823_v49 }
 0x7d2   :  { %v1857_v0 = vmul.f32 %v3039_v20, %v1856_v52 }
 0x7d3   :  { %v1825_v1 = vadd.f32 %v3037_v36, %v1824_v62 }
 0x7d4   :  { %v1858_v55 = vadd.f32 %v3039_v20, %v1857_v0 }
 0x7d5   :  { %v1829_v32 = vsel %vm1828_vm7, %v3037_v36, %v1825_v1  ;;  %v1093_v36 = vadd.f32 %v2919_v31, %v3682_v8 }
 0x7d6   :  { %v1834_v24 = vsel %vm1831_vm8, %v1833_v2, %v1829_v32  ;;  %v1862_v16 = vsel %vm1861_vm12, %v3039_v20, %v1858_v55 }
 0x7d7   :  { %v1882_v11 = vmul.f32 %v1879_v43, %v1834_v24  ;;  %v1867_v15 = vsel %vm1864_vm13, %v1866_v5, %v1862_v16 }
 0x7d8   :  { %v1885_v50 = vsub.f32 1.0, %v1867_v15  ;;  %v1887_v7 = vmul.f32 %v1867_v15, %v3735_v23 }
 0x7d9   :  { %v1883_v42 = vadd.f32 %v1882_v11, %v1494_v9  ;;  %v2935_v11 = vld [vmem:[%s3986_s12 + $0x2] ss:$0 sm:$0xff] }
 0x7db   :  { %3040 = vtanh.f32 %v1883_v42 }
 0x7e1   :  { %v3041_v21 = vpop.eup %3040 }
 0x7e2   :  { %v1886_v29 = vmul.f32 %v3041_v21, %v1885_v50  ;;  %v1521_v21 = vadd.f32 %v2935_v11, %v3710_v38 }
 0x7e4   :  { %v3762_v60 = vadd.f32 %v1887_v7, %v1886_v29 }
 0x7e6   :  { %v1889_v27 = vpack.c.bf16 %v3762_v60, %v3762_v60 }
 0x7e8   :  { %2826 = vmatmul.msk.bf16.vlgmr.msrb.gmra.mxu3 %vm227_vm10, %v1889_v27  ;;  %2828 = vmatmul.msk.bf16.vlgmr.msra.gmra.mxu0 %vm227_vm10, %v1889_v27 }
 0x7e9   :  { %2830 = vmatmul.msk.bf16.vlgmr.msra.gmra.mxu1 %vm227_vm10, %v1889_v27  ;;  %2145 = vmatpush.bf16.msrb.mxu3 %v3624_v34 }
 0x7ea   :  { %2169 = vmatpush.bf16.msra.mxu0 %v3610_v25  ;;  %2202 = vmatpush.bf16.msra.mxu1 %v3615_v30 }
 0x7ed   :  { %2146 = vmatpush.bf16.msrb.mxu3 %v3646_v6 }
 0x7ee   :  { %2170 = vmatpush.bf16.msra.mxu0 %v3635_v51  ;;  %2203 = vmatpush.bf16.msra.mxu1 %v3640_v4 }
 0x865   :  { %v1935_v22 = vpop.f32.mrf.mxu0 }
 0x866   :  { %v1939_v33 = vadd.f32 %v1935_v22, %v1307_v40  ;;  %v1968_v35 = vpop.f32.mrf.mxu1 }
 0x867   :  { %v1969_v16 = vadd.f32 %v3729_v18, %v1968_v35 }
 0x868   :  { %v2829_v10 = vmul.f32 -1.442695, %v1939_v33 }
 0x86a   :  { %3042 = vpow2.f32 %v2829_v10 }
 0x86b   :  { %v1902_v20 = vpop.f32.mrf.mxu3 }
 0x86c   :  { %v1906_v47 = vadd.f32 %v1902_v20, %v1093_v36 }
 0x86d   :  { %v1937_v48 = vpop.f32.mrf.mxu0 }
 0x86e   :  { %v2827_v49 = vmul.f32 -1.442695, %v1906_v47  ;;  %v1970_v52 = vpop.f32.mrf.mxu1  ;;  %v2917_v47 = vld [vmem:[%s3980_s10 + $0x3] ss:$0 sm:$0xff] }
 0x86f   :  { %v2925_v48 = vld [vmem:[%s3984_s11 + $0x3] ss:$0 sm:$0xff]  ;;  %v1120_v52 = vadd.f32 %v2917_v47, %v3678_v53 }
 0x870   :  { %v3043_v61 = vpop.eup %3042  ;;  %3044 = vpow2.f32 %v2827_v49 }
 0x871   :  { %v1943_v62 = vadd.f32 1.0, %v3043_v61  ;;  %v1334_v61 = vadd.f32 %v2925_v48, %v3692_v28 }
 0x873   :  { %v1904_v17 = vpop.f32.mrf.mxu3  ;;  %3046 = vrcp.f32 %v1943_v62  ;;  %v1955_v29 = vand.u32 2147483648, %v1943_v62  ;;  %vm1949_vm4 = vweird.f32 %v1943_v62  ;;  %v1953_v27 = vand.u32 2147483647, %v1943_v62 }
 0x875   :  { %v1956_v22 = vor.u32 1.1754944e-38, %v1955_v29  ;;  %vm1954_vm6 = vcmp.eq.f32.partialorder %v1953_v27, 8.507059e+37 }
 0x876   :  { %v3045_v63 = vpop.eup %3044 }
 0x877   :  { %v1910_v0 = vadd.f32 1.0, %v3045_v63 }
 0x879   :  { %3048 = vrcp.f32 %v1910_v0  ;;  %v3047_v58 = vpop.eup %3046  ;;  %v1922_v55 = vand.u32 2147483648, %v1910_v0  ;;  %v1920_v9 = vand.u32 2147483647, %v1910_v0  ;;  %vm1916_vm15 = vweird.f32 %v1910_v0 }
 0x87a   :  { %v1945_v1 = vmul.f32 %v3047_v58, %v1943_v62  ;;  %vm1950_vm3 = vweird.f32 %v3047_v58 }
 0x87b   :  { %v1923_v42 = vor.u32 1.1754944e-38, %v1922_v55  ;;  %vm1921_vm2 = vcmp.eq.f32.partialorder %v1920_v9, 8.507059e+37  ;;  %vm1951_vm5 = vmor %vm1949_vm4, %vm1950_vm3 }
 0x87c   :  { %v1946_v43 = vsub.f32 1.0, %v1945_v1 }
 0x87e   :  { %v1947_v3 = vmul.f32 %v3047_v58, %v1946_v43 }
 0x87f   :  { %v3049_v2 = vpop.eup %3048 }
 0x880   :  { %v1912_v32 = vmul.f32 %v3049_v2, %v1910_v0  ;;  %vm1917_vm14 = vweird.f32 %v3049_v2  ;;  %v1948_v15 = vadd.f32 %v3047_v58, %v1947_v3 }
 0x881   :  { %vm1918_vm0 = vmor %vm1916_vm15, %vm1917_vm14 }
 0x882   :  { %v1913_v8 = vsub.f32 1.0, %v1912_v32  ;;  %v1952_v40 = vsel %vm1951_vm5, %v3047_v58, %v1948_v15 }
 0x883   :  { %v1957_v31 = vsel %vm1954_vm6, %v1956_v22, %v1952_v40 }
 0x884   :  { %v1914_v24 = vmul.f32 %v3049_v2, %v1913_v8  ;;  %v1975_v33 = vsub.f32 1.0, %v1957_v31  ;;  %v1977_v10 = vmul.f32 %v1957_v31, %v3762_v60 }
 0x886   :  { %v1915_v54 = vadd.f32 %v3049_v2, %v1914_v24 }
 0x888   :  { %v1919_v5 = vsel %vm1918_vm0, %v3049_v2, %v1915_v54 }
 0x889   :  { %v1924_v50 = vsel %vm1921_vm2, %v1923_v42, %v1919_v5 }
 0x88a   :  { %v1972_v7 = vmul.f32 %v1969_v16, %v1924_v50 }
 0x88c   :  { %v1973_v57 = vadd.f32 %v1972_v7, %v1521_v21  ;;  %v2933_v21 = vld [vmem:[%s3986_s12 + $0x3] ss:$0 sm:$0xff] }
 0x88d   :  { %v1548_v31 = vadd.f32 %v2933_v21, %v3706_v26 }
 0x88e   :  { %3050 = vtanh.f32 %v1973_v57 }
 0x894   :  { %v3051_v35 = vpop.eup %3050 }
 0x895   :  { %v1976_v36 = vmul.f32 %v3051_v35, %v1975_v33 }
 0x897   :  { %v3789_v20 = vadd.f32 %v1977_v10, %v1976_v36 }
 0x899   :  { %v1979_v38 = vpack.c.bf16 %v3789_v20, %v3789_v20 }
 0x89b   :  { %2831 = vmatmul.msk.bf16.vlgmr.msrb.gmra.mxu2 %vm227_vm10, %v1979_v38  ;;  %2833 = vmatmul.msk.bf16.vlgmr.msra.gmra.mxu3 %vm227_vm10, %v1979_v38 }
 0x89c   :  { %2835 = vmatmul.msk.bf16.vlgmr.msrb.gmra.mxu0 %vm227_vm10, %v1979_v38  ;;  %2235 = vmatpush.bf16.msrb.mxu2 %v3624_v34 }
 0x89d   :  { %2259 = vmatpush.bf16.msra.mxu3 %v3610_v25  ;;  %2292 = vmatpush.bf16.msrb.mxu0 %v3615_v30 }
 0x8a0   :  { %2236 = vmatpush.bf16.msrb.mxu2 %v3646_v6 }
 0x8a1   :  { %2260 = vmatpush.bf16.msra.mxu3 %v3635_v51  ;;  %2293 = vmatpush.bf16.msrb.mxu0 %v3640_v4 }
 0x919   :  { %v2058_v49 = vpop.f32.mrf.mxu0 }
 0x91a   :  { %v2059_v27 = vadd.f32 %v3729_v18, %v2058_v49 }
 0x91e   :  { %v1992_v62 = vpop.f32.mrf.mxu2  ;;  %v2025_v17 = vpop.f32.mrf.mxu3 }
 0x91f   :  { %v1996_v63 = vadd.f32 %v1992_v62, %v1120_v52  ;;  %v2029_v0 = vadd.f32 %v2025_v17, %v1334_v61 }
 0x921   :  { %v2832_v58 = vmul.f32 -1.442695, %v1996_v63  ;;  %v2834_v1 = vmul.f32 -1.442695, %v2029_v0  ;;  %v2060_v2 = vpop.f32.mrf.mxu0  ;;  %v2920_v63 = vld [vmem:[%s3980_s10 + $0x4] ss:$0 sm:$0xff] }
 0x922   :  { %v1147_v0 = vadd.f32 %v2920_v63, %v3684_v12 }
 0x923   :  { %3052 = vpow2.f32 %v2832_v58 }
 0x924   :  { %3054 = vpow2.f32 %v2834_v1  ;;  %v2928_v1 = vld [vmem:[%s3984_s11 + $0x4] ss:$0 sm:$0xff] }
 0x926   :  { %v1994_v32 = vpop.f32.mrf.mxu2  ;;  %v2027_v43 = vpop.f32.mrf.mxu3 }
 0x929   :  { %v3053_v8 = vpop.eup %3052 }
 0x92a   :  { %v3055_v55 = vpop.eup %3054  ;;  %v2000_v24 = vadd.f32 1.0, %v3053_v8 }
 0x92b   :  { %v2033_v9 = vadd.f32 1.0, %v3055_v55 }
 0x92c   :  { %3056 = vrcp.f32 %v2000_v24  ;;  %v2012_v42 = vand.u32 2147483648, %v2000_v24  ;;  %v2010_v15 = vand.u32 2147483647, %v2000_v24  ;;  %vm2006_vm8 = vweird.f32 %v2000_v24 }
 0x92d   :  { %3058 = vrcp.f32 %v2033_v9  ;;  %v2045_v35 = vand.u32 2147483648, %v2033_v9  ;;  %vm2039_vm13 = vweird.f32 %v2033_v9  ;;  %v2043_v10 = vand.u32 2147483647, %v2033_v9 }
 0x92e   :  { %v2013_v7 = vor.u32 1.1754944e-38, %v2012_v42  ;;  %vm2011_vm11 = vcmp.eq.f32.partialorder %v2010_v15, 8.507059e+37  ;;  %v2936_v15 = vld [vmem:[%s3986_s12 + $0x4] ss:$0 sm:$0xff] }
 0x92f   :  { %v2046_v47 = vor.u32 1.1754944e-38, %v2045_v35  ;;  %vm2044_vm15 = vcmp.eq.f32.partialorder %v2043_v10, 8.507059e+37 }
 0x932   :  { %v3057_v53 = vpop.eup %3056 }
 0x933   :  { %v3059_v3 = vpop.eup %3058  ;;  %v2002_v28 = vmul.f32 %v3057_v53, %v2000_v24  ;;  %vm2007_vm7 = vweird.f32 %v3057_v53 }
 0x934   :  { %v2035_v11 = vmul.f32 %v3059_v3, %v2033_v9  ;;  %vm2008_vm9 = vmor %vm2006_vm8, %vm2007_vm7  ;;  %vm2040_vm12 = vweird.f32 %v3059_v3 }
 0x935   :  { %v2003_v54 = vsub.f32 1.0, %v2002_v28  ;;  %vm2041_vm14 = vmor %vm2039_vm13, %vm2040_vm12 }
 0x936   :  { %v2036_v16 = vsub.f32 1.0, %v2035_v11 }
 0x937   :  { %v2004_v5 = vmul.f32 %v3057_v53, %v2003_v54 }
 0x938   :  { %v2037_v50 = vmul.f32 %v3059_v3, %v2036_v16 }
 0x939   :  { %v2005_v29 = vadd.f32 %v3057_v53, %v2004_v5 }
 0x93a   :  { %v2038_v22 = vadd.f32 %v3059_v3, %v2037_v50 }
 0x93b   :  { %v2009_v57 = vsel %vm2008_vm9, %v3057_v53, %v2005_v29 }
 0x93c   :  { %v2014_v40 = vsel %vm2011_vm11, %v2013_v7, %v2009_v57  ;;  %v2042_v38 = vsel %vm2041_vm14, %v3059_v3, %v2038_v22 }
 0x93d   :  { %v2062_v33 = vmul.f32 %v2059_v27, %v2014_v40  ;;  %v2047_v48 = vsel %vm2044_vm15, %v2046_v47, %v2042_v38  ;;  %v1575_v40 = vadd.f32 %v2936_v15, %v3712_v44 }
 0x93e   :  { %v2065_v52 = vsub.f32 1.0, %v2047_v48  ;;  %v2067_v62 = vmul.f32 %v2047_v48, %v3789_v20 }
 0x93f   :  { %v2063_v36 = vadd.f32 %v2062_v33, %v1548_v31 }
 0x941   :  { %3060 = vtanh.f32 %v2063_v36 }
 0x947   :  { %v3061_v49 = vpop.eup %3060 }
 0x948   :  { %v2066_v61 = vmul.f32 %v3061_v49, %v2065_v52 }
 0x94a   :  { %v3816_v17 = vadd.f32 %v2067_v62, %v2066_v61 }
 0x94c   :  { %v2069_v26 = vpack.c.bf16 %v3816_v17, %v3816_v17 }
 0x94e   :  { %2836 = vmatmul.msk.bf16.vlgmr.msrb.gmra.mxu1 %vm227_vm10, %v2069_v26  ;;  %2838 = vmatmul.msk.bf16.vlgmr.msra.gmra.mxu2 %vm227_vm10, %v2069_v26 }
 0x94f   :  { %2840 = vmatmul.msk.bf16.vlgmr.msrb.gmra.mxu3 %vm227_vm10, %v2069_v26  ;;  %2325 = vmatpush.bf16.msrb.mxu1 %v3624_v34 }
 0x950   :  { %2349 = vmatpush.bf16.msra.mxu2 %v3610_v25  ;;  %2382 = vmatpush.bf16.msrb.mxu3 %v3615_v30  ;;  %v1361_v30 = vadd.f32 %v2928_v1, %v3698_v39 }
 0x953   :  { %2326 = vmatpush.bf16.msrb.mxu1 %v3646_v6 }
 0x954   :  { %2350 = vmatpush.bf16.msra.mxu2 %v3635_v51  ;;  %2383 = vmatpush.bf16.msrb.mxu3 %v3640_v4 }
 0x9cb   :  { %v2082_v58 = vpop.f32.mrf.mxu1 }
 0x9cc   :  { %v2086_v25 = vadd.f32 %v2082_v58, %v1147_v0  ;;  %v2922_v0 = vld [vmem:[%s3980_s10 + $0x5] ss:$0 sm:$0xff] }
 0x9cd   :  { %v2930_v58 = vld [vmem:[%s3984_s11 + $0x5] ss:$0 sm:$0xff]  ;;  %v1174_v1 = vadd.f32 %v2922_v0, %v3688_v37  ;;  %v2430_v0 = vpack.c.bf16 %v3816_v17, %v3789_v20 }
 0x9ce   :  { %v2837_v2 = vmul.f32 -1.442695, %v2086_v25  ;;  %v1388_v25 = vadd.f32 %v2930_v58, %v3702_v59  ;;  %v2907_v59 = vld [vmem:[%s3988_s15 + $0x8] sm:$0xff] }
 0x9d0   :  { %3062 = vpow2.f32 %v2837_v2 }
 0x9d1   :  { %v2115_v32 = vpop.f32.mrf.mxu2 }
 0x9d2   :  { %v2119_v51 = vadd.f32 %v2115_v32, %v1361_v30  ;;  %v2148_v43 = vpop.f32.mrf.mxu3 }
 0x9d3   :  { %v2084_v4 = vpop.f32.mrf.mxu1  ;;  %v2149_v57 = vadd.f32 %v3729_v18, %v2148_v43 }
 0x9d4   :  { %v2839_v8 = vmul.f32 -1.442695, %v2119_v51 }
 0x9d6   :  { %v3063_v55 = vpop.eup %3062  ;;  %3064 = vpow2.f32 %v2839_v8 }
 0x9d7   :  { %v2090_v24 = vadd.f32 1.0, %v3063_v55 }
 0x9d9   :  { %3066 = vrcp.f32 %v2090_v24  ;;  %v2117_v12 = vpop.f32.mrf.mxu2  ;;  %v2102_v42 = vand.u32 2147483648, %v2090_v24  ;;  %v2100_v16 = vand.u32 2147483647, %v2090_v24  ;;  %vm2096_vm2 = vweird.f32 %v2090_v24 }
 0x9da   :  { %v2150_v9 = vpop.f32.mrf.mxu3 }
 0x9db   :  { %v2103_v29 = vor.u32 1.1754944e-38, %v2102_v42  ;;  %vm2101_vm4 = vcmp.eq.f32.partialorder %v2100_v16, 8.507059e+37 }
 0x9dc   :  { %v3065_v53 = vpop.eup %3064 }
 0x9dd   :  { %v2123_v3 = vadd.f32 1.0, %v3065_v53  ;;  %v2906_v53 = vld [vmem:[%s3988_s15] sm:$0xff] }
 0x9df   :  { %v3067_v28 = vpop.eup %3066  ;;  %3068 = vrcp.f32 %v2123_v3  ;;  %v2135_v33 = vand.u32 2147483648, %v2123_v3  ;;  %v2133_v10 = vand.u32 2147483647, %v2123_v3  ;;  %vm2129_vm6 = vweird.f32 %v2123_v3 }
 0x9e0   :  { %v2092_v11 = vmul.f32 %v3067_v28, %v2090_v24  ;;  %vm2097_vm0 = vweird.f32 %v3067_v28 }
 0x9e1   :  { %vm2098_vm3 = vmor %vm2096_vm2, %vm2097_vm0  ;;  %v2136_v47 = vor.u32 1.1754944e-38, %v2135_v33  ;;  %vm2134_vm8 = vcmp.eq.f32.partialorder %v2133_v10, 8.507059e+37 }
 0x9e2   :  { %v2093_v54 = vsub.f32 1.0, %v2092_v11 }
 0x9e4   :  { %v2094_v39 = vmul.f32 %v3067_v28, %v2093_v54 }
 0x9e5   :  { %v3069_v5 = vpop.eup %3068 }
 0x9e6   :  { %v2125_v50 = vmul.f32 %v3069_v5, %v2123_v3  ;;  %v2095_v21 = vadd.f32 %v3067_v28, %v2094_v39  ;;  %vm2130_vm5 = vweird.f32 %v3069_v5 }
 0x9e7   :  { %vm2131_vm7 = vmor %vm2129_vm6, %vm2130_vm5 }
 0x9e8   :  { %v2126_v7 = vsub.f32 1.0, %v2125_v50  ;;  %v2099_v27 = vsel %vm2098_vm3, %v3067_v28, %v2095_v21  ;;  %v2938_v21 = vld [vmem:[%s3986_s12 + $0x5] ss:$0 sm:$0xff] }
 0x9e9   :  { %v2104_v22 = vsel %vm2101_vm4, %v2103_v29, %v2099_v27 }
 0x9ea   :  { %v2127_v31 = vmul.f32 %v3069_v5, %v2126_v7  ;;  %v2152_v35 = vmul.f32 %v2149_v57, %v2104_v22 }
 0x9ec   :  { %v2128_v36 = vadd.f32 %v3069_v5, %v2127_v31  ;;  %v2153_v38 = vadd.f32 %v2152_v35, %v1575_v40  ;;  %v1602_v31 = vadd.f32 %v2938_v21, %v3716_v46 }
 0x9ee   :  { %v2132_v48 = vsel %vm2131_vm7, %v3069_v5, %v2128_v36  ;;  %3070 = vtanh.f32 %v2153_v38 }
 0x9ef   :  { %v2137_v52 = vsel %vm2134_vm8, %v2136_v47, %v2132_v48 }
 0x9f0   :  { %v2155_v49 = vsub.f32 1.0, %v2137_v52  ;;  %v2157_v44 = vmul.f32 %v2137_v52, %v3816_v17 }
 0x9f4   :  { %v3071_v61 = vpop.eup %3070 }
 0x9f5   :  { %v2156_v62 = vmul.f32 %v3071_v61, %v2155_v49 }
 0x9f7   :  { %v3843_v26 = vadd.f32 %v2157_v44, %v2156_v62 }
 0x9f9   :  { %v2159_v63 = vpack.c.bf16 %v3843_v26, %v3843_v26 }
 0x9fb   :  { %2841 = vmatmul.msk.bf16.vlgmr.msra.gmra.mxu0 %vm227_vm10, %v2159_v63  ;;  %2843 = vmatmul.msk.bf16.vlgmr.msra.gmra.mxu1 %vm227_vm10, %v2159_v63 }
 0x9fc   :  { %2845 = vmatmul.msk.bf16.vlgmr.msrb.gmra.mxu2 %vm227_vm10, %v2159_v63  ;;  %2415 = vmatpush.bf16.msra.mxu0 %v3624_v34  ;;  %v2429_v63 = vpack.c.bf16 %v3762_v60, %v3735_v23  ;;  %v2923_v23 = vld [vmem:[%s3980_s10 + $0x6] ss:$0 sm:$0xff] }
 0x9fd   :  { %2471 = vmatpush.bf16.msra.mxu1 %v2907_v59 }
 0xa00   :  { %2416 = vmatpush.bf16.msra.mxu0 %v3646_v6 }
 0xa01   :  { %2472 = vmatpush.bf16.msra.mxu1 %v2906_v53 }
 0xa78   :  { %v2172_v2 = vpop.f32.mrf.mxu0  ;;  %v2205_v30 = vpop.f32.mrf.mxu1 }
 0xa79   :  { %v2176_v32 = vadd.f32 %v2172_v2, %v1174_v1  ;;  %v2209_v51 = vadd.f32 %v2205_v30, %v1388_v25  ;;  %v2931_v1 = vld [vmem:[%s3984_s11 + $0x6] ss:$0 sm:$0xff]  ;;  %v1201_v30 = vadd.f32 %v2923_v23, %v3690_v14 }
 0xa7a   :  { %v1415_v25 = vadd.f32 %v2931_v1, %v3704_v41 }
 0xa7b   :  { %v2842_v43 = vmul.f32 -1.442695, %v2176_v32  ;;  %v2844_v34 = vmul.f32 -1.442695, %v2209_v51 }
 0xa7d   :  { %3072 = vpow2.f32 %v2842_v43 }
 0xa7e   :  { %3074 = vpow2.f32 %v2844_v34 }
 0xa7f   :  { %v2238_v6 = vpop.f32.mrf.mxu2 }
 0xa80   :  { %v2174_v4 = vpop.f32.mrf.mxu0  ;;  %v2207_v8 = vpop.f32.mrf.mxu1  ;;  %v2239_v57 = vadd.f32 %v3729_v18, %v2238_v6 }
 0xa81   :  { %v3899_v8 = vld [vmem:[%s3989_s16] ss:$0 sm:$0xff] }
 0xa83   :  { %v3073_v55 = vpop.eup %3072 }
 0xa84   :  { %v3075_v24 = vpop.eup %3074  ;;  %v2180_v12 = vadd.f32 1.0, %v3073_v55 }
 0xa85   :  { %v2213_v9 = vadd.f32 1.0, %v3075_v24 }
 0xa86   :  { %3076 = vrcp.f32 %v2180_v12  ;;  %v2192_v16 = vand.u32 2147483648, %v2180_v12  ;;  %v2190_v15 = vand.u32 2147483647, %v2180_v12  ;;  %vm2186_vm11 = vweird.f32 %v2180_v12 }
 0xa87   :  { %3078 = vrcp.f32 %v2213_v9  ;;  %v2240_v37 = vpop.f32.mrf.mxu2  ;;  %v2225_v33 = vand.u32 2147483648, %v2213_v9  ;;  %vm2219_vm15 = vweird.f32 %v2213_v9  ;;  %v2223_v10 = vand.u32 2147483647, %v2213_v9 }
 0xa88   :  { %v2193_v7 = vor.u32 1.1754944e-38, %v2192_v16  ;;  %vm2191_vm13 = vcmp.eq.f32.partialorder %v2190_v15, 8.507059e+37  ;;  %v2939_v15 = vld [vmem:[%s3986_s12 + $0x6] ss:$0 sm:$0xff] }
 0xa89   :  { %v2226_v47 = vor.u32 1.1754944e-38, %v2225_v33  ;;  %vm2224_vm2 = vcmp.eq.f32.partialorder %v2223_v10, 8.507059e+37 }
 0xa8c   :  { %v3077_v3 = vpop.eup %3076 }
 0xa8d   :  { %v3079_v28 = vpop.eup %3078  ;;  %v2182_v11 = vmul.f32 %v3077_v3, %v2180_v12  ;;  %vm2187_vm9 = vweird.f32 %v3077_v3 }
 0xa8e   :  { %v2215_v54 = vmul.f32 %v3079_v28, %v2213_v9  ;;  %vm2188_vm12 = vmor %vm2186_vm11, %vm2187_vm9  ;;  %vm2220_vm14 = vweird.f32 %v3079_v28 }
 0xa8f   :  { %v2183_v42 = vsub.f32 1.0, %v2182_v11  ;;  %vm2221_vm0 = vmor %vm2219_vm15, %vm2220_vm14 }
 0xa90   :  { %v2216_v39 = vsub.f32 1.0, %v2215_v54 }
 0xa91   :  { %v2184_v5 = vmul.f32 %v3077_v3, %v2183_v42 }
 0xa92   :  { %v2217_v50 = vmul.f32 %v3079_v28, %v2216_v39 }
 0xa93   :  { %v2185_v29 = vadd.f32 %v3077_v3, %v2184_v5 }
 0xa94   :  { %v2218_v40 = vadd.f32 %v3079_v28, %v2217_v50 }
 0xa95   :  { %v2189_v27 = vsel %vm2188_vm12, %v3077_v3, %v2185_v29 }
 0xa96   :  { %v2194_v22 = vsel %vm2191_vm13, %v2193_v7, %v2189_v27  ;;  %v2222_v38 = vsel %vm2221_vm0, %v3079_v28, %v2218_v40 }
 0xa97   :  { %v2242_v35 = vmul.f32 %v2239_v57, %v2194_v22  ;;  %v2227_v48 = vsel %vm2224_vm2, %v2226_v47, %v2222_v38 }
 0xa98   :  { %v2245_v52 = vsub.f32 1.0, %v2227_v48  ;;  %v2247_v62 = vmul.f32 %v2227_v48, %v3843_v26 }
 0xa99   :  { %v2243_v36 = vadd.f32 %v2242_v35, %v1602_v31  ;;  %v1629_v31 = vadd.f32 %v2939_v15, %v3718_v56 }
 0xa9b   :  { %3080 = vtanh.f32 %v2243_v36 }
 0xaa1   :  { %v3081_v49 = vpop.eup %3080 }
 0xaa2   :  { %v2246_v61 = vmul.f32 %v3081_v49, %v2245_v52 }
 0xaa4   :  { %v3872_v44 = vadd.f32 %v2247_v62, %v2246_v61 }
 0xaa6   :  { %v2249_v46 = vpack.c.bf16 %v3872_v44, %v3872_v44  ;;  %v2431_v58 = vpack.c.bf16 %v3872_v44, %v3843_v26 }
 0xaa8   :  { %2846 = vmatmul.msk.bf16.vlgmr.msra.gmra.mxu3 %vm227_vm10, %v2249_v46  ;;  %2848 = vmatmul.msk.bf16.vlgmr.msrb.gmra.mxu0 %vm227_vm10, %v2249_v46 }
 0xaa9   :  { %2850 = vmatmul.msk.bf16.vlgmr.msrb.gmra.mxu1 %vm227_vm10, %v2249_v46 }
 0xab9   :  { %2864 = vmatmul.msk.bf16.vlgmr.msra.gmra.mxu1 %vm227_vm10, %v2429_v63 }
 0xac9   :  { %2865 = vmatmul.msk.bf16.gmra.mxu1 %vm227_vm10, %v2430_v0 }
 0xad9   :  { %2866 = vmatmul.msk.bf16.gmra.mxu1 %vm227_vm10, %v2431_v58 }
 0xb25   :  { %v2295_v2 = vpop.f32.mrf.mxu0 }
 0xb26   :  { %v2299_v60 = vadd.f32 %v2295_v2, %v1415_v25  ;;  %v2328_v20 = vpop.f32.mrf.mxu1  ;;  %v2921_v25 = vld [vmem:[%s3980_s10 + $0x7] ss:$0 sm:$0xff] }
 0xb27   :  { %v2329_v27 = vadd.f32 %v3729_v18, %v2328_v20  ;;  %v2929_v2 = vld [vmem:[%s3984_s11 + $0x7] ss:$0 sm:$0xff] }
 0xb28   :  { %v2849_v17 = vmul.f32 -1.442695, %v2299_v60  ;;  %v1228_v60 = vadd.f32 %v2921_v25, %v3686_v13  ;;  %v1442_v20 = vadd.f32 %v2929_v2, %v3700_v19 }
 0xb2a   :  { %3082 = vpow2.f32 %v2849_v17 }
 0xb2b   :  { %v2262_v26 = vpop.f32.mrf.mxu3 }
 0xb2c   :  { %v2266_v32 = vadd.f32 %v2262_v26, %v1201_v30 }
 0xb2d   :  { %v2297_v51 = vpop.f32.mrf.mxu0 }
 0xb2e   :  { %v2847_v43 = vmul.f32 -1.442695, %v2266_v32  ;;  %v2330_v34 = vpop.f32.mrf.mxu1 }
 0xb30   :  { %v3083_v6 = vpop.eup %3082  ;;  %3084 = vpow2.f32 %v2847_v43 }
 0xb31   :  { %v2303_v4 = vadd.f32 1.0, %v3083_v6 }
 0xb33   :  { %v2264_v41 = vpop.f32.mrf.mxu3  ;;  %3086 = vrcp.f32 %v2303_v4  ;;  %v2315_v33 = vand.u32 2147483648, %v2303_v4  ;;  %vm2309_vm8 = vweird.f32 %v2303_v4  ;;  %v2313_v10 = vand.u32 2147483647, %v2303_v4 }
 0xb35   :  { %v2316_v18 = vor.u32 1.1754944e-38, %v2315_v33  ;;  %vm2314_vm11 = vcmp.eq.f32.partialorder %v2313_v10, 8.507059e+37 }
 0xb36   :  { %v3085_v55 = vpop.eup %3084  ;;  %v2474_v24 = vpop.f32.mrf.mxu1 }
 0xb37   :  { %v2270_v12 = vadd.f32 1.0, %v3085_v55  ;;  %v2475_v14 = vadd.f32 %v3899_v8, %v2474_v24 }
 0xb39   :  { %3088 = vrcp.f32 %v2270_v12  ;;  %2494 = vst.msk [vmem:[%s3990_s17] sm:$0xff] %vm76_vm1, %v2475_v14  ;;  %v3087_v9 = vpop.eup %3086  ;;  %v2282_v42 = vand.u32 2147483648, %v2270_v12  ;;  %v2280_v16 = vand.u32 2147483647, %v2270_v12  ;;  %vm2276_vm4 = vweird.f32 %v2270_v12 }
 0xb3a   :  { %v2305_v37 = vmul.f32 %v3087_v9, %v2303_v4  ;;  %vm2310_vm7 = vweird.f32 %v3087_v9 }
 0xb3b   :  { %v2283_v29 = vor.u32 1.1754944e-38, %v2282_v42  ;;  %vm2281_vm6 = vcmp.eq.f32.partialorder %v2280_v16, 8.507059e+37  ;;  %vm2311_vm9 = vmor %vm2309_vm8, %vm2310_vm7  ;;  %v3102_v16 = vld [vmem:[%s3987_s14] ss:$0 sm:$0xff] }
 0xb3c   :  { %v2306_v11 = vsub.f32 1.0, %v2305_v37 }
 0xb3e   :  { %v2476_v59 = vpop.f32.mrf.mxu1  ;;  %v2307_v5 = vmul.f32 %v3087_v9, %v2306_v11 }
 0xb3f   :  { %v3089_v53 = vpop.eup %3088  ;;  %v2477_v3 = vadd.f32 %v3899_v8, %v2476_v59 }
 0xb40   :  { %v2272_v28 = vmul.f32 %v3089_v53, %v2270_v12  ;;  %vm2277_vm3 = vweird.f32 %v3089_v53  ;;  %v2308_v40 = vadd.f32 %v3087_v9, %v2307_v5 }
 0xb41   :  { %2495 = vst.msk [vmem:[%s3990_s17 + $0x8] sm:$0xff] %vm76_vm1, %v2477_v3  ;;  %vm2278_vm5 = vmor %vm2276_vm4, %vm2277_vm3 }
 0xb42   :  { %v2273_v54 = vsub.f32 1.0, %v2272_v28  ;;  %v2312_v38 = vsel %vm2311_vm9, %v3087_v9, %v2308_v40 }
 0xb43   :  { %v2317_v52 = vsel %vm2314_vm11, %v2316_v18, %v2312_v38 }
 0xb44   :  { %v2274_v39 = vmul.f32 %v3089_v53, %v2273_v54  ;;  %v2335_v56 = vsub.f32 1.0, %v2317_v52  ;;  %v2337_v61 = vmul.f32 %v2317_v52, %v3872_v44  ;;  %v2937_v54 = vld [vmem:[%s3986_s12 + $0x7] ss:$0 sm:$0xff] }
 0xb46   :  { %v2275_v50 = vadd.f32 %v3089_v53, %v2274_v39  ;;  %v2479_v21 = vpop.f32.mrf.mxu1 }
 0xb47   :  { %v2480_v7 = vadd.f32 %v3899_v8, %v2479_v21 }
 0xb48   :  { %v2279_v57 = vsel %vm2278_vm5, %v3089_v53, %v2275_v50 }
 0xb49   :  { %v2284_v22 = vsel %vm2281_vm6, %v2283_v29, %v2279_v57  ;;  %2496 = vst.msk [vmem:[%s3990_s17 + $0x10] sm:$0xff] %vm76_vm1, %v2480_v7  ;;  %v1656_v29 = vadd.f32 %v2937_v54, %v3714_v45 }
 0xb4a   :  { %v2332_v35 = vmul.f32 %v2329_v27, %v2284_v22 }
 0xb4c   :  { %v2333_v36 = vadd.f32 %v2332_v35, %v1629_v31 }
 0xb4e   :  { %3090 = vtanh.f32 %v2333_v36  ;;  %v2481_v47 = vpop.f32.mrf.mxu1 }
 0xb4f   :  { %v2482_v48 = vadd.f32 %v3899_v8, %v2481_v47 }
 0xb51   :  { %2497 = vst.msk [vmem:[%s3990_s17 + $0x18] sm:$0xff] %vm76_vm1, %v2482_v48 }
 0xb54   :  { %v3091_v49 = vpop.eup %3090 }
 0xb55   :  { %v2336_v62 = vmul.f32 %v3091_v49, %v2335_v56 }
 0xb56   :  { %v2484_v46 = vpop.f32.mrf.mxu1 }
 0xb57   :  { %v2485_v63 = vadd.f32 %v3899_v8, %v2484_v46  ;;  %v3928_v0 = vadd.f32 %v2337_v61, %v2336_v62 }
 0xb59   :  { %2498 = vst.msk [vmem:[%s3990_s17 + $0x20] sm:$0xff] %vm76_vm1, %v2485_v63  ;;  %v2339_v58 = vpack.c.bf16 %v3928_v0, %v3928_v0 }
 0xb5b   :  { %2851 = vmatmul.msk.bf16.vlgmr.msra.gmra.mxu2 %vm227_vm10, %v2339_v58  ;;  %2853 = vmatmul.msk.bf16.vlgmr.msrb.gmra.mxu3 %vm227_vm10, %v2339_v58 }
 0xb5c   :  { %2855 = vmatmul.msk.bf16.vlgmr.msra.gmra.mxu0 %vm227_vm10, %v2339_v58 }
 0xb5e   :  { %v2486_v44 = vpop.f32.mrf.mxu1 }
 0xb5f   :  { %v2487_v1 = vadd.f32 %v3899_v8, %v2486_v44 }
 0xb61   :  { %2499 = vst.msk [vmem:[%s3990_s17 + $0x28] sm:$0xff] %vm76_vm1, %v2487_v1 }
 0xbd9   :  { %v2418_v23 = vpop.f32.mrf.mxu0 }
 0xbda   :  { %v2419_v5 = vadd.f32 %v3102_v16, %v2418_v23 }
 0xbde   :  { %v2352_v17 = vpop.f32.mrf.mxu2  ;;  %v2385_v30 = vpop.f32.mrf.mxu3 }
 0xbdf   :  { %v2356_v26 = vadd.f32 %v2352_v17, %v1228_v60  ;;  %v2389_v32 = vadd.f32 %v2385_v30, %v1442_v20 }
 0xbe1   :  { %v2852_v51 = vmul.f32 -1.442695, %v2356_v26  ;;  %v2854_v43 = vmul.f32 -1.442695, %v2389_v32  ;;  %v2420_v34 = vpop.f32.mrf.mxu0 }
 0xbe3   :  { %3092 = vpow2.f32 %v2852_v51 }
 0xbe4   :  { %3094 = vpow2.f32 %v2854_v43 }
 0xbe6   :  { %v2354_v6 = vpop.f32.mrf.mxu2  ;;  %v2387_v4 = vpop.f32.mrf.mxu3 }
 0xbe9   :  { %v3093_v41 = vpop.eup %3092 }
 0xbea   :  { %v3095_v55 = vpop.eup %3094  ;;  %v2360_v24 = vadd.f32 1.0, %v3093_v41 }
 0xbeb   :  { %v2393_v12 = vadd.f32 1.0, %v3095_v55 }
 0xbec   :  { %3096 = vrcp.f32 %v2360_v24  ;;  %v2372_v59 = vand.u32 2147483648, %v2360_v24  ;;  %v2370_v28 = vand.u32 2147483647, %v2360_v24  ;;  %vm2366_vm13 = vweird.f32 %v2360_v24 }
 0xbed   :  { %3098 = vrcp.f32 %v2393_v12  ;;  %v2405_v27 = vand.u32 2147483648, %v2393_v12  ;;  %vm2399_vm2 = vweird.f32 %v2393_v12  ;;  %v2403_v57 = vand.u32 2147483647, %v2393_v12 }
 0xbee   :  { %v2373_v39 = vor.u32 1.1754944e-38, %v2372_v59  ;;  %vm2371_vm15 = vcmp.eq.f32.partialorder %v2370_v28, 8.507059e+37 }
 0xbef   :  { %v2406_v31 = vor.u32 1.1754944e-38, %v2405_v27  ;;  %vm2404_vm4 = vcmp.eq.f32.partialorder %v2403_v57, 8.507059e+37 }
 0xbf2   :  { %v3097_v13 = vpop.eup %3096 }
 0xbf3   :  { %v3099_v14 = vpop.eup %3098  ;;  %v2362_v19 = vmul.f32 %v3097_v13, %v2360_v24  ;;  %vm2367_vm12 = vweird.f32 %v3097_v13 }
 0xbf4   :  { %v2395_v9 = vmul.f32 %v3099_v14, %v2393_v12  ;;  %vm2368_vm14 = vmor %vm2366_vm13, %vm2367_vm12  ;;  %vm2400_vm0 = vweird.f32 %v3099_v14 }
 0xbf5   :  { %v2363_v37 = vsub.f32 1.0, %v2362_v19  ;;  %vm2401_vm3 = vmor %vm2399_vm2, %vm2400_vm0 }
 0xbf6   :  { %v2396_v53 = vsub.f32 1.0, %v2395_v9 }
 0xbf7   :  { %v2364_v3 = vmul.f32 %v3097_v13, %v2363_v37 }
 0xbf8   :  { %v2397_v11 = vmul.f32 %v3099_v14, %v2396_v53 }
 0xbf9   :  { %v2365_v42 = vadd.f32 %v3097_v13, %v2364_v3 }
 0xbfa   :  { %v2398_v21 = vadd.f32 %v3099_v14, %v2397_v11 }
 0xbfb   :  { %v2369_v15 = vsel %vm2368_vm14, %v3097_v13, %v2365_v42 }
 0xbfc   :  { %v2374_v50 = vsel %vm2371_vm15, %v2373_v39, %v2369_v15  ;;  %v2402_v22 = vsel %vm2401_vm3, %v3099_v14, %v2398_v21 }
 0xbfd   :  { %v2422_v7 = vmul.f32 %v2419_v5, %v2374_v50  ;;  %v2407_v33 = vsel %vm2404_vm4, %v2406_v31, %v2402_v22 }
 0xbfe   :  { %v2425_v35 = vsub.f32 1.0, %v2407_v33  ;;  %v2427_v38 = vmul.f32 %v2407_v33, %v3928_v0 }
 0xbff   :  { %v2423_v40 = vadd.f32 %v2422_v7, %v1656_v29 }
 0xc01   :  { %3100 = vtanh.f32 %v2423_v40 }
 0xc07   :  { %v3101_v10 = vpop.eup %3100 }
 0xc08   :  { %v2426_v36 = vmul.f32 %v3101_v10, %v2425_v35 }
 0xc0a   :  { %v2428_v18 = vadd.f32 %v2427_v38, %v2426_v36 }
 0xc0c   :  { %v2432_v47 = vpack.c.bf16 %v2428_v18, %v3928_v0 }
 0xc0e   :  { %2867 = vmatmul.msk.bf16.gmra.mxu1 %vm227_vm10, %v2432_v47 }
 0xc8b   :  { %v2489_v45 = vpop.f32.mrf.mxu1 }
 0xc8c   :  { %v2490_v48 = vadd.f32 %v3899_v8, %v2489_v45 }
 0xc8e   :  { %2500 = vst.msk [vmem:[%s3990_s17 + $0x30] sm:$0xff] %vm76_vm1, %v2490_v48 }
 0xc93   :  { %v2491_v52 = vpop.f32.mrf.mxu1 }
 0xc94   :  { %v2492_v56 = vadd.f32 %v3899_v8, %v2491_v52 }
 0xc96   :  { %2501 = vst.msk [vmem:[%s3990_s17 + $0x38] sm:$0xff] %vm76_vm1, %v2492_v56 }

</bundles_post_ra>
